<compile_context>
chip_gen: v6e
topology: v6e:2x2x1
jax: 0.10.0
libtpu: 0.0.40
codegen_flags: <defaults>
</compile_context>

<pallas_src>
import functools

import jax
import jax.numpy as jnp
import numpy as np
from jax.experimental import pallas as pl
from jax.experimental.pallas import tpu as pltpu


_MASK_NEG = -1e30  # finite "-inf": avoids NaN propagation for fully-masked rows


@functools.lru_cache(maxsize=None)
def _vmem_limit_bytes():
    """~80% of physical VMEM (v7x: ~51 MiB, v5e/v6e: ~102 MiB); 64 MiB fallback."""
    try:
        cap = getattr(pltpu.get_tpu_info(), "vmem_capacity_bytes", None)
    except Exception:
        cap = None
    if not cap:
        return 64 * 1024 * 1024
    return int(cap * 0.8)


def _pick_tile(n, target, gran=8):
    """Largest tile <= target that divides n and is a multiple of `gran`
    (8 for sublane dims, 128 for lane dims); falls back to the full extent."""
    if n <= target:
        return n
    start = target - (target % gran)
    for t in range(start, gran - 1, -gran):
        if n % t == 0:
            return t
    return n


def _layernorm(y, g, b, eps=1e-5):
    mu = jnp.mean(y, axis=-1, keepdims=True)
    var = jnp.mean((y - mu) ** 2, axis=-1, keepdims=True)
    return (y - mu) * jax.lax.rsqrt(var + eps) * g + b


# ----------------------------------------------------------------------------
# Pallas kernels
# ----------------------------------------------------------------------------

def add_dino_proj_kernel(x_ref, feat_ref, w_ref, o_ref):
    # o = x + feat @ W  (feat cast to bf16 in-kernel; f32 accumulation)
    o_ref[0] = x_ref[0] + jnp.dot(feat_ref[0].astype(jnp.bfloat16), w_ref[...],
                                  preferred_element_type=jnp.float32)


def geo_attn_kernel(xq_ref, kv_ref, qm_ref, kb_ref,
                    wq_ref, wk_ref, wv_ref, wm_ref,
                    g1_ref, b1_ref, w1a_ref, w1b_ref, w2_ref, g2_ref, b2_ref,
                    out_ref,
                    q_scr, o_scr, m_scr, l_scr, acc_scr,
                    *, nhead):
    """GeometryAttentionLayer forward for one (batch, q-tile) against one KV tile.

    grid = (B, n_q, n_kv); the KV axis is the reduction ('arbitrary') axis, with
    flash-style online-softmax state in scratch and the merge/MLP epilogue on the
    last KV step.
    """
    f32, bf16 = jnp.float32, jnp.bfloat16
    ki = pl.program_id(2)
    n_kv = pl.num_programs(2)

    xq = xq_ref[0]                                   # (tq, D) f32
    tq, D = xq.shape
    dh = D // nhead
    xq_b = xq.astype(bf16)

    # --- per-(b, q-tile) init: full-width Q projection + flash state ----------
    @pl.when(ki == 0)
    def _():
        # (tq, D) @ (D, D): full MXU width; 1/sqrt(dh) folded into Wq
        q = jnp.dot(xq_b, wq_ref[...], preferred_element_type=f32)
        q_scr[...] = q.astype(bf16)
        m_scr[...] = jnp.full_like(m_scr, _MASK_NEG)
        l_scr[...] = jnp.zeros_like(l_scr)
        acc_scr[...] = jnp.zeros_like(acc_scr)

    # --- full-width K / V projections for this KV tile ------------------------
    kvb = kv_ref[0].astype(bf16)                     # (tk, D)
    k = jnp.dot(kvb, wk_ref[...], preferred_element_type=f32).astype(bf16)   # (tk, D)
    v = jnp.dot(kvb, wv_ref[...], preferred_element_type=f32).astype(bf16)   # (tk, D)

    # additive mask bias: _MASK_NEG where (valid query) & (padded key), else 0
    bias = qm_ref[0] * kb_ref[0]                     # (tq,1) * (1,tk) -> (tq, tk)

    q_all = q_scr[...]                               # (tq, D) bf16

    # --- per-head online softmax (heads unrolled; 2-D matmuls on lane slices) --
    for h in range(nhead):
        sl = slice(h * dh, (h + 1) * dh)
        logits = jnp.einsum('ld,sd->ls', q_all[:, sl], k[:, sl],
                            preferred_element_type=f32) + bias               # (tq, tk)
        m_prev = m_scr[h]                                                    # (tq, 1)
        m_new = jnp.maximum(m_prev, jnp.max(logits, axis=-1, keepdims=True))
        alpha = jnp.exp(m_prev - m_new)
        p = jnp.exp(logits - m_new)                                          # (tq, tk)
        l_scr[h] = alpha * l_scr[h] + jnp.sum(p, axis=-1, keepdims=True)
        acc_scr[:, sl] = alpha * acc_scr[:, sl] + jnp.dot(
            p.astype(bf16), v[:, sl], preferred_element_type=f32)
        m_scr[h] = m_new

    # --- epilogue on last KV tile: merge + LN + MLP + LN + residual -----------
    @pl.when(ki == n_kv - 1)
    def _():
        # normalize per head (VPU) into a bf16 (tq, D) buffer, then ONE K=D merge matmul
        for h in range(nhead):
            sl = slice(h * dh, (h + 1) * dh)
            inv = pl.reciprocal(l_scr[h], approx=True)                       # (tq, 1)
            o_scr[:, sl] = (acc_scr[:, sl] * inv).astype(bf16)
        msg = jnp.dot(o_scr[...], wm_ref[...], preferred_element_type=f32)   # (tq, D)
        msg = _layernorm(msg, g1_ref[...], b1_ref[...])
        # concat([x, msg]) @ W1 == x @ W1[:D] + msg @ W1[D:]  (weights split on host)
        hid = jnp.maximum(
            jnp.dot(xq_b, w1a_ref[...], preferred_element_type=f32)
            + jnp.dot(msg.astype(bf16), w1b_ref[...], preferred_element_type=f32),
            0.0).astype(bf16)                                                # fused ReLU + cast
        msg = jnp.dot(hid, w2_ref[...], preferred_element_type=f32)          # (tq, D)
        msg = _layernorm(msg, g2_ref[...], b2_ref[...])
        out_ref[0] = xq + msg


# ----------------------------------------------------------------------------
# Wrappers around pallas_call
# ----------------------------------------------------------------------------

def _add_dino_proj(x, feat2d, w_bf16):
    """x + feat2d @ dino_w, fused (one kernel, no separate proj2d buffer)."""
    B, L, D = x.shape
    F = feat2d.shape[-1]
    tr = _pick_tile(L, 512, gran=8)
    n_r = L // tr
    return pl.pallas_call(
        add_dino_proj_kernel,
        out_shape=jax.ShapeDtypeStruct((B, L, D), jnp.float32),
        grid=(B, n_r),
        in_specs=[
            pl.BlockSpec((1, tr, D), lambda b, r: (b, r, 0)),
            pl.BlockSpec((1, tr, F), lambda b, r: (b, r, 0)),
            pl.BlockSpec((F, D), lambda b, r: (0, 0)),
        ],
        out_specs=pl.BlockSpec((1, tr, D), lambda b, r: (b, r, 0)),
        compiler_params=pltpu.CompilerParams(
            dimension_semantics=("parallel", "parallel"),
            vmem_limit_bytes=_vmem_limit_bytes()),
    )(x, feat2d, w_bf16)


def _attention_layer(wp, x, source, qm, kbias, nhead):
    """One GeometryAttentionLayer (works for both self- and cross-attention)."""
    B, L, D = x.shape
    S = source.shape[1]
    tq = _pick_tile(L, 256, gran=8)     # sublane dim of x / out blocks
    tk = _pick_tile(S, 512, gran=128)   # lane dim of the key-bias block -> 128-granular
    n_q, n_kv = L // tq, S // tk

    kernel = functools.partial(geo_attn_kernel, nhead=nhead)
    const = lambda shape: pl.BlockSpec(shape, lambda b, qi, ki: (0,) * len(shape))

    return pl.pallas_call(
        kernel,
        out_shape=jax.ShapeDtypeStruct((B, L, D), jnp.float32),
        grid=(B, n_q, n_kv),
        in_specs=[
            pl.BlockSpec((1, tq, D), lambda b, qi, ki: (b, qi, 0)),   # x query tile
            pl.BlockSpec((1, tk, D), lambda b, qi, ki: (b, ki, 0)),   # source KV tile
            pl.BlockSpec((1, tq, 1), lambda b, qi, ki: (b, qi, 0)),   # query valid (1/0)
            pl.BlockSpec((1, 1, tk), lambda b, qi, ki: (b, 0, ki)),   # key bias (0/_MASK_NEG)
            const((D, D)), const((D, D)), const((D, D)),              # Wq(scaled), Wk, Wv
            const((D, D)),                                            # Wmerge
            const((1, D)), const((1, D)),                             # norm1 gamma/beta
            const((D, 2 * D)), const((D, 2 * D)),                     # MLP W1 split (x / msg)
            const((2 * D, D)),                                        # MLP W2
            const((1, D)), const((1, D)),                             # norm2 gamma/beta
        ],
        out_specs=pl.BlockSpec((1, tq, D), lambda b, qi, ki: (b, qi, 0)),
        scratch_shapes=[
            pltpu.VMEM((tq, D), jnp.bfloat16),        # projected Q (computed at ki == 0)
            pltpu.VMEM((tq, D), jnp.bfloat16),        # normalized attention output (merge in)
            pltpu.VMEM((nhead, tq, 1), jnp.float32),  # running max
            pltpu.VMEM((nhead, tq, 1), jnp.float32),  # running denominator
            pltpu.VMEM((tq, D), jnp.float32),         # running numerator (heads along lanes)
        ],
        compiler_params=pltpu.CompilerParams(
            dimension_semantics=("parallel", "parallel", "arbitrary"),
            vmem_limit_bytes=_vmem_limit_bytes()),
    )(x, source, qm, kbias,
      wp['wq'], wp['wk'], wp['wv'], wp['wm'],
      wp['g1'], wp['b1'], wp['w1a'], wp['w1b'], wp['w2'], wp['g2'], wp['b2'])


# ----------------------------------------------------------------------------
# Weight prep (hoisted: run once at model load) and the forward pass
# ----------------------------------------------------------------------------

def prepare_params(params, nhead):
    """bf16 casts, 1/sqrt(dh) fold into Wq, W1 split.  Weights stay full-width (D,D)."""
    bf = lambda a: a.astype(jnp.bfloat16)
    prepared = {'dino_w': bf(params['dino_w'])}
    layers = []
    for p in params['layers']:
        D = p['wq'].shape[0]
        scale = 1.0 / ((D // nhead) ** 0.5)
        layers.append({
            'wq': bf(p['wq'] * scale),   # (D, D)
            'wk': bf(p['wk']),           # (D, D)
            'wv': bf(p['wv']),           # (D, D)
            'wm': bf(p['wm']),           # (D, D)
            'g1': p['g1'], 'b1': p['b1'],
            'w1a': bf(p['w1'][:D]),      # (D, 2D)   -- x half of concat
            'w1b': bf(p['w1'][D:]),      # (D, 2D)   -- message half of concat
            'w2': bf(p['w2']),           # (2D, D)
            'g2': p['g2'], 'b2': p['b2'],
        })
    prepared['layers'] = layers
    return prepared


def semantic_transformer_forward(prepared, layer_types, nhead,
                                 src_feat, tgt_feat, src_mask, tgt_mask,
                                 src_2dfeat, tgt_2dfeat):
    f32 = jnp.float32
    qm_s = src_mask.astype(f32)[:, :, None]                          # (B, L, 1)
    qm_t = tgt_mask.astype(f32)[:, :, None]
    kb_s = jnp.where(src_mask, 0.0, _MASK_NEG).astype(f32)[:, None, :]   # (B, 1, S)
    kb_t = jnp.where(tgt_mask, 0.0, _MASK_NEG).astype(f32)[:, None, :]

    dino_w = prepared['dino_w']
    for wp, name in zip(prepared['layers'], layer_types):
        if name == 'self':
            # PyTorch: src_feat = src_feat + dino_proj(src_2dfeat); layer(src, src)
            src_feat = _add_dino_proj(src_feat, src_2dfeat, dino_w)
            tgt_feat = _add_dino_proj(tgt_feat, tgt_2dfeat, dino_w)
            src_feat = _attention_layer(wp, src_feat, src_feat, qm_s, kb_s, nhead)
            tgt_feat = _attention_layer(wp, tgt_feat, tgt_feat, qm_t, kb_t, nhead)
        elif name == 'cross':
            # sequential on purpose: tgt attends to the UPDATED src (matches PyTorch)
            src_feat = _attention_layer(wp, src_feat, tgt_feat, qm_s, kb_t, nhead)
            tgt_feat = _attention_layer(wp, tgt_feat, src_feat, qm_t, kb_s, nhead)
        else:
            raise KeyError(name)

    # semantic_subspace_cross branch unreachable (src_sub_ind_padded is None)
    return src_feat, tgt_feat, None, None


# ----------------------------------------------------------------------------
# Pure-JAX references (PyTorch einsum formulation), precision-parameterized
# ----------------------------------------------------------------------------

def _geo_layer_ref(p, x, source, x_mask, kv_mask, nhead, mm_dtype):
    c = lambda a: a.astype(mm_dtype)
    f32 = jnp.float32
    B, L, D = x.shape
    S = source.shape[1]
    dh = D // nhead
    qw = jnp.einsum('blc,cd->bld', c(x), c(p['wq']),
                    preferred_element_type=f32).reshape(B, L, nhead, dh)
    kw = jnp.einsum('blc,cd->bld', c(source), c(p['wk']),
                    preferred_element_type=f32).reshape(B, S, nhead, dh)
    vw = jnp.einsum('blc,cd->bld', c(source), c(p['wv']),
                    preferred_element_type=f32).reshape(B, S, nhead, dh)
    a = jnp.einsum('nlhd,nshd->nlsh', c(qw), c(kw), preferred_element_type=f32)
    mask = x_mask[:, :, None, None] & (~kv_mask)[:, None, :, None]
    a = jnp.where(mask, -jnp.inf, a)
    a = a / dh ** 0.5
    a = jax.nn.softmax(a, axis=2)
    o = jnp.einsum('nlsh,nshd->nlhd', c(a), c(vw),
                   preferred_element_type=f32).reshape(B, L, D)
    msg = _layernorm(jnp.einsum('bld,dc->blc', c(o), c(p['wm']),
                                preferred_element_type=f32), p['g1'], p['b1'])
    cat = jnp.concatenate([x, msg], axis=-1)
    hid = jnp.maximum(jnp.einsum('bld,df->blf', c(cat), c(p['w1']),
                                 preferred_element_type=f32), 0.0)
    msg = jnp.einsum('blf,fd->bld', c(hid), c(p['w2']), preferred_element_type=f32)
    msg = _layernorm(msg, p['g2'], p['b2'])
    return x + msg


def _forward_ref(params, layer_types, nhead, src_feat, tgt_feat,
                 src_mask, tgt_mask, src_2dfeat, tgt_2dfeat, mm_dtype=jnp.float32):
    c = lambda a: a.astype(mm_dtype)
    f32 = jnp.float32
    src_2d = jnp.einsum('blf,fd->bld', c(src_2dfeat), c(params['dino_w']),
                        preferred_element_type=f32)
    tgt_2d = jnp.einsum('blf,fd->bld', c(tgt_2dfeat), c(params['dino_w']),
                        preferred_element_type=f32)
    for lp, name in zip(params['layers'], layer_types):
        if name == 'self':
            src_feat = src_feat + src_2d
            tgt_feat = tgt_feat + tgt_2d
            src_feat = _geo_layer_ref(lp, src_feat, src_feat, src_mask, src_mask,
                                      nhead, mm_dtype)
            tgt_feat = _geo_layer_ref(lp, tgt_feat, tgt_feat, tgt_mask, tgt_mask,
                                      nhead, mm_dtype)
        else:
            src_feat = _geo_layer_ref(lp, src_feat, tgt_feat, src_mask, tgt_mask,
                                      nhead, mm_dtype)
            tgt_feat = _geo_layer_ref(lp, tgt_feat, src_feat, tgt_mask, src_mask,
                                      nhead, mm_dtype)
    return src_feat, tgt_feat


# ----------------------------------------------------------------------------
# Deterministic parameter init (synthetic; shapes follow the module __init__)
# ----------------------------------------------------------------------------

def init_params(key, d_model, layer_types, dino_dim=384):
    keys = jax.random.split(key, 1 + len(layer_types))
    params = {'dino_w': 0.05 * jax.random.normal(keys[0], (dino_dim, d_model),
                                                 jnp.float32)}
    layers = []
    for i, _ in enumerate(layer_types):
        k = jax.random.split(keys[i + 1], 6)
        D = d_model
        layers.append({
            'wq': 0.1 * jax.random.normal(k[0], (D, D), jnp.float32),
            'wk': 0.1 * jax.random.normal(k[1], (D, D), jnp.float32),
            'wv': 0.1 * jax.random.normal(k[2], (D, D), jnp.float32),
            'wm': 0.1 * jax.random.normal(k[3], (D, D), jnp.float32),
            'g1': jnp.ones((1, D), jnp.float32),
            'b1': jnp.zeros((1, D), jnp.float32),
            'w1': 0.1 * jax.random.normal(k[4], (2 * D, 2 * D), jnp.float32),
            'w2': 0.1 * jax.random.normal(k[5], (2 * D, D), jnp.float32),
            'g2': jnp.ones((1, D), jnp.float32),
            'b2': jnp.zeros((1, D), jnp.float32),
        })
    params['layers'] = layers
    return params


# ----------------------------------------------------------------------------
# Demo
# ----------------------------------------------------------------------------

if __name__ == "__main__":
    B, L, D, NHEAD, DINO = 2, 16, 32, 4, 384
    layer_types = ['self', 'cross']

    key = jax.random.PRNGKey(0)
    kp, k1, k2, k3, k4 = jax.random.split(key, 5)
    params = init_params(kp, D, layer_types, DINO)
    prepared = prepare_params(params, NHEAD)   # hoisted: runs once at model load

    src_feat = jax.random.normal(k1, (B, L, D), jnp.float32)
    tgt_feat = jax.random.normal(k2, (B, L, D), jnp.float32)
    src_2dfeat = jax.random.normal(k3, (B, L, DINO), jnp.float32)
    tgt_2dfeat = jax.random.normal(k4, (B, L, DINO), jnp.float32)

    # True = valid point; keep at least one valid key per batch element.
    src_mask = jnp.arange(L)[None, :] < jnp.array([[12], [14]])
    tgt_mask = jnp.arange(L)[None, :] < jnp.array([[15], [10]])

    fwd = jax.jit(semantic_transformer_forward, static_argnums=(1, 2))
    out = fwd(prepared, tuple(layer_types), NHEAD,
              src_feat, tgt_feat, src_mask, tgt_mask, src_2dfeat, tgt_2dfeat)
    src_out, tgt_out, sem_src, sem_tgt = jax.block_until_ready(out)

    # (1) reference with the same precision policy (bf16 matmuls, f32 accumulate):
    #     loose enough to absorb approx-reciprocal / accumulation-order deltas.
    ref_src_b, ref_tgt_b = _forward_ref(params, layer_types, NHEAD,
                                        src_feat, tgt_feat, src_mask, tgt_mask,
                                        src_2dfeat, tgt_2dfeat,
                                        mm_dtype=jnp.bfloat16)
    np.testing.assert_allclose(np.asarray(src_out), np.asarray(ref_src_b),
                               rtol=5e-2, atol=5e-2)
    np.testing.assert_allclose(np.asarray(tgt_out), np.asarray(ref_tgt_b),
                               rtol=5e-2, atol=5e-2)

    # (2) full-f32 PyTorch-semantics reference: coarse check on overall semantics.
    ref_src_f, ref_tgt_f = _forward_ref(params, layer_types, NHEAD,
                                        src_feat, tgt_feat, src_mask, tgt_mask,
                                        src_2dfeat, tgt_2dfeat,
                                        mm_dtype=jnp.float32)
    np.testing.assert_allclose(np.asarray(src_out), np.asarray(ref_src_f),
                               rtol=1e-1, atol=1e-1)
    np.testing.assert_allclose(np.asarray(tgt_out), np.asarray(ref_tgt_f),
                               rtol=1e-1, atol=1e-1)

    assert sem_src is None and sem_tgt is None

    print("KERNEL_OK")
</pallas_src>

<mosaic_0001>
module attributes {stable_mosaic.version = 11 : i64} {
  func.func @add_dino_proj_kernel(%arg0: i32, %arg1: i32, %arg2: memref<1x16x32xf32, #tpu.memory_space<vmem>>, %arg3: memref<1x16x384xf32, #tpu.memory_space<vmem>>, %arg4: memref<384x32xbf16, #tpu.memory_space<vmem>>, %arg5: memref<1x16x32xf32, #tpu.memory_space<vmem>>) attributes {dimension_semantics = [#tpu.dimension_semantics<parallel>, #tpu.dimension_semantics<parallel>], iteration_bounds = array<i64: 2, 1>, scalar_prefetch = 0 : i64, scratch_operands = 0 : i64, tpu.core_type = #tpu.core_type<tc>, window_params = [{transform_indices = @transform_0, window_bounds = array<i64: 1, 16, 32>}, {transform_indices = @transform_1, window_bounds = array<i64: 1, 16, 384>}, {pipeline_mode = #tpu.pipeline_mode<synchronous>, transform_indices = @transform_2, window_bounds = array<i64: 384, 32>}, {transform_indices = @transform_3, window_bounds = array<i64: 1, 16, 32>}]} {
    %c0 = arith.constant 0 : index
    %c0_0 = arith.constant 0 : index
    %c0_1 = arith.constant 0 : index
    %0 = vector.load %arg2[%c0, %c0_0, %c0_1] : memref<1x16x32xf32, #tpu.memory_space<vmem>>, vector<1x16x32xf32>
    %1 = vector.shape_cast %0 : vector<1x16x32xf32> to vector<16x32xf32>
    %c0_2 = arith.constant 0 : index
    %c0_3 = arith.constant 0 : index
    %c0_4 = arith.constant 0 : index
    %2 = vector.load %arg3[%c0_2, %c0_3, %c0_4] : memref<1x16x384xf32, #tpu.memory_space<vmem>>, vector<1x16x384xf32>
    %3 = vector.shape_cast %2 : vector<1x16x384xf32> to vector<16x384xf32>
    %4 = arith.truncf %3 : vector<16x384xf32> to vector<16x384xbf16>
    %c0_5 = arith.constant 0 : index
    %c0_6 = arith.constant 0 : index
    %5 = vector.load %arg4[%c0_5, %c0_6] : memref<384x32xbf16, #tpu.memory_space<vmem>>, vector<384x32xbf16>
    %cst = arith.constant dense<0.000000e+00> : vector<16x32xf32>
    %6 = tpu.matmul %4, %5, %cst {dimension_numbers = #tpu.dot_dimension_numbers<[1], [0], [0], [1], [0, 0, 1, 1], [], []>} : vector<16x384xbf16>, vector<384x32xbf16>, vector<16x32xf32> -> vector<16x32xf32>
    %7 = arith.addf %1, %6 : vector<16x32xf32>
    %c0_7 = arith.constant 0 : index
    %c0_8 = arith.constant 0 : index
    %c0_9 = arith.constant 0 : index
    %8 = vector.load %arg5[%c0_7, %c0_8, %c0_9] : memref<1x16x32xf32, #tpu.memory_space<vmem>>, vector<1x16x32xf32>
    %9 = vector.shape_cast %8 : vector<1x16x32xf32> to vector<16x32xf32>
    %10 = vector.shape_cast %7 : vector<16x32xf32> to vector<1x16x32xf32>
    tpu.vector_store %arg5[%c0_7, %c0_8, %c0_9], %10 {strides = array<i32>} : memref<1x16x32xf32, #tpu.memory_space<vmem>>, vector<1x16x32xf32>,
    return
  }
  func.func @transform_0(%arg0: i32, %arg1: i32) -> (i32, i32, i32) {
    %c0_i32 = arith.constant 0 : i32
    %c0_i32_0 = arith.constant 0 : i32
    return %arg0, %arg1, %c0_i32 : i32, i32, i32
  }
  func.func @transform_1(%arg0: i32, %arg1: i32) -> (i32, i32, i32) {
    %c0_i32 = arith.constant 0 : i32
    %c0_i32_0 = arith.constant 0 : i32
    return %arg0, %arg1, %c0_i32 : i32, i32, i32
  }
  func.func @transform_2(%arg0: i32, %arg1: i32) -> (i32, i32) {
    %c0_i32 = arith.constant 0 : i32
    %c0_i32_0 = arith.constant 0 : i32
    %c0_i32_1 = arith.constant 0 : i32
    return %c0_i32, %c0_i32_0 : i32, i32
  }
  func.func @transform_3(%arg0: i32, %arg1: i32) -> (i32, i32, i32) {
    %c0_i32 = arith.constant 0 : i32
    %c0_i32_0 = arith.constant 0 : i32
    return %arg0, %arg1, %c0_i32 : i32, i32, i32
  }
}

module attributes {stable_mosaic.version = 11 : i64} {
  func.func @geo_attn_kernel(%arg0: i32, %arg1: i32, %arg2: i32, %arg3: memref<1x16x32xf32, #tpu.memory_space<vmem>>, %arg4: memref<1x16x32xf32, #tpu.memory_space<vmem>>, %arg5: memref<1x16x1xf32, #tpu.memory_space<vmem>>, %arg6: memref<1x1x16xf32, #tpu.memory_space<vmem>>, %arg7: memref<32x32xbf16, #tpu.memory_space<vmem>>, %arg8: memref<32x32xbf16, #tpu.memory_space<vmem>>, %arg9: memref<32x32xbf16, #tpu.memory_space<vmem>>, %arg10: memref<32x32xbf16, #tpu.memory_space<vmem>>, %arg11: memref<1x32xf32, #tpu.memory_space<vmem>>, %arg12: memref<1x32xf32, #tpu.memory_space<vmem>>, %arg13: memref<32x64xbf16, #tpu.memory_space<vmem>>, %arg14: memref<32x64xbf16, #tpu.memory_space<vmem>>, %arg15: memref<64x32xbf16, #tpu.memory_space<vmem>>, %arg16: memref<1x32xf32, #tpu.memory_space<vmem>>, %arg17: memref<1x32xf32, #tpu.memory_space<vmem>>, %arg18: memref<1x16x32xf32, #tpu.memory_space<vmem>>, %arg19: memref<16x32xbf16, #tpu.memory_space<vmem>>, %arg20: memref<16x32xbf16, #tpu.memory_space<vmem>>, %arg21: memref<4x16x1xf32, #tpu.memory_space<vmem>>, %arg22: memref<4x16x1xf32, #tpu.memory_space<vmem>>, %arg23: memref<16x32xf32, #tpu.memory_space<vmem>>) attributes {dimension_semantics = [#tpu.dimension_semantics<parallel>, #tpu.dimension_semantics<parallel>, #tpu.dimension_semantics<arbitrary>], iteration_bounds = array<i64: 2, 1, 1>, scalar_prefetch = 0 : i64, scratch_operands = 5 : i64, tpu.core_type = #tpu.core_type<tc>, window_params = [{transform_indices = @transform_0, window_bounds = array<i64: 1, 16, 32>}, {transform_indices = @transform_1, window_bounds = array<i64: 1, 16, 32>}, {transform_indices = @transform_2, window_bounds = array<i64: 1, 16, 1>}, {transform_indices = @transform_3, window_bounds = array<i64: 1, 1, 16>}, {pipeline_mode = #tpu.pipeline_mode<synchronous>, transform_indices = @transform_4, window_bounds = array<i64: 32, 32>}, {pipeline_mode = #tpu.pipeline_mode<synchronous>, transform_indices = @transform_5, window_bounds = array<i64: 32, 32>}, {pipeline_mode = #tpu.pipeline_mode<synchronous>, transform_indices = @transform_6, window_bounds = array<i64: 32, 32>}, {pipeline_mode = #tpu.pipeline_mode<synchronous>, transform_indices = @transform_7, window_bounds = array<i64: 32, 32>}, {pipeline_mode = #tpu.pipeline_mode<synchronous>, transform_indices = @transform_8, window_bounds = array<i64: 1, 32>}, {pipeline_mode = #tpu.pipeline_mode<synchronous>, transform_indices = @transform_9, window_bounds = array<i64: 1, 32>}, {pipeline_mode = #tpu.pipeline_mode<synchronous>, transform_indices = @transform_10, window_bounds = array<i64: 32, 64>}, {pipeline_mode = #tpu.pipeline_mode<synchronous>, transform_indices = @transform_11, window_bounds = array<i64: 32, 64>}, {pipeline_mode = #tpu.pipeline_mode<synchronous>, transform_indices = @transform_12, window_bounds = array<i64: 64, 32>}, {pipeline_mode = #tpu.pipeline_mode<synchronous>, transform_indices = @transform_13, window_bounds = array<i64: 1, 32>}, {pipeline_mode = #tpu.pipeline_mode<synchronous>, transform_indices = @transform_14, window_bounds = array<i64: 1, 32>}, {transform_indices = @transform_15, window_bounds = array<i64: 1, 16, 32>}]} {
    %c0 = arith.constant 0 : index
    %c0_0 = arith.constant 0 : index
    %c0_1 = arith.constant 0 : index
    %0 = vector.load %arg3[%c0, %c0_0, %c0_1] : memref<1x16x32xf32, #tpu.memory_space<vmem>>, vector<1x16x32xf32>
    %1 = vector.shape_cast %0 : vector<1x16x32xf32> to vector<16x32xf32>
    %2 = arith.truncf %1 : vector<16x32xf32> to vector<16x32xbf16>
    %c0_i32 = arith.constant 0 : i32
    %3 = arith.cmpi eq, %arg2, %c0_i32 : i32
    %4 = arith.extui %3 : i1 to i32
    %c0_i32_2 = arith.constant 0 : i32
    %5 = arith.cmpi ne, %4, %c0_i32_2 : i32
    scf.if %5 {
      %c0_95 = arith.constant 0 : index
      %c0_96 = arith.constant 0 : index
      %162 = vector.load %arg7[%c0_95, %c0_96] : memref<32x32xbf16, #tpu.memory_space<vmem>>, vector<32x32xbf16>
      %cst_97 = arith.constant dense<0.000000e+00> : vector<16x32xf32>
      %163 = tpu.matmul %2, %162, %cst_97 {dimension_numbers = #tpu.dot_dimension_numbers<[1], [0], [0], [1], [0, 0, 1, 1], [], []>} : vector<16x32xbf16>, vector<32x32xbf16>, vector<16x32xf32> -> vector<16x32xf32>
      %164 = arith.truncf %163 : vector<16x32xf32> to vector<16x32xbf16>
      %c0_98 = arith.constant 0 : index
      %c0_99 = arith.constant 0 : index
      %165 = vector.load %arg19[%c0_98, %c0_99] : memref<16x32xbf16, #tpu.memory_space<vmem>>, vector<16x32xbf16>
      tpu.vector_store %arg19[%c0_98, %c0_99], %164 {strides = array<i32>} : memref<16x32xbf16, #tpu.memory_space<vmem>>, vector<16x32xbf16>,
      %cst_100 = arith.constant -1.000000e+30 : f32
      %166 = vector.broadcast %cst_100 : f32 to vector<4x16x1xf32>
      %c0_101 = arith.constant 0 : index
      %c0_102 = arith.constant 0 : index
      %c0_103 = arith.constant 0 : index
      %167 = vector.load %arg21[%c0_101, %c0_102, %c0_103] : memref<4x16x1xf32, #tpu.memory_space<vmem>>, vector<4x16x1xf32>
      tpu.vector_store %arg21[%c0_101, %c0_102, %c0_103], %166 {strides = array<i32>} : memref<4x16x1xf32, #tpu.memory_space<vmem>>, vector<4x16x1xf32>,
      %cst_104 = arith.constant 0.000000e+00 : f32
      %168 = vector.broadcast %cst_104 : f32 to vector<4x16x1xf32>
      %c0_105 = arith.constant 0 : index
      %c0_106 = arith.constant 0 : index
      %c0_107 = arith.constant 0 : index
      %169 = vector.load %arg22[%c0_105, %c0_106, %c0_107] : memref<4x16x1xf32, #tpu.memory_space<vmem>>, vector<4x16x1xf32>
      tpu.vector_store %arg22[%c0_105, %c0_106, %c0_107], %168 {strides = array<i32>} : memref<4x16x1xf32, #tpu.memory_space<vmem>>, vector<4x16x1xf32>,
      %cst_108 = arith.constant 0.000000e+00 : f32
      %170 = vector.broadcast %cst_108 : f32 to vector<16x32xf32>
      %c0_109 = arith.constant 0 : index
      %c0_110 = arith.constant 0 : index
      %171 = vector.load %arg23[%c0_109, %c0_110] : memref<16x32xf32, #tpu.memory_space<vmem>>, vector<16x32xf32>
      tpu.vector_store %arg23[%c0_109, %c0_110], %170 {strides = array<i32>} : memref<16x32xf32, #tpu.memory_space<vmem>>, vector<16x32xf32>,
    } else {
    }
    %c0_3 = arith.constant 0 : index
    %c0_4 = arith.constant 0 : index
    %c0_5 = arith.constant 0 : index
    %6 = vector.load %arg4[%c0_3, %c0_4, %c0_5] : memref<1x16x32xf32, #tpu.memory_space<vmem>>, vector<1x16x32xf32>
    %7 = vector.shape_cast %6 : vector<1x16x32xf32> to vector<16x32xf32>
    %8 = arith.truncf %7 : vector<16x32xf32> to vector<16x32xbf16>
    %c0_6 = arith.constant 0 : index
    %c0_7 = arith.constant 0 : index
    %9 = vector.load %arg8[%c0_6, %c0_7] : memref<32x32xbf16, #tpu.memory_space<vmem>>, vector<32x32xbf16>
    %cst = arith.constant dense<0.000000e+00> : vector<16x32xf32>
    %10 = tpu.matmul %8, %9, %cst {dimension_numbers = #tpu.dot_dimension_numbers<[1], [0], [0], [1], [0, 0, 1, 1], [], []>} : vector<16x32xbf16>, vector<32x32xbf16>, vector<16x32xf32> -> vector<16x32xf32>
    %11 = arith.truncf %10 : vector<16x32xf32> to vector<16x32xbf16>
    %c0_8 = arith.constant 0 : index
    %c0_9 = arith.constant 0 : index
    %12 = vector.load %arg9[%c0_8, %c0_9] : memref<32x32xbf16, #tpu.memory_space<vmem>>, vector<32x32xbf16>
    %cst_10 = arith.constant dense<0.000000e+00> : vector<16x32xf32>
    %13 = tpu.matmul %8, %12, %cst_10 {dimension_numbers = #tpu.dot_dimension_numbers<[1], [0], [0], [1], [0, 0, 1, 1], [], []>} : vector<16x32xbf16>, vector<32x32xbf16>, vector<16x32xf32> -> vector<16x32xf32>
    %14 = arith.truncf %13 : vector<16x32xf32> to vector<16x32xbf16>
    %c0_11 = arith.constant 0 : index
    %c0_12 = arith.constant 0 : index
    %c0_13 = arith.constant 0 : index
    %15 = vector.load %arg5[%c0_11, %c0_12, %c0_13] : memref<1x16x1xf32, #tpu.memory_space<vmem>>, vector<1x16x1xf32>
    %16 = vector.shape_cast %15 : vector<1x16x1xf32> to vector<16x1xf32>
    %c0_14 = arith.constant 0 : index
    %c0_15 = arith.constant 0 : index
    %c0_16 = arith.constant 0 : index
    %17 = vector.load %arg6[%c0_14, %c0_15, %c0_16] : memref<1x1x16xf32, #tpu.memory_space<vmem>>, vector<1x1x16xf32>
    %18 = vector.shape_cast %17 : vector<1x1x16xf32> to vector<1x16xf32>
    %19 = vector.broadcast %16 : vector<16x1xf32> to vector<16x16xf32>
    %20 = vector.broadcast %18 : vector<1x16xf32> to vector<16x16xf32>
    %21 = arith.mulf %19, %20 : vector<16x16xf32>
    %c0_17 = arith.constant 0 : index
    %c0_18 = arith.constant 0 : index
    %22 = vector.load %arg19[%c0_17, %c0_18] : memref<16x32xbf16, #tpu.memory_space<vmem>>, vector<16x32xbf16>
    %23 = vector.extract_strided_slice %22 {offsets = [0, 0], sizes = [16, 8], strides = [1, 1]} : vector<16x32xbf16> to vector<16x8xbf16>
    %24 = vector.extract_strided_slice %11 {offsets = [0, 0], sizes = [16, 8], strides = [1, 1]} : vector<16x32xbf16> to vector<16x8xbf16>
    "tpu.trace_start"() <{level = 10 : i32, message = "ld,sd->ls"}> : () -> ()
    %cst_19 = arith.constant dense<0.000000e+00> : vector<16x16xf32>
    %25 = tpu.matmul %23, %24, %cst_19 {dimension_numbers = #tpu.dot_dimension_numbers<[1], [1], [0], [0], [0, 0, 1, 0], [], []>} : vector<16x8xbf16>, vector<16x8xbf16>, vector<16x16xf32> -> vector<16x16xf32>
    "tpu.trace_stop"() : () -> ()
    %26 = arith.addf %25, %21 : vector<16x16xf32>
    %c0_20 = arith.constant 0 : index
    %c0_21 = arith.constant 0 : index
    %c0_22 = arith.constant 0 : index
    %27 = vector.load %arg21[%c0_20, %c0_21, %c0_22] : memref<4x16x1xf32, #tpu.memory_space<vmem>>, vector<1x16x1xf32>
    %28 = vector.shape_cast %27 : vector<1x16x1xf32> to vector<16x1xf32>
    %cst_23 = arith.constant dense<0xFF800000> : vector<16xf32>
    %29 = vector.multi_reduction <maximumf>, %26, %cst_23 [1] : vector<16x16xf32> to vector<16xf32>
    %30 = vector.shape_cast %29 : vector<16xf32> to vector<16x1xf32>
    %31 = arith.maximumf %28, %30 : vector<16x1xf32>
    %32 = arith.subf %28, %31 : vector<16x1xf32>
    %33 = math.exp %32 : vector<16x1xf32>
    %34 = vector.broadcast %31 : vector<16x1xf32> to vector<16x16xf32>
    %35 = arith.subf %26, %34 : vector<16x16xf32>
    %36 = math.exp %35 : vector<16x16xf32>
    %c0_24 = arith.constant 0 : index
    %c0_25 = arith.constant 0 : index
    %c0_26 = arith.constant 0 : index
    %37 = vector.load %arg22[%c0_24, %c0_25, %c0_26] : memref<4x16x1xf32, #tpu.memory_space<vmem>>, vector<1x16x1xf32>
    %38 = vector.shape_cast %37 : vector<1x16x1xf32> to vector<16x1xf32>
    %39 = arith.mulf %33, %38 : vector<16x1xf32>
    %cst_27 = arith.constant dense<0.000000e+00> : vector<16xf32>
    %40 = vector.multi_reduction <add>, %36, %cst_27 [1] : vector<16x16xf32> to vector<16xf32>
    %41 = vector.shape_cast %40 : vector<16xf32> to vector<16x1xf32>
    %42 = arith.addf %39, %41 : vector<16x1xf32>
    %c0_28 = arith.constant 0 : index
    %c0_29 = arith.constant 0 : index
    %c0_30 = arith.constant 0 : index
    %43 = vector.load %arg22[%c0_28, %c0_29, %c0_30] : memref<4x16x1xf32, #tpu.memory_space<vmem>>, vector<1x16x1xf32>
    %44 = vector.shape_cast %43 : vector<1x16x1xf32> to vector<16x1xf32>
    %45 = vector.shape_cast %42 : vector<16x1xf32> to vector<1x16x1xf32>
    tpu.vector_store %arg22[%c0_28, %c0_29, %c0_30], %45 {strides = array<i32>} : memref<4x16x1xf32, #tpu.memory_space<vmem>>, vector<1x16x1xf32>,
    %c0_31 = arith.constant 0 : index
    %c0_32 = arith.constant 0 : index
    %46 = vector.load %arg23[%c0_31, %c0_32] : memref<16x32xf32, #tpu.memory_space<vmem>>, vector<16x8xf32>
    %47 = vector.broadcast %33 : vector<16x1xf32> to vector<16x8xf32>
    %48 = arith.mulf %47, %46 : vector<16x8xf32>
    %49 = arith.truncf %36 : vector<16x16xf32> to vector<16x16xbf16>
    %50 = vector.extract_strided_slice %14 {offsets = [0, 0], sizes = [16, 8], strides = [1, 1]} : vector<16x32xbf16> to vector<16x8xbf16>
    %cst_33 = arith.constant dense<0.000000e+00> : vector<16x8xf32>
    %51 = tpu.matmul %49, %50, %cst_33 {dimension_numbers = #tpu.dot_dimension_numbers<[1], [0], [0], [1], [0, 0, 1, 1], [], []>} : vector<16x16xbf16>, vector<16x8xbf16>, vector<16x8xf32> -> vector<16x8xf32>
    %52 = arith.addf %48, %51 : vector<16x8xf32>
    %c0_34 = arith.constant 0 : index
    %c0_35 = arith.constant 0 : index
    %53 = vector.load %arg23[%c0_34, %c0_35] : memref<16x32xf32, #tpu.memory_space<vmem>>, vector<16x8xf32>
    tpu.vector_store %arg23[%c0_34, %c0_35], %52 {strides = array<i32>} : memref<16x32xf32, #tpu.memory_space<vmem>>, vector<16x8xf32>,
    %c0_36 = arith.constant 0 : index
    %c0_37 = arith.constant 0 : index
    %c0_38 = arith.constant 0 : index
    %54 = vector.load %arg21[%c0_36, %c0_37, %c0_38] : memref<4x16x1xf32, #tpu.memory_space<vmem>>, vector<1x16x1xf32>
    %55 = vector.shape_cast %54 : vector<1x16x1xf32> to vector<16x1xf32>
    %56 = vector.shape_cast %31 : vector<16x1xf32> to vector<1x16x1xf32>
    tpu.vector_store %arg21[%c0_36, %c0_37, %c0_38], %56 {strides = array<i32>} : memref<4x16x1xf32, #tpu.memory_space<vmem>>, vector<1x16x1xf32>,
    %57 = vector.extract_strided_slice %22 {offsets = [0, 8], sizes = [16, 8], strides = [1, 1]} : vector<16x32xbf16> to vector<16x8xbf16>
    %58 = vector.extract_strided_slice %11 {offsets = [0, 8], sizes = [16, 8], strides = [1, 1]} : vector<16x32xbf16> to vector<16x8xbf16>
    "tpu.trace_start"() <{level = 10 : i32, message = "ld,sd->ls"}> : () -> ()
    %cst_39 = arith.constant dense<0.000000e+00> : vector<16x16xf32>
    %59 = tpu.matmul %57, %58, %cst_39 {dimension_numbers = #tpu.dot_dimension_numbers<[1], [1], [0], [0], [0, 0, 1, 0], [], []>} : vector<16x8xbf16>, vector<16x8xbf16>, vector<16x16xf32> -> vector<16x16xf32>
    "tpu.trace_stop"() : () -> ()
    %60 = arith.addf %59, %21 : vector<16x16xf32>
    %c1 = arith.constant 1 : index
    %c0_40 = arith.constant 0 : index
    %c0_41 = arith.constant 0 : index
    %61 = vector.load %arg21[%c1, %c0_40, %c0_41] : memref<4x16x1xf32, #tpu.memory_space<vmem>>, vector<1x16x1xf32>
    %62 = vector.shape_cast %61 : vector<1x16x1xf32> to vector<16x1xf32>
    %cst_42 = arith.constant dense<0xFF800000> : vector<16xf32>
    %63 = vector.multi_reduction <maximumf>, %60, %cst_42 [1] : vector<16x16xf32> to vector<16xf32>
    %64 = vector.shape_cast %63 : vector<16xf32> to vector<16x1xf32>
    %65 = arith.maximumf %62, %64 : vector<16x1xf32>
    %66 = arith.subf %62, %65 : vector<16x1xf32>
    %67 = math.exp %66 : vector<16x1xf32>
    %68 = vector.broadcast %65 : vector<16x1xf32> to vector<16x16xf32>
    %69 = arith.subf %60, %68 : vector<16x16xf32>
    %70 = math.exp %69 : vector<16x16xf32>
    %c1_43 = arith.constant 1 : index
    %c0_44 = arith.constant 0 : index
    %c0_45 = arith.constant 0 : index
    %71 = vector.load %arg22[%c1_43, %c0_44, %c0_45] : memref<4x16x1xf32, #tpu.memory_space<vmem>>, vector<1x16x1xf32>
    %72 = vector.shape_cast %71 : vector<1x16x1xf32> to vector<16x1xf32>
    %73 = arith.mulf %67, %72 : vector<16x1xf32>
    %cst_46 = arith.constant dense<0.000000e+00> : vector<16xf32>
    %74 = vector.multi_reduction <add>, %70, %cst_46 [1] : vector<16x16xf32> to vector<16xf32>
    %75 = vector.shape_cast %74 : vector<16xf32> to vector<16x1xf32>
    %76 = arith.addf %73, %75 : vector<16x1xf32>
    %c1_47 = arith.constant 1 : index
    %c0_48 = arith.constant 0 : index
    %c0_49 = arith.constant 0 : index
    %77 = vector.load %arg22[%c1_47, %c0_48, %c0_49] : memref<4x16x1xf32, #tpu.memory_space<vmem>>, vector<1x16x1xf32>
    %78 = vector.shape_cast %77 : vector<1x16x1xf32> to vector<16x1xf32>
    %79 = vector.shape_cast %76 : vector<16x1xf32> to vector<1x16x1xf32>
    tpu.vector_store %arg22[%c1_47, %c0_48, %c0_49], %79 {strides = array<i32>} : memref<4x16x1xf32, #tpu.memory_space<vmem>>, vector<1x16x1xf32>,
    %c0_50 = arith.constant 0 : index
    %c8 = arith.constant 8 : index
    %80 = vector.load %arg23[%c0_50, %c8] : memref<16x32xf32, #tpu.memory_space<vmem>>, vector<16x8xf32>
    %81 = vector.broadcast %67 : vector<16x1xf32> to vector<16x8xf32>
    %82 = arith.mulf %81, %80 : vector<16x8xf32>
    %83 = arith.truncf %70 : vector<16x16xf32> to vector<16x16xbf16>
    %84 = vector.extract_strided_slice %14 {offsets = [0, 8], sizes = [16, 8], strides = [1, 1]} : vector<16x32xbf16> to vector<16x8xbf16>
    %cst_51 = arith.constant dense<0.000000e+00> : vector<16x8xf32>
    %85 = tpu.matmul %83, %84, %cst_51 {dimension_numbers = #tpu.dot_dimension_numbers<[1], [0], [0], [1], [0, 0, 1, 1], [], []>} : vector<16x16xbf16>, vector<16x8xbf16>, vector<16x8xf32> -> vector<16x8xf32>
    %86 = arith.addf %82, %85 : vector<16x8xf32>
    %c0_52 = arith.constant 0 : index
    %c8_53 = arith.constant 8 : index
    %87 = vector.load %arg23[%c0_52, %c8_53] : memref<16x32xf32, #tpu.memory_space<vmem>>, vector<16x8xf32>
    tpu.vector_store %arg23[%c0_52, %c8_53], %86 {strides = array<i32>} : memref<16x32xf32, #tpu.memory_space<vmem>>, vector<16x8xf32>,
    %c1_54 = arith.constant 1 : index
    %c0_55 = arith.constant 0 : index
    %c0_56 = arith.constant 0 : index
    %88 = vector.load %arg21[%c1_54, %c0_55, %c0_56] : memref<4x16x1xf32, #tpu.memory_space<vmem>>, vector<1x16x1xf32>
    %89 = vector.shape_cast %88 : vector<1x16x1xf32> to vector<16x1xf32>
    %90 = vector.shape_cast %65 : vector<16x1xf32> to vector<1x16x1xf32>
    tpu.vector_store %arg21[%c1_54, %c0_55, %c0_56], %90 {strides = array<i32>} : memref<4x16x1xf32, #tpu.memory_space<vmem>>, vector<1x16x1xf32>,
    %91 = vector.extract_strided_slice %22 {offsets = [0, 16], sizes = [16, 8], strides = [1, 1]} : vector<16x32xbf16> to vector<16x8xbf16>
    %92 = vector.extract_strided_slice %11 {offsets = [0, 16], sizes = [16, 8], strides = [1, 1]} : vector<16x32xbf16> to vector<16x8xbf16>
    "tpu.trace_start"() <{level = 10 : i32, message = "ld,sd->ls"}> : () -> ()
    %cst_57 = arith.constant dense<0.000000e+00> : vector<16x16xf32>
    %93 = tpu.matmul %91, %92, %cst_57 {dimension_numbers = #tpu.dot_dimension_numbers<[1], [1], [0], [0], [0, 0, 1, 0], [], []>} : vector<16x8xbf16>, vector<16x8xbf16>, vector<16x16xf32> -> vector<16x16xf32>
    "tpu.trace_stop"() : () -> ()
    %94 = arith.addf %93, %21 : vector<16x16xf32>
    %c2 = arith.constant 2 : index
    %c0_58 = arith.constant 0 : index
    %c0_59 = arith.constant 0 : index
    %95 = vector.load %arg21[%c2, %c0_58, %c0_59] : memref<4x16x1xf32, #tpu.memory_space<vmem>>, vector<1x16x1xf32>
    %96 = vector.shape_cast %95 : vector<1x16x1xf32> to vector<16x1xf32>
    %cst_60 = arith.constant dense<0xFF800000> : vector<16xf32>
    %97 = vector.multi_reduction <maximumf>, %94, %cst_60 [1] : vector<16x16xf32> to vector<16xf32>
    %98 = vector.shape_cast %97 : vector<16xf32> to vector<16x1xf32>
    %99 = arith.maximumf %96, %98 : vector<16x1xf32>
    %100 = arith.subf %96, %99 : vector<16x1xf32>
    %101 = math.exp %100 : vector<16x1xf32>
    %102 = vector.broadcast %99 : vector<16x1xf32> to vector<16x16xf32>
    %103 = arith.subf %94, %102 : vector<16x16xf32>
    %104 = math.exp %103 : vector<16x16xf32>
    %c2_61 = arith.constant 2 : index
    %c0_62 = arith.constant 0 : index
    %c0_63 = arith.constant 0 : index
    %105 = vector.load %arg22[%c2_61, %c0_62, %c0_63] : memref<4x16x1xf32, #tpu.memory_space<vmem>>, vector<1x16x1xf32>
    %106 = vector.shape_cast %105 : vector<1x16x1xf32> to vector<16x1xf32>
    %107 = arith.mulf %101, %106 : vector<16x1xf32>
    %cst_64 = arith.constant dense<0.000000e+00> : vector<16xf32>
    %108 = vector.multi_reduction <add>, %104, %cst_64 [1] : vector<16x16xf32> to vector<16xf32>
    %109 = vector.shape_cast %108 : vector<16xf32> to vector<16x1xf32>
    %110 = arith.addf %107, %109 : vector<16x1xf32>
    %c2_65 = arith.constant 2 : index
    %c0_66 = arith.constant 0 : index
    %c0_67 = arith.constant 0 : index
    %111 = vector.load %arg22[%c2_65, %c0_66, %c0_67] : memref<4x16x1xf32, #tpu.memory_space<vmem>>, vector<1x16x1xf32>
    %112 = vector.shape_cast %111 : vector<1x16x1xf32> to vector<16x1xf32>
    %113 = vector.shape_cast %110 : vector<16x1xf32> to vector<1x16x1xf32>
    tpu.vector_store %arg22[%c2_65, %c0_66, %c0_67], %113 {strides = array<i32>} : memref<4x16x1xf32, #tpu.memory_space<vmem>>, vector<1x16x1xf32>,
    %c0_68 = arith.constant 0 : index
    %c16 = arith.constant 16 : index
    %114 = vector.load %arg23[%c0_68, %c16] : memref<16x32xf32, #tpu.memory_space<vmem>>, vector<16x8xf32>
    %115 = vector.broadcast %101 : vector<16x1xf32> to vector<16x8xf32>
    %116 = arith.mulf %115, %114 : vector<16x8xf32>
    %117 = arith.truncf %104 : vector<16x16xf32> to vector<16x16xbf16>
    %118 = vector.extract_strided_slice %14 {offsets = [0, 16], sizes = [16, 8], strides = [1, 1]} : vector<16x32xbf16> to vector<16x8xbf16>
    %cst_69 = arith.constant dense<0.000000e+00> : vector<16x8xf32>
    %119 = tpu.matmul %117, %118, %cst_69 {dimension_numbers = #tpu.dot_dimension_numbers<[1], [0], [0], [1], [0, 0, 1, 1], [], []>} : vector<16x16xbf16>, vector<16x8xbf16>, vector<16x8xf32> -> vector<16x8xf32>
    %120 = arith.addf %116, %119 : vector<16x8xf32>
    %c0_70 = arith.constant 0 : index
    %c16_71 = arith.constant 16 : index
    %121 = vector.load %arg23[%c0_70, %c16_71] : memref<16x32xf32, #tpu.memory_space<vmem>>, vector<16x8xf32>
    tpu.vector_store %arg23[%c0_70, %c16_71], %120 {strides = array<i32>} : memref<16x32xf32, #tpu.memory_space<vmem>>, vector<16x8xf32>,
    %c2_72 = arith.constant 2 : index
    %c0_73 = arith.constant 0 : index
    %c0_74 = arith.constant 0 : index
    %122 = vector.load %arg21[%c2_72, %c0_73, %c0_74] : memref<4x16x1xf32, #tpu.memory_space<vmem>>, vector<1x16x1xf32>
    %123 = vector.shape_cast %122 : vector<1x16x1xf32> to vector<16x1xf32>
    %124 = vector.shape_cast %99 : vector<16x1xf32> to vector<1x16x1xf32>
    tpu.vector_store %arg21[%c2_72, %c0_73, %c0_74], %124 {strides = array<i32>} : memref<4x16x1xf32, #tpu.memory_space<vmem>>, vector<1x16x1xf32>,
    %125 = vector.extract_strided_slice %22 {offsets = [0, 24], sizes = [16, 8], strides = [1, 1]} : vector<16x32xbf16> to vector<16x8xbf16>
    %126 = vector.extract_strided_slice %11 {offsets = [0, 24], sizes = [16, 8], strides = [1, 1]} : vector<16x32xbf16> to vector<16x8xbf16>
    "tpu.trace_start"() <{level = 10 : i32, message = "ld,sd->ls"}> : () -> ()
    %cst_75 = arith.constant dense<0.000000e+00> : vector<16x16xf32>
    %127 = tpu.matmul %125, %126, %cst_75 {dimension_numbers = #tpu.dot_dimension_numbers<[1], [1], [0], [0], [0, 0, 1, 0], [], []>} : vector<16x8xbf16>, vector<16x8xbf16>, vector<16x16xf32> -> vector<16x16xf32>
    "tpu.trace_stop"() : () -> ()
    %128 = arith.addf %127, %21 : vector<16x16xf32>
    %c3 = arith.constant 3 : index
    %c0_76 = arith.constant 0 : index
    %c0_77 = arith.constant 0 : index
    %129 = vector.load %arg21[%c3, %c0_76, %c0_77] : memref<4x16x1xf32, #tpu.memory_space<vmem>>, vector<1x16x1xf32>
    %130 = vector.shape_cast %129 : vector<1x16x1xf32> to vector<16x1xf32>
    %cst_78 = arith.constant dense<0xFF800000> : vector<16xf32>
    %131 = vector.multi_reduction <maximumf>, %128, %cst_78 [1] : vector<16x16xf32> to vector<16xf32>
    %132 = vector.shape_cast %131 : vector<16xf32> to vector<16x1xf32>
    %133 = arith.maximumf %130, %132 : vector<16x1xf32>
    %134 = arith.subf %130, %133 : vector<16x1xf32>
    %135 = math.exp %134 : vector<16x1xf32>
    %136 = vector.broadcast %133 : vector<16x1xf32> to vector<16x16xf32>
    %137 = arith.subf %128, %136 : vector<16x16xf32>
    %138 = math.exp %137 : vector<16x16xf32>
    %c3_79 = arith.constant 3 : index
    %c0_80 = arith.constant 0 : index
    %c0_81 = arith.constant 0 : index
    %139 = vector.load %arg22[%c3_79, %c0_80, %c0_81] : memref<4x16x1xf32, #tpu.memory_space<vmem>>, vector<1x16x1xf32>
    %140 = vector.shape_cast %139 : vector<1x16x1xf32> to vector<16x1xf32>
    %141 = arith.mulf %135, %140 : vector<16x1xf32>
    %cst_82 = arith.constant dense<0.000000e+00> : vector<16xf32>
    %142 = vector.multi_reduction <add>, %138, %cst_82 [1] : vector<16x16xf32> to vector<16xf32>
    %143 = vector.shape_cast %142 : vector<16xf32> to vector<16x1xf32>
    %144 = arith.addf %141, %143 : vector<16x1xf32>
    %c3_83 = arith.constant 3 : index
    %c0_84 = arith.constant 0 : index
    %c0_85 = arith.constant 0 : index
    %145 = vector.load %arg22[%c3_83, %c0_84, %c0_85] : memref<4x16x1xf32, #tpu.memory_space<vmem>>, vector<1x16x1xf32>
    %146 = vector.shape_cast %145 : vector<1x16x1xf32> to vector<16x1xf32>
    %147 = vector.shape_cast %144 : vector<16x1xf32> to vector<1x16x1xf32>
    tpu.vector_store %arg22[%c3_83, %c0_84, %c0_85], %147 {strides = array<i32>} : memref<4x16x1xf32, #tpu.memory_space<vmem>>, vector<1x16x1xf32>,
    %c0_86 = arith.constant 0 : index
    %c24 = arith.constant 24 : index
    %148 = vector.load %arg23[%c0_86, %c24] : memref<16x32xf32, #tpu.memory_space<vmem>>, vector<16x8xf32>
    %149 = vector.broadcast %135 : vector<16x1xf32> to vector<16x8xf32>
    %150 = arith.mulf %149, %148 : vector<16x8xf32>
    %151 = arith.truncf %138 : vector<16x16xf32> to vector<16x16xbf16>
    %152 = vector.extract_strided_slice %14 {offsets = [0, 24], sizes = [16, 8], strides = [1, 1]} : vector<16x32xbf16> to vector<16x8xbf16>
    %cst_87 = arith.constant dense<0.000000e+00> : vector<16x8xf32>
    %153 = tpu.matmul %151, %152, %cst_87 {dimension_numbers = #tpu.dot_dimension_numbers<[1], [0], [0], [1], [0, 0, 1, 1], [], []>} : vector<16x16xbf16>, vector<16x8xbf16>, vector<16x8xf32> -> vector<16x8xf32>
    %154 = arith.addf %150, %153 : vector<16x8xf32>
    %c0_88 = arith.constant 0 : index
    %c24_89 = arith.constant 24 : index
    %155 = vector.load %arg23[%c0_88, %c24_89] : memref<16x32xf32, #tpu.memory_space<vmem>>, vector<16x8xf32>
    tpu.vector_store %arg23[%c0_88, %c24_89], %154 {strides = array<i32>} : memref<16x32xf32, #tpu.memory_space<vmem>>, vector<16x8xf32>,
    %c3_90 = arith.constant 3 : index
    %c0_91 = arith.constant 0 : index
    %c0_92 = arith.constant 0 : index
    %156 = vector.load %arg21[%c3_90, %c0_91, %c0_92] : memref<4x16x1xf32, #tpu.memory_space<vmem>>, vector<1x16x1xf32>
    %157 = vector.shape_cast %156 : vector<1x16x1xf32> to vector<16x1xf32>
    %158 = vector.shape_cast %133 : vector<16x1xf32> to vector<1x16x1xf32>
    tpu.vector_store %arg21[%c3_90, %c0_91, %c0_92], %158 {strides = array<i32>} : memref<4x16x1xf32, #tpu.memory_space<vmem>>, vector<1x16x1xf32>,
    %c0_i32_93 = arith.constant 0 : i32
    %159 = arith.cmpi eq, %arg2, %c0_i32_93 : i32
    %160 = arith.extui %159 : i1 to i32
    %c0_i32_94 = arith.constant 0 : i32
    %161 = arith.cmpi ne, %160, %c0_i32_94 : i32
    scf.if %161 {
      %c0_95 = arith.constant 0 : index
      %c0_96 = arith.constant 0 : index
      %c0_97 = arith.constant 0 : index
      %162 = vector.load %arg22[%c0_95, %c0_96, %c0_97] : memref<4x16x1xf32, #tpu.memory_space<vmem>>, vector<1x16x1xf32>
      %163 = vector.shape_cast %162 : vector<1x16x1xf32> to vector<16x1xf32>
      %164 = tpu.reciprocal %163 {approx = true} : vector<16x1xf32> -> vector<16x1xf32>
      %c0_98 = arith.constant 0 : index
      %c0_99 = arith.constant 0 : index
      %165 = vector.load %arg23[%c0_98, %c0_99] : memref<16x32xf32, #tpu.memory_space<vmem>>, vector<16x8xf32>
      %166 = vector.broadcast %164 : vector<16x1xf32> to vector<16x8xf32>
      %167 = arith.mulf %165, %166 : vector<16x8xf32>
      %168 = arith.truncf %167 : vector<16x8xf32> to vector<16x8xbf16>
      %c0_100 = arith.constant 0 : index
      %c0_101 = arith.constant 0 : index
      %169 = vector.load %arg20[%c0_100, %c0_101] : memref<16x32xbf16, #tpu.memory_space<vmem>>, vector<16x8xbf16>
      tpu.vector_store %arg20[%c0_100, %c0_101], %168 {strides = array<i32>} : memref<16x32xbf16, #tpu.memory_space<vmem>>, vector<16x8xbf16>,
      %c1_102 = arith.constant 1 : index
      %c0_103 = arith.constant 0 : index
      %c0_104 = arith.constant 0 : index
      %170 = vector.load %arg22[%c1_102, %c0_103, %c0_104] : memref<4x16x1xf32, #tpu.memory_space<vmem>>, vector<1x16x1xf32>
      %171 = vector.shape_cast %170 : vector<1x16x1xf32> to vector<16x1xf32>
      %172 = tpu.reciprocal %171 {approx = true} : vector<16x1xf32> -> vector<16x1xf32>
      %c0_105 = arith.constant 0 : index
      %c8_106 = arith.constant 8 : index
      %173 = vector.load %arg23[%c0_105, %c8_106] : memref<16x32xf32, #tpu.memory_space<vmem>>, vector<16x8xf32>
      %174 = vector.broadcast %172 : vector<16x1xf32> to vector<16x8xf32>
      %175 = arith.mulf %173, %174 : vector<16x8xf32>
      %176 = arith.truncf %175 : vector<16x8xf32> to vector<16x8xbf16>
      %c0_107 = arith.constant 0 : index
      %c8_108 = arith.constant 8 : index
      %177 = vector.load %arg20[%c0_107, %c8_108] : memref<16x32xbf16, #tpu.memory_space<vmem>>, vector<16x8xbf16>
      tpu.vector_store %arg20[%c0_107, %c8_108], %176 {strides = array<i32>} : memref<16x32xbf16, #tpu.memory_space<vmem>>, vector<16x8xbf16>,
      %c2_109 = arith.constant 2 : index
      %c0_110 = arith.constant 0 : index
      %c0_111 = arith.constant 0 : index
      %178 = vector.load %arg22[%c2_109, %c0_110, %c0_111] : memref<4x16x1xf32, #tpu.memory_space<vmem>>, vector<1x16x1xf32>
      %179 = vector.shape_cast %178 : vector<1x16x1xf32> to vector<16x1xf32>
      %180 = tpu.reciprocal %179 {approx = true} : vector<16x1xf32> -> vector<16x1xf32>
      %c0_112 = arith.constant 0 : index
      %c16_113 = arith.constant 16 : index
      %181 = vector.load %arg23[%c0_112, %c16_113] : memref<16x32xf32, #tpu.memory_space<vmem>>, vector<16x8xf32>
      %182 = vector.broadcast %180 : vector<16x1xf32> to vector<16x8xf32>
      %183 = arith.mulf %181, %182 : vector<16x8xf32>
      %184 = arith.truncf %183 : vector<16x8xf32> to vector<16x8xbf16>
      %c0_114 = arith.constant 0 : index
      %c16_115 = arith.constant 16 : index
      %185 = vector.load %arg20[%c0_114, %c16_115] : memref<16x32xbf16, #tpu.memory_space<vmem>>, vector<16x8xbf16>
      tpu.vector_store %arg20[%c0_114, %c16_115], %184 {strides = array<i32>} : memref<16x32xbf16, #tpu.memory_space<vmem>>, vector<16x8xbf16>,
      %c3_116 = arith.constant 3 : index
      %c0_117 = arith.constant 0 : index
      %c0_118 = arith.constant 0 : index
      %186 = vector.load %arg22[%c3_116, %c0_117, %c0_118] : memref<4x16x1xf32, #tpu.memory_space<vmem>>, vector<1x16x1xf32>
      %187 = vector.shape_cast %186 : vector<1x16x1xf32> to vector<16x1xf32>
      %188 = tpu.reciprocal %187 {approx = true} : vector<16x1xf32> -> vector<16x1xf32>
      %c0_119 = arith.constant 0 : index
      %c24_120 = arith.constant 24 : index
      %189 = vector.load %arg23[%c0_119, %c24_120] : memref<16x32xf32, #tpu.memory_space<vmem>>, vector<16x8xf32>
      %190 = vector.broadcast %188 : vector<16x1xf32> to vector<16x8xf32>
      %191 = arith.mulf %189, %190 : vector<16x8xf32>
      %192 = arith.truncf %191 : vector<16x8xf32> to vector<16x8xbf16>
      %c0_121 = arith.constant 0 : index
      %c24_122 = arith.constant 24 : index
      %193 = vector.load %arg20[%c0_121, %c24_122] : memref<16x32xbf16, #tpu.memory_space<vmem>>, vector<16x8xbf16>
      tpu.vector_store %arg20[%c0_121, %c24_122], %192 {strides = array<i32>} : memref<16x32xbf16, #tpu.memory_space<vmem>>, vector<16x8xbf16>,
      %c0_123 = arith.constant 0 : index
      %c0_124 = arith.constant 0 : index
      %194 = vector.load %arg20[%c0_123, %c0_124] : memref<16x32xbf16, #tpu.memory_space<vmem>>, vector<16x32xbf16>
      %c0_125 = arith.constant 0 : index
      %c0_126 = arith.constant 0 : index
      %195 = vector.load %arg10[%c0_125, %c0_126] : memref<32x32xbf16, #tpu.memory_space<vmem>>, vector<32x32xbf16>
      %cst_127 = arith.constant dense<0.000000e+00> : vector<16x32xf32>
      %196 = tpu.matmul %194, %195, %cst_127 {dimension_numbers = #tpu.dot_dimension_numbers<[1], [0], [0], [1], [0, 0, 1, 1], [], []>} : vector<16x32xbf16>, vector<32x32xbf16>, vector<16x32xf32> -> vector<16x32xf32>
      %c0_128 = arith.constant 0 : index
      %c0_129 = arith.constant 0 : index
      %197 = vector.load %arg11[%c0_128, %c0_129] : memref<1x32xf32, #tpu.memory_space<vmem>>, vector<1x32xf32>
      %c0_130 = arith.constant 0 : index
      %c0_131 = arith.constant 0 : index
      %198 = vector.load %arg12[%c0_130, %c0_131] : memref<1x32xf32, #tpu.memory_space<vmem>>, vector<1x32xf32>
      %cst_132 = arith.constant dense<0.000000e+00> : vector<16xf32>
      %199 = vector.multi_reduction <add>, %196, %cst_132 [1] : vector<16x32xf32> to vector<16xf32>
      %200 = vector.shape_cast %199 : vector<16xf32> to vector<16x1xf32>
      %cst_133 = arith.constant 3.200000e+01 : f32
      %201 = vector.broadcast %cst_133 : f32 to vector<16x1xf32>
      %202 = arith.divf %200, %201 : vector<16x1xf32>
      %203 = vector.broadcast %202 : vector<16x1xf32> to vector<16x32xf32>
      %204 = arith.subf %196, %203 : vector<16x32xf32>
      %205 = arith.mulf %204, %204 : vector<16x32xf32>
      %cst_134 = arith.constant dense<0.000000e+00> : vector<16xf32>
      %206 = vector.multi_reduction <add>, %205, %cst_134 [1] : vector<16x32xf32> to vector<16xf32>
      %207 = vector.shape_cast %206 : vector<16xf32> to vector<16x1xf32>
      %cst_135 = arith.constant 3.200000e+01 : f32
      %208 = vector.broadcast %cst_135 : f32 to vector<16x1xf32>
      %209 = arith.divf %207, %208 : vector<16x1xf32>
      %210 = vector.broadcast %202 : vector<16x1xf32> to vector<16x32xf32>
      %211 = arith.subf %196, %210 : vector<16x32xf32>
      %cst_136 = arith.constant 9.99999974E-6 : f32
      %212 = vector.broadcast %cst_136 : f32 to vector<16x1xf32>
      %213 = arith.addf %209, %212 : vector<16x1xf32>
      %214 = math.rsqrt %213 : vector<16x1xf32>
      %215 = vector.broadcast %214 : vector<16x1xf32> to vector<16x32xf32>
      %216 = arith.mulf %211, %215 : vector<16x32xf32>
      %217 = vector.broadcast %197 : vector<1x32xf32> to vector<16x32xf32>
      %218 = arith.mulf %216, %217 : vector<16x32xf32>
      %219 = vector.broadcast %198 : vector<1x32xf32> to vector<16x32xf32>
      %220 = arith.addf %218, %219 : vector<16x32xf32>
      %c0_137 = arith.constant 0 : index
      %c0_138 = arith.constant 0 : index
      %221 = vector.load %arg13[%c0_137, %c0_138] : memref<32x64xbf16, #tpu.memory_space<vmem>>, vector<32x64xbf16>
      %cst_139 = arith.constant dense<0.000000e+00> : vector<16x64xf32>
      %222 = tpu.matmul %2, %221, %cst_139 {dimension_numbers = #tpu.dot_dimension_numbers<[1], [0], [0], [1], [0, 0, 1, 1], [], []>} : vector<16x32xbf16>, vector<32x64xbf16>, vector<16x64xf32> -> vector<16x64xf32>
      %223 = arith.truncf %220 : vector<16x32xf32> to vector<16x32xbf16>
      %c0_140 = arith.constant 0 : index
      %c0_141 = arith.constant 0 : index
      %224 = vector.load %arg14[%c0_140, %c0_141] : memref<32x64xbf16, #tpu.memory_space<vmem>>, vector<32x64xbf16>
      %cst_142 = arith.constant dense<0.000000e+00> : vector<16x64xf32>
      %225 = tpu.matmul %223, %224, %cst_142 {dimension_numbers = #tpu.dot_dimension_numbers<[1], [0], [0], [1], [0, 0, 1, 1], [], []>} : vector<16x32xbf16>, vector<32x64xbf16>, vector<16x64xf32> -> vector<16x64xf32>
      %226 = arith.addf %222, %225 : vector<16x64xf32>
      %cst_143 = arith.constant 0.000000e+00 : f32
      %227 = vector.broadcast %cst_143 : f32 to vector<16x64xf32>
      %228 = arith.maximumf %226, %227 : vector<16x64xf32>
      %229 = arith.truncf %228 : vector<16x64xf32> to vector<16x64xbf16>
      %c0_144 = arith.constant 0 : index
      %c0_145 = arith.constant 0 : index
      %230 = vector.load %arg15[%c0_144, %c0_145] : memref<64x32xbf16, #tpu.memory_space<vmem>>, vector<64x32xbf16>
      %cst_146 = arith.constant dense<0.000000e+00> : vector<16x32xf32>
      %231 = tpu.matmul %229, %230, %cst_146 {dimension_numbers = #tpu.dot_dimension_numbers<[1], [0], [0], [1], [0, 0, 1, 1], [], []>} : vector<16x64xbf16>, vector<64x32xbf16>, vector<16x32xf32> -> vector<16x32xf32>
      %c0_147 = arith.constant 0 : index
      %c0_148 = arith.constant 0 : index
      %232 = vector.load %arg16[%c0_147, %c0_148] : memref<1x32xf32, #tpu.memory_space<vmem>>, vector<1x32xf32>
      %c0_149 = arith.constant 0 : index
      %c0_150 = arith.constant 0 : index
      %233 = vector.load %arg17[%c0_149, %c0_150] : memref<1x32xf32, #tpu.memory_space<vmem>>, vector<1x32xf32>
      %cst_151 = arith.constant dense<0.000000e+00> : vector<16xf32>
      %234 = vector.multi_reduction <add>, %231, %cst_151 [1] : vector<16x32xf32> to vector<16xf32>
      %235 = vector.shape_cast %234 : vector<16xf32> to vector<16x1xf32>
      %cst_152 = arith.constant 3.200000e+01 : f32
      %236 = vector.broadcast %cst_152 : f32 to vector<16x1xf32>
      %237 = arith.divf %235, %236 : vector<16x1xf32>
      %238 = vector.broadcast %237 : vector<16x1xf32> to vector<16x32xf32>
      %239 = arith.subf %231, %238 : vector<16x32xf32>
      %240 = arith.mulf %239, %239 : vector<16x32xf32>
      %cst_153 = arith.constant dense<0.000000e+00> : vector<16xf32>
      %241 = vector.multi_reduction <add>, %240, %cst_153 [1] : vector<16x32xf32> to vector<16xf32>
      %242 = vector.shape_cast %241 : vector<16xf32> to vector<16x1xf32>
      %cst_154 = arith.constant 3.200000e+01 : f32
      %243 = vector.broadcast %cst_154 : f32 to vector<16x1xf32>
      %244 = arith.divf %242, %243 : vector<16x1xf32>
      %245 = vector.broadcast %237 : vector<16x1xf32> to vector<16x32xf32>
      %246 = arith.subf %231, %245 : vector<16x32xf32>
      %cst_155 = arith.constant 9.99999974E-6 : f32
      %247 = vector.broadcast %cst_155 : f32 to vector<16x1xf32>
      %248 = arith.addf %244, %247 : vector<16x1xf32>
      %249 = math.rsqrt %248 : vector<16x1xf32>
      %250 = vector.broadcast %249 : vector<16x1xf32> to vector<16x32xf32>
      %251 = arith.mulf %246, %250 : vector<16x32xf32>
      %252 = vector.broadcast %232 : vector<1x32xf32> to vector<16x32xf32>
      %253 = arith.mulf %251, %252 : vector<16x32xf32>
      %254 = vector.broadcast %233 : vector<1x32xf32> to vector<16x32xf32>
      %255 = arith.addf %253, %254 : vector<16x32xf32>
      %256 = arith.addf %1, %255 : vector<16x32xf32>
      %c0_156 = arith.constant 0 : index
      %c0_157 = arith.constant 0 : index
      %c0_158 = arith.constant 0 : index
      %257 = vector.load %arg18[%c0_156, %c0_157, %c0_158] : memref<1x16x32xf32, #tpu.memory_space<vmem>>, vector<1x16x32xf32>
      %258 = vector.shape_cast %257 : vector<1x16x32xf32> to vector<16x32xf32>
      %259 = vector.shape_cast %256 : vector<16x32xf32> to vector<1x16x32xf32>
      tpu.vector_store %arg18[%c0_156, %c0_157, %c0_158], %259 {strides = array<i32>} : memref<1x16x32xf32, #tpu.memory_space<vmem>>, vector<1x16x32xf32>,
    } else {
    }
    return
  }
  func.func @transform_0(%arg0: i32, %arg1: i32, %arg2: i32) -> (i32, i32, i32) {
    %c0_i32 = arith.constant 0 : i32
    %c0_i32_0 = arith.constant 0 : i32
    return %arg0, %arg1, %c0_i32 : i32, i32, i32
  }
  func.func @transform_1(%arg0: i32, %arg1: i32, %arg2: i32) -> (i32, i32, i32) {
    %c0_i32 = arith.constant 0 : i32
    %c0_i32_0 = arith.constant 0 : i32
    return %arg0, %arg2, %c0_i32 : i32, i32, i32
  }
  func.func @transform_2(%arg0: i32, %arg1: i32, %arg2: i32) -> (i32, i32, i32) {
    %c0_i32 = arith.constant 0 : i32
    %c0_i32_0 = arith.constant 0 : i32
    return %arg0, %arg1, %c0_i32 : i32, i32, i32
  }
  func.func @transform_3(%arg0: i32, %arg1: i32, %arg2: i32) -> (i32, i32, i32) {
    %c0_i32 = arith.constant 0 : i32
    %c0_i32_0 = arith.constant 0 : i32
    return %arg0, %c0_i32, %arg2 : i32, i32, i32
  }
  func.func @transform_4(%arg0: i32, %arg1: i32, %arg2: i32) -> (i32, i32) {
    %c0_i32 = arith.constant 0 : i32
    %c0_i32_0 = arith.constant 0 : i32
    %c0_i32_1 = arith.constant 0 : i32
    return %c0_i32, %c0_i32_0 : i32, i32
  }
  func.func @transform_5(%arg0: i32, %arg1: i32, %arg2: i32) -> (i32, i32) {
    %c0_i32 = arith.constant 0 : i32
    %c0_i32_0 = arith.constant 0 : i32
    %c0_i32_1 = arith.constant 0 : i32
    return %c0_i32, %c0_i32_0 : i32, i32
  }
  func.func @transform_6(%arg0: i32, %arg1: i32, %arg2: i32) -> (i32, i32) {
    %c0_i32 = arith.constant 0 : i32
    %c0_i32_0 = arith.constant 0 : i32
    %c0_i32_1 = arith.constant 0 : i32
    return %c0_i32, %c0_i32_0 : i32, i32
  }
  func.func @transform_7(%arg0: i32, %arg1: i32, %arg2: i32) -> (i32, i32) {
    %c0_i32 = arith.constant 0 : i32
    %c0_i32_0 = arith.constant 0 : i32
    %c0_i32_1 = arith.constant 0 : i32
    return %c0_i32, %c0_i32_0 : i32, i32
  }
  func.func @transform_8(%arg0: i32, %arg1: i32, %arg2: i32) -> (i32, i32) {
    %c0_i32 = arith.constant 0 : i32
    %c0_i32_0 = arith.constant 0 : i32
    %c0_i32_1 = arith.constant 0 : i32
    return %c0_i32, %c0_i32_0 : i32, i32
  }
  func.func @transform_9(%arg0: i32, %arg1: i32, %arg2: i32) -> (i32, i32) {
    %c0_i32 = arith.constant 0 : i32
    %c0_i32_0 = arith.constant 0 : i32
    %c0_i32_1 = arith.constant 0 : i32
    return %c0_i32, %c0_i32_0 : i32, i32
  }
  func.func @transform_10(%arg0: i32, %arg1: i32, %arg2: i32) -> (i32, i32) {
    %c0_i32 = arith.constant 0 : i32
    %c0_i32_0 = arith.constant 0 : i32
    %c0_i32_1 = arith.constant 0 : i32
    return %c0_i32, %c0_i32_0 : i32, i32
  }
  func.func @transform_11(%arg0: i32, %arg1: i32, %arg2: i32) -> (i32, i32) {
    %c0_i32 = arith.constant 0 : i32
    %c0_i32_0 = arith.constant 0 : i32
    %c0_i32_1 = arith.constant 0 : i32
    return %c0_i32, %c0_i32_0 : i32, i32
  }
  func.func @transform_12(%arg0: i32, %arg1: i32, %arg2: i32) -> (i32, i32) {
    %c0_i32 = arith.constant 0 : i32
    %c0_i32_0 = arith.constant 0 : i32
    %c0_i32_1 = arith.constant 0 : i32
    return %c0_i32, %c0_i32_0 : i32, i32
  }
  func.func @transform_13(%arg0: i32, %arg1: i32, %arg2: i32) -> (i32, i32) {
    %c0_i32 = arith.constant 0 : i32
    %c0_i32_0 = arith.constant 0 : i32
    %c0_i32_1 = arith.constant 0 : i32
    return %c0_i32, %c0_i32_0 : i32, i32
  }
  func.func @transform_14(%arg0: i32, %arg1: i32, %arg2: i32) -> (i32, i32) {
    %c0_i32 = arith.constant 0 : i32
    %c0_i32_0 = arith.constant 0 : i32
    %c0_i32_1 = arith.constant 0 : i32
    return %c0_i32, %c0_i32_0 : i32, i32
  }
  func.func @transform_15(%arg0: i32, %arg1: i32, %arg2: i32) -> (i32, i32, i32) {
    %c0_i32 = arith.constant 0 : i32
    %c0_i32_0 = arith.constant 0 : i32
    return %arg0, %arg1, %c0_i32 : i32, i32, i32
  }
}

module attributes {stable_mosaic.version = 11 : i64} {
  func.func @geo_attn_kernel(%arg0: i32, %arg1: i32, %arg2: i32, %arg3: memref<1x16x32xf32, #tpu.memory_space<vmem>>, %arg4: memref<1x16x32xf32, #tpu.memory_space<vmem>>, %arg5: memref<1x16x1xf32, #tpu.memory_space<vmem>>, %arg6: memref<1x1x16xf32, #tpu.memory_space<vmem>>, %arg7: memref<32x32xbf16, #tpu.memory_space<vmem>>, %arg8: memref<32x32xbf16, #tpu.memory_space<vmem>>, %arg9: memref<32x32xbf16, #tpu.memory_space<vmem>>, %arg10: memref<32x32xbf16, #tpu.memory_space<vmem>>, %arg11: memref<1x32xf32, #tpu.memory_space<vmem>>, %arg12: memref<1x32xf32, #tpu.memory_space<vmem>>, %arg13: memref<32x64xbf16, #tpu.memory_space<vmem>>, %arg14: memref<32x64xbf16, #tpu.memory_space<vmem>>, %arg15: memref<64x32xbf16, #tpu.memory_space<vmem>>, %arg16: memref<1x32xf32, #tpu.memory_space<vmem>>, %arg17: memref<1x32xf32, #tpu.memory_space<vmem>>, %arg18: memref<1x16x32xf32, #tpu.memory_space<vmem>>, %arg19: memref<16x32xbf16, #tpu.memory_space<vmem>>, %arg20: memref<16x32xbf16, #tpu.memory_space<vmem>>, %arg21: memref<4x16x1xf32, #tpu.memory_space<vmem>>, %arg22: memref<4x16x1xf32, #tpu.memory_space<vmem>>, %arg23: memref<16x32xf32, #tpu.memory_space<vmem>>) attributes {dimension_semantics = [#tpu.dimension_semantics<parallel>, #tpu.dimension_semantics<parallel>, #tpu.dimension_semantics<arbitrary>], iteration_bounds = array<i64: 2, 1, 1>, scalar_prefetch = 0 : i64, scratch_operands = 5 : i64, tpu.core_type = #tpu.core_type<tc>, window_params = [{transform_indices = @transform_0, window_bounds = array<i64: 1, 16, 32>}, {transform_indices = @transform_1, window_bounds = array<i64: 1, 16, 32>}, {transform_indices = @transform_2, window_bounds = array<i64: 1, 16, 1>}, {transform_indices = @transform_3, window_bounds = array<i64: 1, 1, 16>}, {pipeline_mode = #tpu.pipeline_mode<synchronous>, transform_indices = @transform_4, window_bounds = array<i64: 32, 32>}, {pipeline_mode = #tpu.pipeline_mode<synchronous>, transform_indices = @transform_5, window_bounds = array<i64: 32, 32>}, {pipeline_mode = #tpu.pipeline_mode<synchronous>, transform_indices = @transform_6, window_bounds = array<i64: 32, 32>}, {pipeline_mode = #tpu.pipeline_mode<synchronous>, transform_indices = @transform_7, window_bounds = array<i64: 32, 32>}, {pipeline_mode = #tpu.pipeline_mode<synchronous>, transform_indices = @transform_8, window_bounds = array<i64: 1, 32>}, {pipeline_mode = #tpu.pipeline_mode<synchronous>, transform_indices = @transform_9, window_bounds = array<i64: 1, 32>}, {pipeline_mode = #tpu.pipeline_mode<synchronous>, transform_indices = @transform_10, window_bounds = array<i64: 32, 64>}, {pipeline_mode = #tpu.pipeline_mode<synchronous>, transform_indices = @transform_11, window_bounds = array<i64: 32, 64>}, {pipeline_mode = #tpu.pipeline_mode<synchronous>, transform_indices = @transform_12, window_bounds = array<i64: 64, 32>}, {pipeline_mode = #tpu.pipeline_mode<synchronous>, transform_indices = @transform_13, window_bounds = array<i64: 1, 32>}, {pipeline_mode = #tpu.pipeline_mode<synchronous>, transform_indices = @transform_14, window_bounds = array<i64: 1, 32>}, {transform_indices = @transform_15, window_bounds = array<i64: 1, 16, 32>}]} {
    %c0 = arith.constant 0 : index
    %c0_0 = arith.constant 0 : index
    %c0_1 = arith.constant 0 : index
    %0 = vector.load %arg3[%c0, %c0_0, %c0_1] : memref<1x16x32xf32, #tpu.memory_space<vmem>>, vector<1x16x32xf32>
    %1 = vector.shape_cast %0 : vector<1x16x32xf32> to vector<16x32xf32>
    %2 = arith.truncf %1 : vector<16x32xf32> to vector<16x32xbf16>
    %c0_i32 = arith.constant 0 : i32
    %3 = arith.cmpi eq, %arg2, %c0_i32 : i32
    %4 = arith.extui %3 : i1 to i32
    %c0_i32_2 = arith.constant 0 : i32
    %5 = arith.cmpi ne, %4, %c0_i32_2 : i32
    scf.if %5 {
      %c0_95 = arith.constant 0 : index
      %c0_96 = arith.constant 0 : index
      %162 = vector.load %arg7[%c0_95, %c0_96] : memref<32x32xbf16, #tpu.memory_space<vmem>>, vector<32x32xbf16>
      %cst_97 = arith.constant dense<0.000000e+00> : vector<16x32xf32>
      %163 = tpu.matmul %2, %162, %cst_97 {dimension_numbers = #tpu.dot_dimension_numbers<[1], [0], [0], [1], [0, 0, 1, 1], [], []>} : vector<16x32xbf16>, vector<32x32xbf16>, vector<16x32xf32> -> vector<16x32xf32>
      %164 = arith.truncf %163 : vector<16x32xf32> to vector<16x32xbf16>
      %c0_98 = arith.constant 0 : index
      %c0_99 = arith.constant 0 : index
      %165 = vector.load %arg19[%c0_98, %c0_99] : memref<16x32xbf16, #tpu.memory_space<vmem>>, vector<16x32xbf16>
      tpu.vector_store %arg19[%c0_98, %c0_99], %164 {strides = array<i32>} : memref<16x32xbf16, #tpu.memory_space<vmem>>, vector<16x32xbf16>,
      %cst_100 = arith.constant -1.000000e+30 : f32
      %166 = vector.broadcast %cst_100 : f32 to vector<4x16x1xf32>
      %c0_101 = arith.constant 0 : index
      %c0_102 = arith.constant 0 : index
      %c0_103 = arith.constant 0 : index
      %167 = vector.load %arg21[%c0_101, %c0_102, %c0_103] : memref<4x16x1xf32, #tpu.memory_space<vmem>>, vector<4x16x1xf32>
      tpu.vector_store %arg21[%c0_101, %c0_102, %c0_103], %166 {strides = array<i32>} : memref<4x16x1xf32, #tpu.memory_space<vmem>>, vector<4x16x1xf32>,
      %cst_104 = arith.constant 0.000000e+00 : f32
      %168 = vector.broadcast %cst_104 : f32 to vector<4x16x1xf32>
      %c0_105 = arith.constant 0 : index
      %c0_106 = arith.constant 0 : index
      %c0_107 = arith.constant 0 : index
      %169 = vector.load %arg22[%c0_105, %c0_106, %c0_107] : memref<4x16x1xf32, #tpu.memory_space<vmem>>, vector<4x16x1xf32>
      tpu.vector_store %arg22[%c0_105, %c0_106, %c0_107], %168 {strides = array<i32>} : memref<4x16x1xf32, #tpu.memory_space<vmem>>, vector<4x16x1xf32>,
      %cst_108 = arith.constant 0.000000e+00 : f32
      %170 = vector.broadcast %cst_108 : f32 to vector<16x32xf32>
      %c0_109 = arith.constant 0 : index
      %c0_110 = arith.constant 0 : index
      %171 = vector.load %arg23[%c0_109, %c0_110] : memref<16x32xf32, #tpu.memory_space<vmem>>, vector<16x32xf32>
      tpu.vector_store %arg23[%c0_109, %c0_110], %170 {strides = array<i32>} : memref<16x32xf32, #tpu.memory_space<vmem>>, vector<16x32xf32>,
    } else {
    }
    %c0_3 = arith.constant 0 : index
    %c0_4 = arith.constant 0 : index
    %c0_5 = arith.constant 0 : index
    %6 = vector.load %arg4[%c0_3, %c0_4, %c0_5] : memref<1x16x32xf32, #tpu.memory_space<vmem>>, vector<1x16x32xf32>
    %7 = vector.shape_cast %6 : vector<1x16x32xf32> to vector<16x32xf32>
    %8 = arith.truncf %7 : vector<16x32xf32> to vector<16x32xbf16>
    %c0_6 = arith.constant 0 : index
    %c0_7 = arith.constant 0 : index
    %9 = vector.load %arg8[%c0_6, %c0_7] : memref<32x32xbf16, #tpu.memory_space<vmem>>, vector<32x32xbf16>
    %cst = arith.constant dense<0.000000e+00> : vector<16x32xf32>
    %10 = tpu.matmul %8, %9, %cst {dimension_numbers = #tpu.dot_dimension_numbers<[1], [0], [0], [1], [0, 0, 1, 1], [], []>} : vector<16x32xbf16>, vector<32x32xbf16>, vector<16x32xf32> -> vector<16x32xf32>
    %11 = arith.truncf %10 : vector<16x32xf32> to vector<16x32xbf16>
    %c0_8 = arith.constant 0 : index
    %c0_9 = arith.constant 0 : index
    %12 = vector.load %arg9[%c0_8, %c0_9] : memref<32x32xbf16, #tpu.memory_space<vmem>>, vector<32x32xbf16>
    %cst_10 = arith.constant dense<0.000000e+00> : vector<16x32xf32>
    %13 = tpu.matmul %8, %12, %cst_10 {dimension_numbers = #tpu.dot_dimension_numbers<[1], [0], [0], [1], [0, 0, 1, 1], [], []>} : vector<16x32xbf16>, vector<32x32xbf16>, vector<16x32xf32> -> vector<16x32xf32>
    %14 = arith.truncf %13 : vector<16x32xf32> to vector<16x32xbf16>
    %c0_11 = arith.constant 0 : index
    %c0_12 = arith.constant 0 : index
    %c0_13 = arith.constant 0 : index
    %15 = vector.load %arg5[%c0_11, %c0_12, %c0_13] : memref<1x16x1xf32, #tpu.memory_space<vmem>>, vector<1x16x1xf32>
    %16 = vector.shape_cast %15 : vector<1x16x1xf32> to vector<16x1xf32>
    %c0_14 = arith.constant 0 : index
    %c0_15 = arith.constant 0 : index
    %c0_16 = arith.constant 0 : index
    %17 = vector.load %arg6[%c0_14, %c0_15, %c0_16] : memref<1x1x16xf32, #tpu.memory_space<vmem>>, vector<1x1x16xf32>
    %18 = vector.shape_cast %17 : vector<1x1x16xf32> to vector<1x16xf32>
    %19 = vector.broadcast %16 : vector<16x1xf32> to vector<16x16xf32>
    %20 = vector.broadcast %18 : vector<1x16xf32> to vector<16x16xf32>
    %21 = arith.mulf %19, %20 : vector<16x16xf32>
    %c0_17 = arith.constant 0 : index
    %c0_18 = arith.constant 0 : index
    %22 = vector.load %arg19[%c0_17, %c0_18] : memref<16x32xbf16, #tpu.memory_space<vmem>>, vector<16x32xbf16>
    %23 = vector.extract_strided_slice %22 {offsets = [0, 0], sizes = [16, 8], strides = [1, 1]} : vector<16x32xbf16> to vector<16x8xbf16>
    %24 = vector.extract_strided_slice %11 {offsets = [0, 0], sizes = [16, 8], strides = [1, 1]} : vector<16x32xbf16> to vector<16x8xbf16>
    "tpu.trace_start"() <{level = 10 : i32, message = "ld,sd->ls"}> : () -> ()
    %cst_19 = arith.constant dense<0.000000e+00> : vector<16x16xf32>
    %25 = tpu.matmul %23, %24, %cst_19 {dimension_numbers = #tpu.dot_dimension_numbers<[1], [1], [0], [0], [0, 0, 1, 0], [], []>} : vector<16x8xbf16>, vector<16x8xbf16>, vector<16x16xf32> -> vector<16x16xf32>
    "tpu.trace_stop"() : () -> ()
    %26 = arith.addf %25, %21 : vector<16x16xf32>
    %c0_20 = arith.constant 0 : index
    %c0_21 = arith.constant 0 : index
    %c0_22 = arith.constant 0 : index
    %27 = vector.load %arg21[%c0_20, %c0_21, %c0_22] : memref<4x16x1xf32, #tpu.memory_space<vmem>>, vector<1x16x1xf32>
    %28 = vector.shape_cast %27 : vector<1x16x1xf32> to vector<16x1xf32>
    %cst_23 = arith.constant dense<0xFF800000> : vector<16xf32>
    %29 = vector.multi_reduction <maximumf>, %26, %cst_23 [1] : vector<16x16xf32> to vector<16xf32>
    %30 = vector.shape_cast %29 : vector<16xf32> to vector<16x1xf32>
    %31 = arith.maximumf %28, %30 : vector<16x1xf32>
    %32 = arith.subf %28, %31 : vector<16x1xf32>
    %33 = math.exp %32 : vector<16x1xf32>
    %34 = vector.broadcast %31 : vector<16x1xf32> to vector<16x16xf32>
    %35 = arith.subf %26, %34 : vector<16x16xf32>
    %36 = math.exp %35 : vector<16x16xf32>
    %c0_24 = arith.constant 0 : index
    %c0_25 = arith.constant 0 : index
    %c0_26 = arith.constant 0 : index
    %37 = vector.load %arg22[%c0_24, %c0_25, %c0_26] : memref<4x16x1xf32, #tpu.memory_space<vmem>>, vector<1x16x1xf32>
    %38 = vector.shape_cast %37 : vector<1x16x1xf32> to vector<16x1xf32>
    %39 = arith.mulf %33, %38 : vector<16x1xf32>
    %cst_27 = arith.constant dense<0.000000e+00> : vector<16xf32>
    %40 = vector.multi_reduction <add>, %36, %cst_27 [1] : vector<16x16xf32> to vector<16xf32>
    %41 = vector.shape_cast %40 : vector<16xf32> to vector<16x1xf32>
    %42 = arith.addf %39, %41 : vector<16x1xf32>
    %c0_28 = arith.constant 0 : index
    %c0_29 = arith.constant 0 : index
    %c0_30 = arith.constant 0 : index
    %43 = vector.load %arg22[%c0_28, %c0_29, %c0_30] : memref<4x16x1xf32, #tpu.memory_space<vmem>>, vector<1x16x1xf32>
    %44 = vector.shape_cast %43 : vector<1x16x1xf32> to vector<16x1xf32>
    %45 = vector.shape_cast %42 : vector<16x1xf32> to vector<1x16x1xf32>
    tpu.vector_store %arg22[%c0_28, %c0_29, %c0_30], %45 {strides = array<i32>} : memref<4x16x1xf32, #tpu.memory_space<vmem>>, vector<1x16x1xf32>,
    %c0_31 = arith.constant 0 : index
    %c0_32 = arith.constant 0 : index
    %46 = vector.load %arg23[%c0_31, %c0_32] : memref<16x32xf32, #tpu.memory_space<vmem>>, vector<16x8xf32>
    %47 = vector.broadcast %33 : vector<16x1xf32> to vector<16x8xf32>
    %48 = arith.mulf %47, %46 : vector<16x8xf32>
    %49 = arith.truncf %36 : vector<16x16xf32> to vector<16x16xbf16>
    %50 = vector.extract_strided_slice %14 {offsets = [0, 0], sizes = [16, 8], strides = [1, 1]} : vector<16x32xbf16> to vector<16x8xbf16>
    %cst_33 = arith.constant dense<0.000000e+00> : vector<16x8xf32>
    %51 = tpu.matmul %49, %50, %cst_33 {dimension_numbers = #tpu.dot_dimension_numbers<[1], [0], [0], [1], [0, 0, 1, 1], [], []>} : vector<16x16xbf16>, vector<16x8xbf16>, vector<16x8xf32> -> vector<16x8xf32>
    %52 = arith.addf %48, %51 : vector<16x8xf32>
    %c0_34 = arith.constant 0 : index
    %c0_35 = arith.constant 0 : index
    %53 = vector.load %arg23[%c0_34, %c0_35] : memref<16x32xf32, #tpu.memory_space<vmem>>, vector<16x8xf32>
    tpu.vector_store %arg23[%c0_34, %c0_35], %52 {strides = array<i32>} : memref<16x32xf32, #tpu.memory_space<vmem>>, vector<16x8xf32>,
    %c0_36 = arith.constant 0 : index
    %c0_37 = arith.constant 0 : index
    %c0_38 = arith.constant 0 : index
    %54 = vector.load %arg21[%c0_36, %c0_37, %c0_38] : memref<4x16x1xf32, #tpu.memory_space<vmem>>, vector<1x16x1xf32>
    %55 = vector.shape_cast %54 : vector<1x16x1xf32> to vector<16x1xf32>
    %56 = vector.shape_cast %31 : vector<16x1xf32> to vector<1x16x1xf32>
    tpu.vector_store %arg21[%c0_36, %c0_37, %c0_38], %56 {strides = array<i32>} : memref<4x16x1xf32, #tpu.memory_space<vmem>>, vector<1x16x1xf32>,
    %57 = vector.extract_strided_slice %22 {offsets = [0, 8], sizes = [16, 8], strides = [1, 1]} : vector<16x32xbf16> to vector<16x8xbf16>
    %58 = vector.extract_strided_slice %11 {offsets = [0, 8], sizes = [16, 8], strides = [1, 1]} : vector<16x32xbf16> to vector<16x8xbf16>
    "tpu.trace_start"() <{level = 10 : i32, message = "ld,sd->ls"}> : () -> ()
    %cst_39 = arith.constant dense<0.000000e+00> : vector<16x16xf32>
    %59 = tpu.matmul %57, %58, %cst_39 {dimension_numbers = #tpu.dot_dimension_numbers<[1], [1], [0], [0], [0, 0, 1, 0], [], []>} : vector<16x8xbf16>, vector<16x8xbf16>, vector<16x16xf32> -> vector<16x16xf32>
    "tpu.trace_stop"() : () -> ()
    %60 = arith.addf %59, %21 : vector<16x16xf32>
    %c1 = arith.constant 1 : index
    %c0_40 = arith.constant 0 : index
    %c0_41 = arith.constant 0 : index
    %61 = vector.load %arg21[%c1, %c0_40, %c0_41] : memref<4x16x1xf32, #tpu.memory_space<vmem>>, vector<1x16x1xf32>
    %62 = vector.shape_cast %61 : vector<1x16x1xf32> to vector<16x1xf32>
    %cst_42 = arith.constant dense<0xFF800000> : vector<16xf32>
    %63 = vector.multi_reduction <maximumf>, %60, %cst_42 [1] : vector<16x16xf32> to vector<16xf32>
    %64 = vector.shape_cast %63 : vector<16xf32> to vector<16x1xf32>
    %65 = arith.maximumf %62, %64 : vector<16x1xf32>
    %66 = arith.subf %62, %65 : vector<16x1xf32>
    %67 = math.exp %66 : vector<16x1xf32>
    %68 = vector.broadcast %65 : vector<16x1xf32> to vector<16x16xf32>
    %69 = arith.subf %60, %68 : vector<16x16xf32>
    %70 = math.exp %69 : vector<16x16xf32>
    %c1_43 = arith.constant 1 : index
    %c0_44 = arith.constant 0 : index
    %c0_45 = arith.constant 0 : index
    %71 = vector.load %arg22[%c1_43, %c0_44, %c0_45] : memref<4x16x1xf32, #tpu.memory_space<vmem>>, vector<1x16x1xf32>
    %72 = vector.shape_cast %71 : vector<1x16x1xf32> to vector<16x1xf32>
    %73 = arith.mulf %67, %72 : vector<16x1xf32>
    %cst_46 = arith.constant dense<0.000000e+00> : vector<16xf32>
    %74 = vector.multi_reduction <add>, %70, %cst_46 [1] : vector<16x16xf32> to vector<16xf32>
    %75 = vector.shape_cast %74 : vector<16xf32> to vector<16x1xf32>
    %76 = arith.addf %73, %75 : vector<16x1xf32>
    %c1_47 = arith.constant 1 : index
    %c0_48 = arith.constant 0 : index
    %c0_49 = arith.constant 0 : index
    %77 = vector.load %arg22[%c1_47, %c0_48, %c0_49] : memref<4x16x1xf32, #tpu.memory_space<vmem>>, vector<1x16x1xf32>
    %78 = vector.shape_cast %77 : vector<1x16x1xf32> to vector<16x1xf32>
    %79 = vector.shape_cast %76 : vector<16x1xf32> to vector<1x16x1xf32>
    tpu.vector_store %arg22[%c1_47, %c0_48, %c0_49], %79 {strides = array<i32>} : memref<4x16x1xf32, #tpu.memory_space<vmem>>, vector<1x16x1xf32>,
    %c0_50 = arith.constant 0 : index
    %c8 = arith.constant 8 : index
    %80 = vector.load %arg23[%c0_50, %c8] : memref<16x32xf32, #tpu.memory_space<vmem>>, vector<16x8xf32>
    %81 = vector.broadcast %67 : vector<16x1xf32> to vector<16x8xf32>
    %82 = arith.mulf %81, %80 : vector<16x8xf32>
    %83 = arith.truncf %70 : vector<16x16xf32> to vector<16x16xbf16>
    %84 = vector.extract_strided_slice %14 {offsets = [0, 8], sizes = [16, 8], strides = [1, 1]} : vector<16x32xbf16> to vector<16x8xbf16>
    %cst_51 = arith.constant dense<0.000000e+00> : vector<16x8xf32>
    %85 = tpu.matmul %83, %84, %cst_51 {dimension_numbers = #tpu.dot_dimension_numbers<[1], [0], [0], [1], [0, 0, 1, 1], [], []>} : vector<16x16xbf16>, vector<16x8xbf16>, vector<16x8xf32> -> vector<16x8xf32>
    %86 = arith.addf %82, %85 : vector<16x8xf32>
    %c0_52 = arith.constant 0 : index
    %c8_53 = arith.constant 8 : index
    %87 = vector.load %arg23[%c0_52, %c8_53] : memref<16x32xf32, #tpu.memory_space<vmem>>, vector<16x8xf32>
    tpu.vector_store %arg23[%c0_52, %c8_53], %86 {strides = array<i32>} : memref<16x32xf32, #tpu.memory_space<vmem>>, vector<16x8xf32>,
    %c1_54 = arith.constant 1 : index
    %c0_55 = arith.constant 0 : index
    %c0_56 = arith.constant 0 : index
    %88 = vector.load %arg21[%c1_54, %c0_55, %c0_56] : memref<4x16x1xf32, #tpu.memory_space<vmem>>, vector<1x16x1xf32>
    %89 = vector.shape_cast %88 : vector<1x16x1xf32> to vector<16x1xf32>
    %90 = vector.shape_cast %65 : vector<16x1xf32> to vector<1x16x1xf32>
    tpu.vector_store %arg21[%c1_54, %c0_55, %c0_56], %90 {strides = array<i32>} : memref<4x16x1xf32, #tpu.memory_space<vmem>>, vector<1x16x1xf32>,
    %91 = vector.extract_strided_slice %22 {offsets = [0, 16], sizes = [16, 8], strides = [1, 1]} : vector<16x32xbf16> to vector<16x8xbf16>
    %92 = vector.extract_strided_slice %11 {offsets = [0, 16], sizes = [16, 8], strides = [1, 1]} : vector<16x32xbf16> to vector<16x8xbf16>
    "tpu.trace_start"() <{level = 10 : i32, message = "ld,sd->ls"}> : () -> ()
    %cst_57 = arith.constant dense<0.000000e+00> : vector<16x16xf32>
    %93 = tpu.matmul %91, %92, %cst_57 {dimension_numbers = #tpu.dot_dimension_numbers<[1], [1], [0], [0], [0, 0, 1, 0], [], []>} : vector<16x8xbf16>, vector<16x8xbf16>, vector<16x16xf32> -> vector<16x16xf32>
    "tpu.trace_stop"() : () -> ()
    %94 = arith.addf %93, %21 : vector<16x16xf32>
    %c2 = arith.constant 2 : index
    %c0_58 = arith.constant 0 : index
    %c0_59 = arith.constant 0 : index
    %95 = vector.load %arg21[%c2, %c0_58, %c0_59] : memref<4x16x1xf32, #tpu.memory_space<vmem>>, vector<1x16x1xf32>
    %96 = vector.shape_cast %95 : vector<1x16x1xf32> to vector<16x1xf32>
    %cst_60 = arith.constant dense<0xFF800000> : vector<16xf32>
    %97 = vector.multi_reduction <maximumf>, %94, %cst_60 [1] : vector<16x16xf32> to vector<16xf32>
    %98 = vector.shape_cast %97 : vector<16xf32> to vector<16x1xf32>
    %99 = arith.maximumf %96, %98 : vector<16x1xf32>
    %100 = arith.subf %96, %99 : vector<16x1xf32>
    %101 = math.exp %100 : vector<16x1xf32>
    %102 = vector.broadcast %99 : vector<16x1xf32> to vector<16x16xf32>
    %103 = arith.subf %94, %102 : vector<16x16xf32>
    %104 = math.exp %103 : vector<16x16xf32>
    %c2_61 = arith.constant 2 : index
    %c0_62 = arith.constant 0 : index
    %c0_63 = arith.constant 0 : index
    %105 = vector.load %arg22[%c2_61, %c0_62, %c0_63] : memref<4x16x1xf32, #tpu.memory_space<vmem>>, vector<1x16x1xf32>
    %106 = vector.shape_cast %105 : vector<1x16x1xf32> to vector<16x1xf32>
    %107 = arith.mulf %101, %106 : vector<16x1xf32>
    %cst_64 = arith.constant dense<0.000000e+00> : vector<16xf32>
    %108 = vector.multi_reduction <add>, %104, %cst_64 [1] : vector<16x16xf32> to vector<16xf32>
    %109 = vector.shape_cast %108 : vector<16xf32> to vector<16x1xf32>
    %110 = arith.addf %107, %109 : vector<16x1xf32>
    %c2_65 = arith.constant 2 : index
    %c0_66 = arith.constant 0 : index
    %c0_67 = arith.constant 0 : index
    %111 = vector.load %arg22[%c2_65, %c0_66, %c0_67] : memref<4x16x1xf32, #tpu.memory_space<vmem>>, vector<1x16x1xf32>
    %112 = vector.shape_cast %111 : vector<1x16x1xf32> to vector<16x1xf32>
    %113 = vector.shape_cast %110 : vector<16x1xf32> to vector<1x16x1xf32>
    tpu.vector_store %arg22[%c2_65, %c0_66, %c0_67], %113 {strides = array<i32>} : memref<4x16x1xf32, #tpu.memory_space<vmem>>, vector<1x16x1xf32>,
    %c0_68 = arith.constant 0 : index
    %c16 = arith.constant 16 : index
    %114 = vector.load %arg23[%c0_68, %c16] : memref<16x32xf32, #tpu.memory_space<vmem>>, vector<16x8xf32>
    %115 = vector.broadcast %101 : vector<16x1xf32> to vector<16x8xf32>
    %116 = arith.mulf %115, %114 : vector<16x8xf32>
    %117 = arith.truncf %104 : vector<16x16xf32> to vector<16x16xbf16>
    %118 = vector.extract_strided_slice %14 {offsets = [0, 16], sizes = [16, 8], strides = [1, 1]} : vector<16x32xbf16> to vector<16x8xbf16>
    %cst_69 = arith.constant dense<0.000000e+00> : vector<16x8xf32>
    %119 = tpu.matmul %117, %118, %cst_69 {dimension_numbers = #tpu.dot_dimension_numbers<[1], [0], [0], [1], [0, 0, 1, 1], [], []>} : vector<16x16xbf16>, vector<16x8xbf16>, vector<16x8xf32> -> vector<16x8xf32>
    %120 = arith.addf %116, %119 : vector<16x8xf32>
    %c0_70 = arith.constant 0 : index
    %c16_71 = arith.constant 16 : index
    %121 = vector.load %arg23[%c0_70, %c16_71] : memref<16x32xf32, #tpu.memory_space<vmem>>, vector<16x8xf32>
    tpu.vector_store %arg23[%c0_70, %c16_71], %120 {strides = array<i32>} : memref<16x32xf32, #tpu.memory_space<vmem>>, vector<16x8xf32>,
    %c2_72 = arith.constant 2 : index
    %c0_73 = arith.constant 0 : index
    %c0_74 = arith.constant 0 : index
    %122 = vector.load %arg21[%c2_72, %c0_73, %c0_74] : memref<4x16x1xf32, #tpu.memory_space<vmem>>, vector<1x16x1xf32>
    %123 = vector.shape_cast %122 : vector<1x16x1xf32> to vector<16x1xf32>
    %124 = vector.shape_cast %99 : vector<16x1xf32> to vector<1x16x1xf32>
    tpu.vector_store %arg21[%c2_72, %c0_73, %c0_74], %124 {strides = array<i32>} : memref<4x16x1xf32, #tpu.memory_space<vmem>>, vector<1x16x1xf32>,
    %125 = vector.extract_strided_slice %22 {offsets = [0, 24], sizes = [16, 8], strides = [1, 1]} : vector<16x32xbf16> to vector<16x8xbf16>
    %126 = vector.extract_strided_slice %11 {offsets = [0, 24], sizes = [16, 8], strides = [1, 1]} : vector<16x32xbf16> to vector<16x8xbf16>
    "tpu.trace_start"() <{level = 10 : i32, message = "ld,sd->ls"}> : () -> ()
    %cst_75 = arith.constant dense<0.000000e+00> : vector<16x16xf32>
    %127 = tpu.matmul %125, %126, %cst_75 {dimension_numbers = #tpu.dot_dimension_numbers<[1], [1], [0], [0], [0, 0, 1, 0], [], []>} : vector<16x8xbf16>, vector<16x8xbf16>, vector<16x16xf32> -> vector<16x16xf32>
    "tpu.trace_stop"() : () -> ()
    %128 = arith.addf %127, %21 : vector<16x16xf32>
    %c3 = arith.constant 3 : index
    %c0_76 = arith.constant 0 : index
    %c0_77 = arith.constant 0 : index
    %129 = vector.load %arg21[%c3, %c0_76, %c0_77] : memref<4x16x1xf32, #tpu.memory_space<vmem>>, vector<1x16x1xf32>
    %130 = vector.shape_cast %129 : vector<1x16x1xf32> to vector<16x1xf32>
    %cst_78 = arith.constant dense<0xFF800000> : vector<16xf32>
    %131 = vector.multi_reduction <maximumf>, %128, %cst_78 [1] : vector<16x16xf32> to vector<16xf32>
    %132 = vector.shape_cast %131 : vector<16xf32> to vector<16x1xf32>
    %133 = arith.maximumf %130, %132 : vector<16x1xf32>
    %134 = arith.subf %130, %133 : vector<16x1xf32>
    %135 = math.exp %134 : vector<16x1xf32>
    %136 = vector.broadcast %133 : vector<16x1xf32> to vector<16x16xf32>
    %137 = arith.subf %128, %136 : vector<16x16xf32>
    %138 = math.exp %137 : vector<16x16xf32>
    %c3_79 = arith.constant 3 : index
    %c0_80 = arith.constant 0 : index
    %c0_81 = arith.constant 0 : index
    %139 = vector.load %arg22[%c3_79, %c0_80, %c0_81] : memref<4x16x1xf32, #tpu.memory_space<vmem>>, vector<1x16x1xf32>
    %140 = vector.shape_cast %139 : vector<1x16x1xf32> to vector<16x1xf32>
    %141 = arith.mulf %135, %140 : vector<16x1xf32>
    %cst_82 = arith.constant dense<0.000000e+00> : vector<16xf32>
    %142 = vector.multi_reduction <add>, %138, %cst_82 [1] : vector<16x16xf32> to vector<16xf32>
    %143 = vector.shape_cast %142 : vector<16xf32> to vector<16x1xf32>
    %144 = arith.addf %141, %143 : vector<16x1xf32>
    %c3_83 = arith.constant 3 : index
    %c0_84 = arith.constant 0 : index
    %c0_85 = arith.constant 0 : index
    %145 = vector.load %arg22[%c3_83, %c0_84, %c0_85] : memref<4x16x1xf32, #tpu.memory_space<vmem>>, vector<1x16x1xf32>
    %146 = vector.shape_cast %145 : vector<1x16x1xf32> to vector<16x1xf32>
    %147 = vector.shape_cast %144 : vector<16x1xf32> to vector<1x16x1xf32>
    tpu.vector_store %arg22[%c3_83, %c0_84, %c0_85], %147 {strides = array<i32>} : memref<4x16x1xf32, #tpu.memory_space<vmem>>, vector<1x16x1xf32>,
    %c0_86 = arith.constant 0 : index
    %c24 = arith.constant 24 : index
    %148 = vector.load %arg23[%c0_86, %c24] : memref<16x32xf32, #tpu.memory_space<vmem>>, vector<16x8xf32>
    %149 = vector.broadcast %135 : vector<16x1xf32> to vector<16x8xf32>
    %150 = arith.mulf %149, %148 : vector<16x8xf32>
    %151 = arith.truncf %138 : vector<16x16xf32> to vector<16x16xbf16>
    %152 = vector.extract_strided_slice %14 {offsets = [0, 24], sizes = [16, 8], strides = [1, 1]} : vector<16x32xbf16> to vector<16x8xbf16>
    %cst_87 = arith.constant dense<0.000000e+00> : vector<16x8xf32>
    %153 = tpu.matmul %151, %152, %cst_87 {dimension_numbers = #tpu.dot_dimension_numbers<[1], [0], [0], [1], [0, 0, 1, 1], [], []>} : vector<16x16xbf16>, vector<16x8xbf16>, vector<16x8xf32> -> vector<16x8xf32>
    %154 = arith.addf %150, %153 : vector<16x8xf32>
    %c0_88 = arith.constant 0 : index
    %c24_89 = arith.constant 24 : index
    %155 = vector.load %arg23[%c0_88, %c24_89] : memref<16x32xf32, #tpu.memory_space<vmem>>, vector<16x8xf32>
    tpu.vector_store %arg23[%c0_88, %c24_89], %154 {strides = array<i32>} : memref<16x32xf32, #tpu.memory_space<vmem>>, vector<16x8xf32>,
    %c3_90 = arith.constant 3 : index
    %c0_91 = arith.constant 0 : index
    %c0_92 = arith.constant 0 : index
    %156 = vector.load %arg21[%c3_90, %c0_91, %c0_92] : memref<4x16x1xf32, #tpu.memory_space<vmem>>, vector<1x16x1xf32>
    %157 = vector.shape_cast %156 : vector<1x16x1xf32> to vector<16x1xf32>
    %158 = vector.shape_cast %133 : vector<16x1xf32> to vector<1x16x1xf32>
    tpu.vector_store %arg21[%c3_90, %c0_91, %c0_92], %158 {strides = array<i32>} : memref<4x16x1xf32, #tpu.memory_space<vmem>>, vector<1x16x1xf32>,
    %c0_i32_93 = arith.constant 0 : i32
    %159 = arith.cmpi eq, %arg2, %c0_i32_93 : i32
    %160 = arith.extui %159 : i1 to i32
    %c0_i32_94 = arith.constant 0 : i32
    %161 = arith.cmpi ne, %160, %c0_i32_94 : i32
    scf.if %161 {
      %c0_95 = arith.constant 0 : index
      %c0_96 = arith.constant 0 : index
      %c0_97 = arith.constant 0 : index
      %162 = vector.load %arg22[%c0_95, %c0_96, %c0_97] : memref<4x16x1xf32, #tpu.memory_space<vmem>>, vector<1x16x1xf32>
      %163 = vector.shape_cast %162 : vector<1x16x1xf32> to vector<16x1xf32>
      %164 = tpu.reciprocal %163 {approx = true} : vector<16x1xf32> -> vector<16x1xf32>
      %c0_98 = arith.constant 0 : index
      %c0_99 = arith.constant 0 : index
      %165 = vector.load %arg23[%c0_98, %c0_99] : memref<16x32xf32, #tpu.memory_space<vmem>>, vector<16x8xf32>
      %166 = vector.broadcast %164 : vector<16x1xf32> to vector<16x8xf32>
      %167 = arith.mulf %165, %166 : vector<16x8xf32>
      %168 = arith.truncf %167 : vector<16x8xf32> to vector<16x8xbf16>
      %c0_100 = arith.constant 0 : index
      %c0_101 = arith.constant 0 : index
      %169 = vector.load %arg20[%c0_100, %c0_101] : memref<16x32xbf16, #tpu.memory_space<vmem>>, vector<16x8xbf16>
      tpu.vector_store %arg20[%c0_100, %c0_101], %168 {strides = array<i32>} : memref<16x32xbf16, #tpu.memory_space<vmem>>, vector<16x8xbf16>,
      %c1_102 = arith.constant 1 : index
      %c0_103 = arith.constant 0 : index
      %c0_104 = arith.constant 0 : index
      %170 = vector.load %arg22[%c1_102, %c0_103, %c0_104] : memref<4x16x1xf32, #tpu.memory_space<vmem>>, vector<1x16x1xf32>
      %171 = vector.shape_cast %170 : vector<1x16x1xf32> to vector<16x1xf32>
      %172 = tpu.reciprocal %171 {approx = true} : vector<16x1xf32> -> vector<16x1xf32>
      %c0_105 = arith.constant 0 : index
      %c8_106 = arith.constant 8 : index
      %173 = vector.load %arg23[%c0_105, %c8_106] : memref<16x32xf32, #tpu.memory_space<vmem>>, vector<16x8xf32>
      %174 = vector.broadcast %172 : vector<16x1xf32> to vector<16x8xf32>
      %175 = arith.mulf %173, %174 : vector<16x8xf32>
      %176 = arith.truncf %175 : vector<16x8xf32> to vector<16x8xbf16>
      %c0_107 = arith.constant 0 : index
      %c8_108 = arith.constant 8 : index
      %177 = vector.load %arg20[%c0_107, %c8_108] : memref<16x32xbf16, #tpu.memory_space<vmem>>, vector<16x8xbf16>
      tpu.vector_store %arg20[%c0_107, %c8_108], %176 {strides = array<i32>} : memref<16x32xbf16, #tpu.memory_space<vmem>>, vector<16x8xbf16>,
      %c2_109 = arith.constant 2 : index
      %c0_110 = arith.constant 0 : index
      %c0_111 = arith.constant 0 : index
      %178 = vector.load %arg22[%c2_109, %c0_110, %c0_111] : memref<4x16x1xf32, #tpu.memory_space<vmem>>, vector<1x16x1xf32>
      %179 = vector.shape_cast %178 : vector<1x16x1xf32> to vector<16x1xf32>
      %180 = tpu.reciprocal %179 {approx = true} : vector<16x1xf32> -> vector<16x1xf32>
      %c0_112 = arith.constant 0 : index
      %c16_113 = arith.constant 16 : index
      %181 = vector.load %arg23[%c0_112, %c16_113] : memref<16x32xf32, #tpu.memory_space<vmem>>, vector<16x8xf32>
      %182 = vector.broadcast %180 : vector<16x1xf32> to vector<16x8xf32>
      %183 = arith.mulf %181, %182 : vector<16x8xf32>
      %184 = arith.truncf %183 : vector<16x8xf32> to vector<16x8xbf16>
      %c0_114 = arith.constant 0 : index
      %c16_115 = arith.constant 16 : index
      %185 = vector.load %arg20[%c0_114, %c16_115] : memref<16x32xbf16, #tpu.memory_space<vmem>>, vector<16x8xbf16>
      tpu.vector_store %arg20[%c0_114, %c16_115], %184 {strides = array<i32>} : memref<16x32xbf16, #tpu.memory_space<vmem>>, vector<16x8xbf16>,
      %c3_116 = arith.constant 3 : index
      %c0_117 = arith.constant 0 : index
      %c0_118 = arith.constant 0 : index
      %186 = vector.load %arg22[%c3_116, %c0_117, %c0_118] : memref<4x16x1xf32, #tpu.memory_space<vmem>>, vector<1x16x1xf32>
      %187 = vector.shape_cast %186 : vector<1x16x1xf32> to vector<16x1xf32>
      %188 = tpu.reciprocal %187 {approx = true} : vector<16x1xf32> -> vector<16x1xf32>
      %c0_119 = arith.constant 0 : index
      %c24_120 = arith.constant 24 : index
      %189 = vector.load %arg23[%c0_119, %c24_120] : memref<16x32xf32, #tpu.memory_space<vmem>>, vector<16x8xf32>
      %190 = vector.broadcast %188 : vector<16x1xf32> to vector<16x8xf32>
      %191 = arith.mulf %189, %190 : vector<16x8xf32>
      %192 = arith.truncf %191 : vector<16x8xf32> to vector<16x8xbf16>
      %c0_121 = arith.constant 0 : index
      %c24_122 = arith.constant 24 : index
      %193 = vector.load %arg20[%c0_121, %c24_122] : memref<16x32xbf16, #tpu.memory_space<vmem>>, vector<16x8xbf16>
      tpu.vector_store %arg20[%c0_121, %c24_122], %192 {strides = array<i32>} : memref<16x32xbf16, #tpu.memory_space<vmem>>, vector<16x8xbf16>,
      %c0_123 = arith.constant 0 : index
      %c0_124 = arith.constant 0 : index
      %194 = vector.load %arg20[%c0_123, %c0_124] : memref<16x32xbf16, #tpu.memory_space<vmem>>, vector<16x32xbf16>
      %c0_125 = arith.constant 0 : index
      %c0_126 = arith.constant 0 : index
      %195 = vector.load %arg10[%c0_125, %c0_126] : memref<32x32xbf16, #tpu.memory_space<vmem>>, vector<32x32xbf16>
      %cst_127 = arith.constant dense<0.000000e+00> : vector<16x32xf32>
      %196 = tpu.matmul %194, %195, %cst_127 {dimension_numbers = #tpu.dot_dimension_numbers<[1], [0], [0], [1], [0, 0, 1, 1], [], []>} : vector<16x32xbf16>, vector<32x32xbf16>, vector<16x32xf32> -> vector<16x32xf32>
      %c0_128 = arith.constant 0 : index
      %c0_129 = arith.constant 0 : index
      %197 = vector.load %arg11[%c0_128, %c0_129] : memref<1x32xf32, #tpu.memory_space<vmem>>, vector<1x32xf32>
      %c0_130 = arith.constant 0 : index
      %c0_131 = arith.constant 0 : index
      %198 = vector.load %arg12[%c0_130, %c0_131] : memref<1x32xf32, #tpu.memory_space<vmem>>, vector<1x32xf32>
      %cst_132 = arith.constant dense<0.000000e+00> : vector<16xf32>
      %199 = vector.multi_reduction <add>, %196, %cst_132 [1] : vector<16x32xf32> to vector<16xf32>
      %200 = vector.shape_cast %199 : vector<16xf32> to vector<16x1xf32>
      %cst_133 = arith.constant 3.200000e+01 : f32
      %201 = vector.broadcast %cst_133 : f32 to vector<16x1xf32>
      %202 = arith.divf %200, %201 : vector<16x1xf32>
      %203 = vector.broadcast %202 : vector<16x1xf32> to vector<16x32xf32>
      %204 = arith.subf %196, %203 : vector<16x32xf32>
      %205 = arith.mulf %204, %204 : vector<16x32xf32>
      %cst_134 = arith.constant dense<0.000000e+00> : vector<16xf32>
      %206 = vector.multi_reduction <add>, %205, %cst_134 [1] : vector<16x32xf32> to vector<16xf32>
      %207 = vector.shape_cast %206 : vector<16xf32> to vector<16x1xf32>
      %cst_135 = arith.constant 3.200000e+01 : f32
      %208 = vector.broadcast %cst_135 : f32 to vector<16x1xf32>
      %209 = arith.divf %207, %208 : vector<16x1xf32>
      %210 = vector.broadcast %202 : vector<16x1xf32> to vector<16x32xf32>
      %211 = arith.subf %196, %210 : vector<16x32xf32>
      %cst_136 = arith.constant 9.99999974E-6 : f32
      %212 = vector.broadcast %cst_136 : f32 to vector<16x1xf32>
      %213 = arith.addf %209, %212 : vector<16x1xf32>
      %214 = math.rsqrt %213 : vector<16x1xf32>
      %215 = vector.broadcast %214 : vector<16x1xf32> to vector<16x32xf32>
      %216 = arith.mulf %211, %215 : vector<16x32xf32>
      %217 = vector.broadcast %197 : vector<1x32xf32> to vector<16x32xf32>
      %218 = arith.mulf %216, %217 : vector<16x32xf32>
      %219 = vector.broadcast %198 : vector<1x32xf32> to vector<16x32xf32>
      %220 = arith.addf %218, %219 : vector<16x32xf32>
      %c0_137 = arith.constant 0 : index
      %c0_138 = arith.constant 0 : index
      %221 = vector.load %arg13[%c0_137, %c0_138] : memref<32x64xbf16, #tpu.memory_space<vmem>>, vector<32x64xbf16>
      %cst_139 = arith.constant dense<0.000000e+00> : vector<16x64xf32>
      %222 = tpu.matmul %2, %221, %cst_139 {dimension_numbers = #tpu.dot_dimension_numbers<[1], [0], [0], [1], [0, 0, 1, 1], [], []>} : vector<16x32xbf16>, vector<32x64xbf16>, vector<16x64xf32> -> vector<16x64xf32>
      %223 = arith.truncf %220 : vector<16x32xf32> to vector<16x32xbf16>
      %c0_140 = arith.constant 0 : index
      %c0_141 = arith.constant 0 : index
      %224 = vector.load %arg14[%c0_140, %c0_141] : memref<32x64xbf16, #tpu.memory_space<vmem>>, vector<32x64xbf16>
      %cst_142 = arith.constant dense<0.000000e+00> : vector<16x64xf32>
      %225 = tpu.matmul %223, %224, %cst_142 {dimension_numbers = #tpu.dot_dimension_numbers<[1], [0], [0], [1], [0, 0, 1, 1], [], []>} : vector<16x32xbf16>, vector<32x64xbf16>, vector<16x64xf32> -> vector<16x64xf32>
      %226 = arith.addf %222, %225 : vector<16x64xf32>
      %cst_143 = arith.constant 0.000000e+00 : f32
      %227 = vector.broadcast %cst_143 : f32 to vector<16x64xf32>
      %228 = arith.maximumf %226, %227 : vector<16x64xf32>
      %229 = arith.truncf %228 : vector<16x64xf32> to vector<16x64xbf16>
      %c0_144 = arith.constant 0 : index
      %c0_145 = arith.constant 0 : index
      %230 = vector.load %arg15[%c0_144, %c0_145] : memref<64x32xbf16, #tpu.memory_space<vmem>>, vector<64x32xbf16>
      %cst_146 = arith.constant dense<0.000000e+00> : vector<16x32xf32>
      %231 = tpu.matmul %229, %230, %cst_146 {dimension_numbers = #tpu.dot_dimension_numbers<[1], [0], [0], [1], [0, 0, 1, 1], [], []>} : vector<16x64xbf16>, vector<64x32xbf16>, vector<16x32xf32> -> vector<16x32xf32>
      %c0_147 = arith.constant 0 : index
      %c0_148 = arith.constant 0 : index
      %232 = vector.load %arg16[%c0_147, %c0_148] : memref<1x32xf32, #tpu.memory_space<vmem>>, vector<1x32xf32>
      %c0_149 = arith.constant 0 : index
      %c0_150 = arith.constant 0 : index
      %233 = vector.load %arg17[%c0_149, %c0_150] : memref<1x32xf32, #tpu.memory_space<vmem>>, vector<1x32xf32>
      %cst_151 = arith.constant dense<0.000000e+00> : vector<16xf32>
      %234 = vector.multi_reduction <add>, %231, %cst_151 [1] : vector<16x32xf32> to vector<16xf32>
      %235 = vector.shape_cast %234 : vector<16xf32> to vector<16x1xf32>
      %cst_152 = arith.constant 3.200000e+01 : f32
      %236 = vector.broadcast %cst_152 : f32 to vector<16x1xf32>
      %237 = arith.divf %235, %236 : vector<16x1xf32>
      %238 = vector.broadcast %237 : vector<16x1xf32> to vector<16x32xf32>
      %239 = arith.subf %231, %238 : vector<16x32xf32>
      %240 = arith.mulf %239, %239 : vector<16x32xf32>
      %cst_153 = arith.constant dense<0.000000e+00> : vector<16xf32>
      %241 = vector.multi_reduction <add>, %240, %cst_153 [1] : vector<16x32xf32> to vector<16xf32>
      %242 = vector.shape_cast %241 : vector<16xf32> to vector<16x1xf32>
      %cst_154 = arith.constant 3.200000e+01 : f32
      %243 = vector.broadcast %cst_154 : f32 to vector<16x1xf32>
      %244 = arith.divf %242, %243 : vector<16x1xf32>
      %245 = vector.broadcast %237 : vector<16x1xf32> to vector<16x32xf32>
      %246 = arith.subf %231, %245 : vector<16x32xf32>
      %cst_155 = arith.constant 9.99999974E-6 : f32
      %247 = vector.broadcast %cst_155 : f32 to vector<16x1xf32>
      %248 = arith.addf %244, %247 : vector<16x1xf32>
      %249 = math.rsqrt %248 : vector<16x1xf32>
      %250 = vector.broadcast %249 : vector<16x1xf32> to vector<16x32xf32>
      %251 = arith.mulf %246, %250 : vector<16x32xf32>
      %252 = vector.broadcast %232 : vector<1x32xf32> to vector<16x32xf32>
      %253 = arith.mulf %251, %252 : vector<16x32xf32>
      %254 = vector.broadcast %233 : vector<1x32xf32> to vector<16x32xf32>
      %255 = arith.addf %253, %254 : vector<16x32xf32>
      %256 = arith.addf %1, %255 : vector<16x32xf32>
      %c0_156 = arith.constant 0 : index
      %c0_157 = arith.constant 0 : index
      %c0_158 = arith.constant 0 : index
      %257 = vector.load %arg18[%c0_156, %c0_157, %c0_158] : memref<1x16x32xf32, #tpu.memory_space<vmem>>, vector<1x16x32xf32>
      %258 = vector.shape_cast %257 : vector<1x16x32xf32> to vector<16x32xf32>
      %259 = vector.shape_cast %256 : vector<16x32xf32> to vector<1x16x32xf32>
      tpu.vector_store %arg18[%c0_156, %c0_157, %c0_158], %259 {strides = array<i32>} : memref<1x16x32xf32, #tpu.memory_space<vmem>>, vector<1x16x32xf32>,
    } else {
    }
    return
  }
  func.func @transform_0(%arg0: i32, %arg1: i32, %arg2: i32) -> (i32, i32, i32) {
    %c0_i32 = arith.constant 0 : i32
    %c0_i32_0 = arith.constant 0 : i32
    return %arg0, %arg1, %c0_i32 : i32, i32, i32
  }
  func.func @transform_1(%arg0: i32, %arg1: i32, %arg2: i32) -> (i32, i32, i32) {
    %c0_i32 = arith.constant 0 : i32
    %c0_i32_0 = arith.constant 0 : i32
    return %arg0, %arg2, %c0_i32 : i32, i32, i32
  }
  func.func @transform_2(%arg0: i32, %arg1: i32, %arg2: i32) -> (i32, i32, i32) {
    %c0_i32 = arith.constant 0 : i32
    %c0_i32_0 = arith.constant 0 : i32
    return %arg0, %arg1, %c0_i32 : i32, i32, i32
  }
  func.func @transform_3(%arg0: i32, %arg1: i32, %arg2: i32) -> (i32, i32, i32) {
    %c0_i32 = arith.constant 0 : i32
    %c0_i32_0 = arith.constant 0 : i32
    return %arg0, %c0_i32, %arg2 : i32, i32, i32
  }
  func.func @transform_4(%arg0: i32, %arg1: i32, %arg2: i32) -> (i32, i32) {
    %c0_i32 = arith.constant 0 : i32
    %c0_i32_0 = arith.constant 0 : i32
    %c0_i32_1 = arith.constant 0 : i32
    return %c0_i32, %c0_i32_0 : i32, i32
  }
  func.func @transform_5(%arg0: i32, %arg1: i32, %arg2: i32) -> (i32, i32) {
    %c0_i32 = arith.constant 0 : i32
    %c0_i32_0 = arith.constant 0 : i32
    %c0_i32_1 = arith.constant 0 : i32
    return %c0_i32, %c0_i32_0 : i32, i32
  }
  func.func @transform_6(%arg0: i32, %arg1: i32, %arg2: i32) -> (i32, i32) {
    %c0_i32 = arith.constant 0 : i32
    %c0_i32_0 = arith.constant 0 : i32
    %c0_i32_1 = arith.constant 0 : i32
    return %c0_i32, %c0_i32_0 : i32, i32
  }
  func.func @transform_7(%arg0: i32, %arg1: i32, %arg2: i32) -> (i32, i32) {
    %c0_i32 = arith.constant 0 : i32
    %c0_i32_0 = arith.constant 0 : i32
    %c0_i32_1 = arith.constant 0 : i32
    return %c0_i32, %c0_i32_0 : i32, i32
  }
  func.func @transform_8(%arg0: i32, %arg1: i32, %arg2: i32) -> (i32, i32) {
    %c0_i32 = arith.constant 0 : i32
    %c0_i32_0 = arith.constant 0 : i32
    %c0_i32_1 = arith.constant 0 : i32
    return %c0_i32, %c0_i32_0 : i32, i32
  }
  func.func @transform_9(%arg0: i32, %arg1: i32, %arg2: i32) -> (i32, i32) {
    %c0_i32 = arith.constant 0 : i32
    %c0_i32_0 = arith.constant 0 : i32
    %c0_i32_1 = arith.constant 0 : i32
    return %c0_i32, %c0_i32_0 : i32, i32
  }
  func.func @transform_10(%arg0: i32, %arg1: i32, %arg2: i32) -> (i32, i32) {
    %c0_i32 = arith.constant 0 : i32
    %c0_i32_0 = arith.constant 0 : i32
    %c0_i32_1 = arith.constant 0 : i32
    return %c0_i32, %c0_i32_0 : i32, i32
  }
  func.func @transform_11(%arg0: i32, %arg1: i32, %arg2: i32) -> (i32, i32) {
    %c0_i32 = arith.constant 0 : i32
    %c0_i32_0 = arith.constant 0 : i32
    %c0_i32_1 = arith.constant 0 : i32
    return %c0_i32, %c0_i32_0 : i32, i32
  }
  func.func @transform_12(%arg0: i32, %arg1: i32, %arg2: i32) -> (i32, i32) {
    %c0_i32 = arith.constant 0 : i32
    %c0_i32_0 = arith.constant 0 : i32
    %c0_i32_1 = arith.constant 0 : i32
    return %c0_i32, %c0_i32_0 : i32, i32
  }
  func.func @transform_13(%arg0: i32, %arg1: i32, %arg2: i32) -> (i32, i32) {
    %c0_i32 = arith.constant 0 : i32
    %c0_i32_0 = arith.constant 0 : i32
    %c0_i32_1 = arith.constant 0 : i32
    return %c0_i32, %c0_i32_0 : i32, i32
  }
  func.func @transform_14(%arg0: i32, %arg1: i32, %arg2: i32) -> (i32, i32) {
    %c0_i32 = arith.constant 0 : i32
    %c0_i32_0 = arith.constant 0 : i32
    %c0_i32_1 = arith.constant 0 : i32
    return %c0_i32, %c0_i32_0 : i32, i32
  }
  func.func @transform_15(%arg0: i32, %arg1: i32, %arg2: i32) -> (i32, i32, i32) {
    %c0_i32 = arith.constant 0 : i32
    %c0_i32_0 = arith.constant 0 : i32
    return %arg0, %arg1, %c0_i32 : i32, i32, i32
  }
}

</mosaic_0001>

<bundles_post_ra>
// kernel: semantic_transformer_forward.7
= control target key start
LH: loop header
LB: loop body
LE: loop exit
PB: predicated region body
PF: predicated region fallthrough
CT: control target
= control target key end

     0   :  { %s834_s12 = smov 0   ;;  %s836_s13 = smov 0   ;;  %s950_s0 = inlined_call_operand.vmem [shape: f32[2,16,32], index: 0, kind: input, shape index: {}]   ;;  %s951_s1 = inlined_call_operand.vmem [shape: f32[2,16,384], index: 1, kind: input, shape index: {}]   ;;  %s952_s2 = inlined_call_operand.vmem [shape: bf16[384,32], index: 2, kind: input, shape index: {}]   ;;  %s953_s3 = inlined_call_operand.vmem [shape: f32[2,16,32], index: 3, kind: output, shape index: {}]  }
   0x1   :  { %s838_s14 = smov 0  }
   0x2 LB: > { %s25_s15 = sadd.s32 1, %s806_s13  ;;  %p652_p0 = scmp.ge.s32.totalorder %s810_s14, 1  ;;  %s810_s14 = sphi %s838_s14, %s13_s14   ;;  %s806_s13 = sphi %s836_s13, %s955_s13   ;;  %s802_s12 = sphi %s834_s12, %s954_s12  }
   0x3   : > { %p27_p1 = scmp.ge.s32.totalorder %s25_s15, 2  ;;  %p176_p2 = scmp.lt.s32.totalorder %s810_s14, 3 }
   0x5   : > { %s957_s15 = smov (%p27_p1, %s25_s15), 0  ;;  %p177_p3 = pnand %p652_p0, %p176_p2 }
   0x6   : > { %p219_p4 = scmp.lt.s32.totalorder (!%p177_p3), %s802_s12, 1 }
   0x7   : > { %180 = sbr.rel (%p177_p3) target bundleno = 252 (0xfc), region = 32 }
   0xc   : > { %v764_v0 = vld [vmem:[%s952_s2 + $0x78] sm:$0xff]   ;;  %v812_v1 = vmov 0.0   ;;  %vm813_vm0 = vmmov 0   ;;  %v767_v4 = vld [vmem:[%s952_s2 + $0x70] sm:$0xff]   ;;  %v770_v7 = vld [vmem:[%s952_s2 + $0x68] sm:$0xff]   ;;  %s959_s12 = smov (!%p219_p4, %s802_s12), 1 }
   0xd   : > { %717 = vmatprep.subr.bf16.mxu1 %v812_v1  ;;  %v765_v2 = vld [vmem:[%s952_s2 + $0xb8] sm:$0xff]   ;;  %686 = vmatprep.subr.bf16.mxu0 %v764_v0  ;;  %v768_v5 = vld [vmem:[%s952_s2 + $0xb0] sm:$0xff]   ;;  %v771_v8 = vld [vmem:[%s952_s2 + $0xa8] sm:$0xff]   ;;  %s737_s25 = smul.u32 48, %s959_s12  ;;  %s684_s22 = sshll.u32 %s959_s12, 4  ;;  %vm537_vm1 = vcmask 261120  }
   0xe   : > { %v766_v3 = vld [vmem:[%s952_s2 + $0x38] sm:$0xff]   ;;  %733 = vmatprep.mubr.msk.bf16.mxu1 %vm813_vm0, %v812_v1  ;;  %718 = vmatpush3.bf16.msra.mxu1 %v765_v2  ;;  %v769_v6 = vld [vmem:[%s952_s2 + $0x30] sm:$0xff]   ;;  %v772_v9 = vld [vmem:[%s952_s2 + $0x28] sm:$0xff]   ;;  %s247_s28 = scalar_lea.vmem %s953_s3, %s684_s22 }
   0xf   : > { %687 = vmatpush3.bf16.msra.mxu0 %v766_v3  ;;  %719 = vmatprep.subr.bf16.mxu1 %v812_v1  ;;  %v773_v10 = vld [vmem:[%s952_s2 + $0x60] sm:$0xff]   ;;  %v776_v13 = vld [vmem:[%s952_s2 + $0x58] sm:$0xff]   ;;  %v779_v16 = vld [vmem:[%s952_s2 + $0x50] sm:$0xff]   ;;  %s237_s7 = scalar_lea.vmem %s951_s1, %s737_s25  ;;  %s226_s25 = scalar_lea.vmem %s950_s0, %s684_s22 }
  0x10   : > { %688 = vmatprep.subr.bf16.mxu0 %v767_v4  ;;  %v774_v11 = vld [vmem:[%s952_s2 + $0xa0] sm:$0xff]   ;;  %v777_v14 = vld [vmem:[%s952_s2 + $0x98] sm:$0xff]   ;;  %v780_v17 = vld [vmem:[%s952_s2 + $0x90] sm:$0xff]  }
  0x11   : > { %v775_v12 = vld [vmem:[%s952_s2 + $0x20] sm:$0xff]   ;;  %v778_v15 = vld [vmem:[%s952_s2 + $0x18] sm:$0xff]   ;;  %v781_v18 = vld [vmem:[%s952_s2 + $0x10] sm:$0xff]  }
  0x12   : > { %720 = vmatpush3.bf16.msra.mxu1 %v768_v5  ;;  %v782_v19 = vld [vmem:[%s952_s2 + $0x48] sm:$0xff]   ;;  %v256_v23 = vld [vmem:[%s237_s7 + $0x20] sm:$0xff]  ;;  %v254_v27 = vld [vmem:[%s237_s7 + $0x10] sm:$0xff] }
  0x13   : > { %689 = vmatpush3.bf16.msra.mxu0 %v769_v6  ;;  %721 = vmatprep.subr.bf16.mxu1 %v812_v1  ;;  %v783_v20 = vld [vmem:[%s952_s2 + $0x88] sm:$0xff]   ;;  %v785_v24 = vld [vmem:[%s952_s2 + $0x40] sm:$0xff]   ;;  %v255_v31 = vld [vmem:[%s237_s7 + $0x18] sm:$0xff] }
  0x14   : > { %690 = vmatprep.subr.bf16.mxu0 %v770_v7  ;;  %v784_v21 = vld [vmem:[%s952_s2 + $0x8] sm:$0xff]   ;;  %v786_v26 = vld [vmem:[%s952_s2 + $0x80] sm:$0xff]  }
  0x15   : > { %v253_v22 = vld [vmem:[%s237_s7 + $0x8] sm:$0xff]  ;;  %v787_v29 = vld [vmem:[%s952_s2] sm:$0xff]  }
  0x16   : > { %722 = vmatpush3.bf16.msra.mxu1 %v771_v8  ;;  %v259_v25 = vpack.c.bf16 %v256_v23, %v253_v22  ;;  %v257_v28 = vld [vmem:[%s237_s7 + $0x28] sm:$0xff]  ;;  %v252_v30 = vld [vmem:[%s237_s7] sm:$0xff] }
  0x17   : > { %691 = vmatpush3.bf16.msra.mxu0 %v772_v9  ;;  %723 = vmatprep.subr.bf16.mxu1 %v812_v1  ;;  %v260_v32 = vpack.c.bf16 %v257_v28, %v254_v27  ;;  %v258_v33 = vpack.c.bf16 %v255_v31, %v252_v30  ;;  %v250_v40 = vld [vmem:[%s226_s25] sm:$0xff]  ;;  %v251_v47 = vld [vmem:[%s226_s25 + $0x8] sm:$0xff] }
  0x18   : > { %692 = vmatprep.subr.bf16.mxu0 %v773_v10  ;;  %485 = vmatprep.mubr.bf16.mxu0 %v259_v25 }
  0x1a   : > { %724 = vmatpush3.bf16.msra.mxu1 %v774_v11 }
  0x1b   : > { %693 = vmatpush3.bf16.msra.mxu0 %v775_v12  ;;  %725 = vmatprep.subr.bf16.mxu1 %v812_v1 }
  0x1c   : > { %694 = vmatprep.subr.bf16.mxu0 %v776_v13 }
  0x1e   : > { %726 = vmatpush3.bf16.msra.mxu1 %v777_v14 }
  0x1f   : > { %695 = vmatpush3.bf16.msra.mxu0 %v778_v15  ;;  %727 = vmatprep.subr.bf16.mxu1 %v812_v1 }
  0x20   : > { %696 = vmatprep.subr.bf16.mxu0 %v779_v16 }
  0x22   : > { %728 = vmatpush3.bf16.msra.mxu1 %v780_v17 }
  0x23   : > { %697 = vmatpush3.bf16.msra.mxu0 %v781_v18  ;;  %729 = vmatprep.subr.bf16.mxu1 %v812_v1 }
  0x24   : > { %698 = vmatprep.subr.bf16.mxu0 %v782_v19 }
  0x26   : > { %730 = vmatpush3.bf16.msra.mxu1 %v783_v20 }
  0x27   : > { %699 = vmatpush3.bf16.msra.mxu0 %v784_v21  ;;  %731 = vmatprep.subr.bf16.mxu1 %v812_v1 }
  0x28   : > { %700 = vmatprep.subr.bf16.mxu0 %v785_v24 }
  0x2a   : > { %732 = vmatpush3.bf16.msra.mxu1 %v786_v26 }
  0x2b   : > { %701 = vmatpush3.bf16.msra.mxu0 %v787_v29 }
  0x2d   : > { %734 = vmatmul.mubr.bf16.vlgmr.msra.gmra.mxu1 %v260_v32 }
  0x2e   : > { %486 = vmatmul.mubr.bf16.vlgmr.msra.gmra.mxu0 %v258_v33 }
  0xed   : > { %v528_v34 = vpop.f32.mrf.mxu1 }
  0xee   : > { %v702_v35 = vpop.f32.mrf.mxu0 }
  0xef   : > { %v735_v36 = vpop.f32.mrf.mxu1 }
  0xf0   : > { %v703_v37 = vpop.f32.mrf.mxu0 }
  0xf1   : > { %v704_v38 = vadd.f32 %v703_v37, %v702_v35  ;;  %v531_v39 = vpop.f32.mrf.mxu1 }
  0xf2   : > { %v705_v41 = vpop.f32.mrf.mxu0 }
  0xf3   : > { %v529_v42 = vadd.f32 %v704_v38, %v528_v34  ;;  %v736_v43 = vpop.f32.mrf.mxu1 }
  0xf4   : > { %v706_v44 = vpop.f32.mrf.mxu0 }
  0xf5   : > { %v535_v45 = vadd.f32 %v529_v42, %v250_v40  ;;  %v707_v46 = vadd.f32 %v706_v44, %v705_v41 }
  0xf7   : > { %538 = vst.msk [vmem:[%s247_s28] sm:$0xff] %vm537_vm1, %v535_v45  ;;  %v532_v48 = vadd.f32 %v707_v46, %v531_v39 }
  0xf9   : > { %v536_v49 = vadd.f32 %v532_v48, %v251_v47 }
  0xfb   : > { %539 = vst.msk [vmem:[%s247_s28 + $0x8] sm:$0xff] %vm537_vm1, %v536_v49 }
  0xfc PF: > { %s13_s14 = sadd.s32 1, %s810_s14   ;;  %s954_s12 = smov %s806_s13 }
  0xfd   : > { %p10_p5 = scmp.ge.s32.totalorder %s13_s14, 4   ;;  %s955_s13 = smov %s957_s15 }
  0xff   :  { %12 = sbr.rel (!%p10_p5) target bundleno = 2 (0x2), region = 65 }

// kernel: semantic_transformer_forward.11
= control target key start
LH: loop header
LB: loop body
LE: loop exit
PB: predicated region body
PF: predicated region fallthrough
CT: control target
= control target key end

     0   :  { %s3229_s0 = inlined_call_operand.vmem [shape: f32[2,16,32], index: 0, kind: input, shape index: {}]   ;;  %s3230_s1 = inlined_call_operand.vmem [shape: f32[2,16,32], index: 1, kind: input, shape index: {}]   ;;  %s3231_s2 = inlined_call_operand.vmem [shape: f32[2,16,1], index: 2, kind: input, shape index: {}]   ;;  %s3232_s3 = inlined_call_operand.vmem [shape: f32[2,1,16], index: 3, kind: input, shape index: {}]   ;;  %s3233_s4 = inlined_call_operand.vmem [shape: bf16[32,32], index: 4, kind: input, shape index: {}]   ;;  %s3234_s5 = inlined_call_operand.vmem [shape: bf16[32,32], index: 5, kind: input, shape index: {}]   ;;  %s3235_s6 = inlined_call_operand.vmem [shape: bf16[32,32], index: 6, kind: input, shape index: {}]   ;;  %s3236_s7 = inlined_call_operand.vmem [shape: bf16[32,32], index: 7, kind: input, shape index: {}]   ;;  %s3237_s8 = inlined_call_operand.vmem [shape: f32[1,32], index: 8, kind: input, shape index: {}]   ;;  %s3238_s9 = inlined_call_operand.vmem [shape: f32[1,32], index: 9, kind: input, shape index: {}]   ;;  %s3239_s10 = inlined_call_operand.vmem [shape: bf16[32,64], index: 10, kind: input, shape index: {}]   ;;  %s3240_s11 = inlined_call_operand.vmem [shape: bf16[32,64], index: 11, kind: input, shape index: {}]   ;;  %s3241_s12 = inlined_call_operand.vmem [shape: bf16[64,32], index: 12, kind: input, shape index: {}]   ;;  %s3242_s13 = inlined_call_operand.vmem [shape: f32[1,32], index: 13, kind: input, shape index: {}]   ;;  %s3243_s14 = inlined_call_operand.vmem [shape: f32[1,32], index: 14, kind: input, shape index: {}]   ;;  %s3244_s15 = inlined_call_operand.hbm [shape: f32[2,16,32], index: 15, kind: output, shape index: {}]  }
   0x1   :  { %3250 = sst [smem:[#allocation14_spill]] %s3229_s0 }
   0x2   :  { %3251 = sst [smem:[#allocation15_spill]] %s3233_s4 }
   0x3   :  { %20 = vsyncpa [#allocation8], 0 }
   0x4   :  { %22 = vsyncpa [#allocation8 + $0x1], 0  ;;  %s2735_s18 = smov 0   ;;  %s2737_s19 = smov 0  }
   0x5   :  { %s2739_s20 = smov 0   ;;  %s2741_s21 = smov 0  }
   0x6   :  { %s2743_s22 = smov 0   ;;  %s2745_s23 = smov 0  }
   0x7 LB: > { %3252 = sst [smem:[#allocation10_spill]] %s2629_s20  ;;  %s2195_s24 = sadd.s32 4294967295, %s2641_s23   ;;  %s2641_s23 = sphi %s2745_s23, %s28_s23   ;;  %s2637_s22 = sphi %s2743_s22, %s3265_s22   ;;  %s2633_s21 = sphi %s2741_s21, %s3264_s21   ;;  %s2629_s20 = sphi %s2739_s20, %s3263_s20   ;;  %s2625_s19 = sphi %s2737_s19, %s3267_s19   ;;  %s2621_s18 = sphi %s2735_s18, %s3266_s18  }
   0x8   : > { %3253 = sst [smem:[#allocation11_spill]] %s2637_s22  ;;  %s2196_s25 = sadd.s32 4294967294, %s2641_s23  }
   0x9   : > { %s47_s26 = sadd.s32 1, %s2637_s22  ;;  %s399_s27 = sadd.s32 1, %s2629_s20 }
   0xa   : > { %p49_p0 = scmp.ge.s32.totalorder %s47_s26, 2  ;;  %p409_p1 = scmp.ne.s32.totalorder %s2629_s20, %s2625_s19 }
   0xb   : > { %p410_p2 = scmp.eq.s32.totalorder %s2195_s24, 1  ;;  %p415_p3 = scmp.ne.s32.totalorder %s2625_s19, %s2621_s18 }
   0xc   : > { %s3269_s26 = smov (%p49_p0, %s47_s26), 0  ;;  %p416_p5 = scmp.eq.s32.totalorder %s2196_s25, 1 }
   0xd   : > { %3254 = sst [smem:[#allocation12_spill]] %s3269_s26  ;;  %p2775_p4 = por %p410_p2, %p409_p1 }
   0xe   : > { %s394_s29 = ssub.s32 %s2637_s22, %s3269_s26  ;;  %p2199_p6 = scmp.ge.s32.totalorder %s2641_s23, 1 }
   0xf   : > { %p397_p7 = scmp.eq.s32.totalorder %s394_s29, 0  ;;  %p2782_p8 = por %p416_p5, %p415_p3 }
  0x10   : > { %p515_p9 = scmp.lt.s32.totalorder %s2641_s23, 3 }
  0x11   : > { %s2788_s16 = scalar_select %p397_p7, %s2629_s20, %s399_s27  }
  0x12   : > { %p516_p10 = pnand %p2199_p6, %p515_p9 }
  0x13   : > { %3257 = sst [smem:[#allocation13_spill]] %s2788_s16  ;;  %p592_p11 = scmp.lt.s32.totalorder (!%p516_p10), %s2633_s21, 1 }
  0x14   : > { %519 = sbr.rel (%p516_p10) target bundleno = 2449 (0x991), region = 80  ;;  %s3258_s4 = sld [smem:[#allocation15_spill]] (!%p516_p10) }
  0x15   : > { %s3259_s0 = sld [smem:[#allocation14_spill]] (!%p516_p10)  ;;  %s2647_s20 = smov (!%p516_p10), 120  }
  0x16   : > { %s2648_s24 = smov (!%p516_p10), 104   ;;  %s2652_s25 = smov (!%p516_p10), 24  }
  0x19   : > { %v2643_v1 = vmov 0.0   ;;  %vm2644_vm0 = vmmov 0   ;;  %vm652_vm1 = vcmask 261120   ;;  %s2809_s27 = scalar_select %p592_p11, %s2633_s21, 1  ;;  %v2491_v5 = vld [vmem:[%s3234_s5 + $0x8] sm:$0xff]   ;;  %v2492_v7 = vld [vmem:[%s3234_s5] sm:$0xff]  }
  0x1a   : > { %v2489_v0 = vld [vmem:[%s3258_s4 + $0x8] sm:$0xff]   ;;  %2313 = vmatprep.subr.bf16.mxu1 %v2643_v1  ;;  %v2490_v2 = vld [vmem:[%s3258_s4] sm:$0xff]   ;;  %2329 = vmatprep.subr.bf16.mxu0 %v2643_v1  ;;  %725 = vst.msk [vmem:[#allocation6] sm:$0xff] %vm652_vm1, %v2643_v1  ;;  %726 = vst.msk [vmem:[#allocation6 + $0x8] sm:$0xff] %vm652_vm1, %v2643_v1  ;;  %v2645_v11 = vmov 0   ;;  %vm705_vm2 = vcmask 257024  }
  0x1b   : > { %2314 = vmatpush3.bf16.msra.mxu1 %v2489_v0  ;;  %2317 = vmatprep.mubr.msk.bf16.mxu1 %vm2644_vm0, %v2643_v1  ;;  %s2812_s17 = sshll.u32 %s2809_s27, 4  ;;  %vm878_vm3 = vcmask 64512   ;;  %s3248_s4 = smov 112   ;;  %v2494_v27 = vld [vmem:[%s3235_s6 + $0x8] sm:$0xff]   ;;  %v2495_v28 = vld [vmem:[%s3235_s6] sm:$0xff]   ;;  %vm928_vm4 = vcmask 130048  }
  0x1c   : > { %2315 = vmatprep.subr.bf16.mxu1 %v2643_v1  ;;  %2333 = vmatprep.mubr.msk.bf16.mxu0 %vm2644_vm0, %v2643_v1  ;;  %s2818_s29 = scalar_lea.vmem %s3259_s0, %s2812_s17  ;;  %s609_s22 = scalar_lea.vmem %s3230_s1, %s2812_s17  ;;  %vm708_vm5 = vcmask 7168   ;;  %v2649_v50 = vmov -1e+30   ;;  %vm1212_vm6 = vcmask 130112   ;;  %vm1388_vm7 = vcmask 195712  }
  0x1d   : > { %v629_v3 = vld [vmem:[%s2818_s29] sm:$0xff]  ;;  %v630_v4 = vld [vmem:[%s2818_s29 + $0x8] sm:$0xff]  ;;  %2487 = vset.pattern.permute.xlu0 %v2645_v11  ;;  %2488 = vset.pattern.permute.xlu1 %v2645_v11  ;;  %s619_s16 = scalar_lea.vmem %s3231_s2, %s2812_s17  ;;  %709 = vst.msk [vmem:[#allocation4] sm:$0xff] %vm708_vm5, %v2649_v50  ;;  %710 = vst.msk [vmem:[#allocation4 + $0x8] sm:$0xff] %vm708_vm5, %v2649_v50  ;;  %vm1564_vm8 = vcmask 261312   ;;  %vm1598_vm9 = vcmask 60416  }
  0x1e   : > { %v2830_v6 = vpack.c.bf16 %v630_v4, %v629_v3  ;;  %v727_v8 = vld [vmem:[%s609_s22] sm:$0xff]  ;;  %v728_v9 = vld [vmem:[%s609_s22 + $0x8] sm:$0xff]  ;;  %2330 = vmatpush3.bf16.msra.mxu0 %v2494_v27  ;;  %711 = vst.msk [vmem:[#allocation4 + $0x10] sm:$0xff] %vm708_vm5, %v2649_v50  ;;  %712 = vst.msk [vmem:[#allocation4 + $0x18] sm:$0xff] %vm708_vm5, %v2649_v50  ;;  %vm1627_vm10 = vcmask 126016   ;;  %vm1656_vm11 = vcmask 191616  }
  0x1f   : > { %2316 = vmatpush3.bf16.msra.mxu1 %v2490_v2  ;;  %v729_v10 = vpack.c.bf16 %v728_v9, %v727_v8  ;;  %v850_v25 = vld [vmem:[%s619_s16] sm:$0xff]  ;;  %v851_v26 = vld [vmem:[%s619_s16 + $0x8] sm:$0xff]  ;;  %2331 = vmatprep.subr.bf16.mxu0 %v2643_v1  ;;  %s626_s16 = scalar_lea.vmem %s3232_s3, %s2809_s27  ;;  %713 = vst.msk [vmem:[#allocation4 + $0x20] sm:$0xff] %vm708_vm5, %v2649_v50  ;;  %714 = vst.msk [vmem:[#allocation4 + $0x28] sm:$0xff] %vm708_vm5, %v2649_v50  ;;  %s3260_s27 = smov 112   ;;  %vm1685_vm12 = vcmask 257216  }
  0x20   : > { %2321 = vmatprep.subr.bf16.mxu1 %v2643_v1  ;;  %v2218_v38 = vld [vmem:[%s626_s16] ss:$0 sm:$0xff]  ;;  %715 = vst.msk [vmem:[#allocation4 + $0x30] sm:$0xff] %vm708_vm5, %v2649_v50  ;;  %716 = vst.msk [vmem:[#allocation4 + $0x38] sm:$0xff] %vm708_vm5, %v2649_v50  ;;  %vm1956_vm13 = vcmask 523264  }
  0x21   : > { %717 = vst.msk [vmem:[#allocation5] sm:$0xff] %vm708_vm5, %v2643_v1  ;;  %718 = vst.msk [vmem:[#allocation5 + $0x8] sm:$0xff] %vm708_vm5, %v2643_v1 }
  0x22   : > { %2318 = vmatmul.mubr.msk.bf16.vlgmr.msra.gmra.mxu1 %vm652_vm1, %v2830_v6  ;;  %2332 = vmatpush3.bf16.msra.mxu0 %v2495_v28  ;;  %719 = vst.msk [vmem:[#allocation5 + $0x10] sm:$0xff] %vm708_vm5, %v2643_v1  ;;  %720 = vst.msk [vmem:[#allocation5 + $0x18] sm:$0xff] %vm708_vm5, %v2643_v1 }
  0x23   : > { %2322 = vmatpush3.bf16.msra.mxu1 %v2491_v5  ;;  %2325 = vmatprep.mubr.msk.bf16.mxu1 %vm2644_vm0, %v2643_v1  ;;  %721 = vst.msk [vmem:[#allocation5 + $0x20] sm:$0xff] %vm708_vm5, %v2643_v1  ;;  %722 = vst.msk [vmem:[#allocation5 + $0x28] sm:$0xff] %vm708_vm5, %v2643_v1 }
  0x24   : > { %2323 = vmatprep.subr.bf16.mxu1 %v2643_v1  ;;  %2343 = vmatprep.subr.bf16.mxu0 %v2643_v1  ;;  %723 = vst.msk [vmem:[#allocation5 + $0x30] sm:$0xff] %vm708_vm5, %v2643_v1  ;;  %724 = vst.msk [vmem:[#allocation5 + $0x38] sm:$0xff] %vm708_vm5, %v2643_v1 }
  0x25   : > { %2334 = vmatmul.mubr.msk.bf16.vlgmr.msra.gmra.mxu0 %vm652_vm1, %v729_v10  ;;  %v2966_v27 = vld [vmem:[#allocation4 + $0x10] sm:$0xff] }
  0x26   : > { %2345 = vmatprep.mubr.msk.bf16.mxu0 %vm2644_vm0, %v2643_v1 }
  0x27   : > { %2324 = vmatpush3.bf16.msra.mxu1 %v2492_v7 }
  0x28   : > { %2337 = vmatprep.subr.bf16.mxu1 %v2643_v1 }
  0x2a   : > { %2326 = vmatmul.mubr.msk.bf16.vlgmr.msra.gmra.mxu1 %vm652_vm1, %v729_v10 }
  0x2b   : > { %2339 = vmatprep.mubr.msk.bf16.mxu1 %vm2644_vm0, %v2643_v1 }
  0xe2   : > { %v690_v12 = vpop.f32.mrf.mxu1 }
  0xe3   : > { %v2263_v13 = vpack.c.bf16 %v690_v12, %v690_v12 }
  0xe4   : > { %v2319_v14 = vpop.f32.mrf.mxu1 }
  0xe5   : > { %706 = vst.msk [vmem:[#allocation2] sm:$0xf] %vm705_vm2, %v2263_v13  ;;  %v2945_v14 = vld [vmem:[#allocation4] sm:$0xff] }
  0xe6   : > { %v693_v15 = vpop.f32.mrf.mxu1 }
  0xe7   : > { %v2264_v16 = vpack.c.bf16 %v693_v15, %v693_v15  ;;  %v842_v15 = vpop.f32.mrf.mxu0 }
  0xe8   : > { %v2320_v17 = vpop.f32.mrf.mxu1 }
  0xe9   : > { %707 = vst.msk [vmem:[#allocation2 + $0x4] sm:$0xf] %vm705_vm2, %v2264_v16 }
  0xea   : > { %v784_v18 = vpop.f32.mrf.mxu1 }
  0xec   : > { %v2327_v19 = vpop.f32.mrf.mxu1 }
  0xed   : > { %v2950_v19 = vld [vmem:[#allocation4 + $0x8] sm:$0xff] }
  0xee   : > { %v787_v20 = vpop.f32.mrf.mxu1 }
  0xef   : > { %v791_v21 = vpack.c.bf16 %v787_v20, %v784_v18  ;;  %v2335_v18 = vpop.f32.mrf.mxu0 }
  0xf0   : > { %v2328_v22 = vpop.f32.mrf.mxu1  ;;  %v2493_v24 = vld [vmem:[#allocation2] sm:$0xff]  }
  0xf1   : > { %1219 = vrot.lane.b32.xlu1 %v791_v21, %s3248_s4  ;;  %1042 = vrot.lane.b32.xlu0 %v791_v21, %s2647_s20  ;;  %v883_v23 = vsel %vm878_vm3, %v791_v21, 0 }
  0xf2   : > { %2338 = vmatpush3.bf16.xpose.msra.mxu1 %v883_v23 }
  0xf3   : > { %2349 = vmatprep.subr.bf16.mxu1 %v2643_v1 }
  0xf5   : > { %1217 = vrot.lane.b32.xlu1 %v2493_v24, %s3248_s4  ;;  %1039 = vrot.lane.b32.xlu0 %v2493_v24, %s2647_s20  ;;  %s588_s4 = sand.u32 1, %s2625_s19  }
  0xf9   : > { %1393 = vrot.lane.b32.xlu1 %v2493_v24, %s2648_s24  ;;  %1395 = vrot.lane.b32.xlu0 %v791_v21, %s2648_s24  ;;  %v845_v21 = vpop.f32.mrf.mxu0 }
  0xfa   : > { %2340 = vmatmul.mubr.msk.bf16.vlgmr.msra.gmra.mxu1 %vm878_vm3, %v2493_v24  ;;  %v849_v23 = vpack.c.bf16 %v845_v21, %v842_v15 }
  0xfb   : > { %2351 = vmatprep.mubr.msk.bf16.mxu1 %vm2644_vm0, %v2643_v1 }
  0xfc   : > { %2344 = vmatpush3.bf16.msra.mxu0 %v849_v23 }
  0xfd   : > { %855 = vperm.xlu0 %2487, %v850_v25   ;;  %860 = vperm.xlu1 %2488, %v851_v26   ;;  %v2336_v25 = vpop.f32.mrf.mxu0 }
  0xfe   : > { %2355 = vmatprep.subr.bf16.mxu0 %v2643_v1 }
 0x163   : > { %v1043_v29 = vpop.permute.xlu0 %1042  ;;  %v1220_v31 = vpop.permute.xlu1 %1219 }
 0x164   : > { %v1048_v30 = vsel %vm878_vm3, %v1043_v29, 0  ;;  %v1225_v33 = vsel %vm878_vm3, %v1220_v31, 0 }
 0x165   : > { %2350 = vmatpush3.bf16.xpose.msra.mxu1 %v1048_v30  ;;  %v2971_v30 = vld [vmem:[#allocation4 + $0x18] sm:$0xff] }
 0x166   : > { %2361 = vmatprep.subr.bf16.mxu1 %v2643_v1 }
 0x167   : > { %v1040_v32 = vpop.permute.xlu0 %1039  ;;  %v1218_v35 = vpop.permute.xlu1 %1217 }
 0x16b   : > { %v1396_v34 = vpop.permute.xlu0 %1395  ;;  %v1394_v37 = vpop.permute.xlu1 %1393 }
 0x16c   : > { %2352 = vmatmul.mubr.msk.bf16.vlgmr.msra.gmra.mxu1 %vm878_vm3, %v1040_v32  ;;  %v1401_v36 = vsel %vm878_vm3, %v1396_v34, 0  ;;  %v2981_v34 = vld [vmem:[#allocation4 + $0x20] sm:$0xff] }
 0x16d   : > { %2362 = vmatpush3.bf16.xpose.msra.mxu1 %v1225_v33  ;;  %2363 = vmatprep.mubr.msk.bf16.mxu1 %vm2644_vm0, %v2643_v1 }
 0x16e   : > { %2373 = vmatprep.subr.bf16.mxu1 %v2643_v1 }
 0x174   : > { %2364 = vmatmul.mubr.msk.bf16.vlgmr.msra.gmra.mxu1 %vm878_vm3, %v1218_v35 }
 0x175   : > { %2374 = vmatpush3.bf16.xpose.msra.mxu1 %v1401_v36  ;;  %2375 = vmatprep.mubr.msk.bf16.mxu1 %vm2644_vm0, %v2643_v1 }
 0x176   : > { %2385 = vmatprep.subr.bf16.mxu1 %v2643_v1 }
 0x178   : > { %v856_v39 = vpop.permute.xlu0 %855  ;;  %v861_v41 = vpop.permute.xlu1 %860 }
 0x179   : > { %v869_v40 = vmul.f32 %v2218_v38, %v856_v39  ;;  %v870_v44 = vmul.f32 %v2218_v38, %v861_v41  ;;  %v2991_v38 = vld [vmem:[#allocation4 + $0x28] sm:$0xff] }
 0x17c   : > { %2376 = vmatmul.mubr.msk.bf16.vlgmr.msra.gmra.mxu1 %vm878_vm3, %v1394_v37 }
 0x17d   : > { %2389 = vmatprep.mubr.msk.bf16.mxu1 %vm2644_vm0, %v2643_v1 }
 0x1ba   : > { %v919_v42 = vpop.f32.mrf.mxu1 }
 0x1bb   : > { %v2889_v43 = vadd.f32 %v919_v42, %v869_v40  ;;  %v3001_v42 = vld [vmem:[#allocation4 + $0x30] sm:$0xff] }
 0x1bc   : > { %v2341_v45 = vpop.f32.mrf.mxu1 }
 0x1bd   : > { %v929_v46 = vsel %vm928_vm4, %v2889_v43, -inf }
 0x1be   : > { %930 = vmax.xlane.f32.xlu1 %v929_v46  ;;  %v922_v47 = vpop.f32.mrf.mxu1 }
 0x1bf   : > { %v2893_v48 = vadd.f32 %v922_v47, %v870_v44  ;;  %v3012_v47 = vld [vmem:[#allocation4 + $0x38] sm:$0xff] }
 0x1c0   : > { %v2342_v49 = vpop.f32.mrf.mxu1 }
 0x1c1   : > { %v932_v51 = vsel %vm928_vm4, %v2893_v48, -inf }
 0x1c2   : > { %933 = vmax.xlane.f32.xlu0 %v932_v51 }
 0x22c   : > { %v1084_v52 = vpop.f32.mrf.mxu1 }
 0x22d   : > { %v2921_v53 = vadd.f32 %v1084_v52, %v869_v40 }
 0x22e   : > { %v2353_v54 = vpop.f32.mrf.mxu1 }
 0x22f   : > { %v1094_v55 = vsel %vm928_vm4, %v2921_v53, -inf }
 0x230   : > { %1095 = vmax.xlane.f32.xlu0 %v1094_v55  ;;  %v1087_v56 = vpop.f32.mrf.mxu1 }
 0x231   : > { %v2925_v57 = vadd.f32 %v1087_v56, %v870_v44 }
 0x232   : > { %v2354_v58 = vpop.f32.mrf.mxu1 }
 0x233   : > { %v1097_v59 = vsel %vm928_vm4, %v2925_v57, -inf }
 0x234   : > { %1098 = vmax.xlane.f32.xlu1 %v1097_v59  ;;  %v1261_v60 = vpop.f32.mrf.mxu1 }
 0x235   : > { %v2929_v61 = vadd.f32 %v1261_v60, %v869_v40 }
 0x236   : > { %v2365_v62 = vpop.f32.mrf.mxu1 }
 0x237   : > { %v1271_v63 = vsel %vm928_vm4, %v2929_v61, -inf }
 0x238   : > { %1272 = vmax.xlane.f32.xlu0 %v1271_v63  ;;  %v1264_v0 = vpop.f32.mrf.mxu1 }
 0x239   : > { %v2933_v2 = vadd.f32 %v1264_v0, %v870_v44 }
 0x23a   : > { %v2366_v3 = vpop.f32.mrf.mxu1 }
 0x23b   : > { %v1274_v4 = vsel %vm928_vm4, %v2933_v2, -inf }
 0x23c   : > { %1275 = vmax.xlane.f32.xlu1 %v1274_v4  ;;  %v1437_v5 = vpop.f32.mrf.mxu1 }
 0x23d   : > { %v2937_v7 = vadd.f32 %v1437_v5, %v869_v40 }
 0x23e   : > { %v2377_v8 = vpop.f32.mrf.mxu1 }
 0x23f   : > { %v1447_v9 = vsel %vm928_vm4, %v2937_v7, -inf }
 0x240   : > { %1448 = vmax.xlane.f32.xlu0 %v1447_v9  ;;  %v1440_v10 = vpop.f32.mrf.mxu1 }
 0x241   : > { %v2941_v11 = vadd.f32 %v1440_v10, %v870_v44 }
 0x242   : > { %v2378_v12 = vpop.f32.mrf.mxu1 }
 0x243   : > { %v1450_v13 = vsel %vm928_vm4, %v2941_v11, -inf }
 0x244   : > { %1451 = vmax.xlane.f32.xlu1 %v1450_v13 }
 0x247   : > { %v931_v16 = vpop.xlane.xlu1 %930 }
 0x248   : > { %v2948_v17 = vmax.f32 %v2945_v14, %v931_v16 }
 0x24a   : > { %v937_v20 = vsub.f32 %v2945_v14, %v2948_v17  ;;  %1037 = vst.msk [vmem:[#allocation4] sm:$0xff] %vm708_vm5, %v2948_v17 }
 0x24b   : > { %v934_v22 = vpop.xlane.xlu0 %933 }
 0x24c   : > { %v2957_v24 = vmax.f32 %v2950_v19, %v934_v22 }
 0x24e   : > { %v938_v26 = vsub.f32 %v2950_v19, %v2957_v24  ;;  %1038 = vst.msk [vmem:[#allocation4 + $0x8] sm:$0xff] %vm708_vm5, %v2957_v24 }
 0x255   : > { %950 = vperm.xlu1 %2488, %v2957_v24  }
 0x256   : > { %945 = vperm.xlu0 %2487, %v2948_v17   ;;  %v941_v17 = vmul.f32 1.442695, %v938_v26 }
 0x2b9   : > { %v1096_v28 = vpop.xlane.xlu0 %1095 }
 0x2ba   : > { %v2969_v29 = vmax.f32 %v2966_v27, %v1096_v28 }
 0x2bc   : > { %v1102_v31 = vsub.f32 %v2966_v27, %v2969_v29  ;;  %1215 = vst.msk [vmem:[#allocation4 + $0x10] sm:$0xff] %vm708_vm5, %v2969_v29  ;;  %1110 = vperm.xlu1 %2488, %v2969_v29  }
 0x2bd   : > { %v1099_v32 = vpop.xlane.xlu1 %1098 }
 0x2be   : > { %v2979_v33 = vmax.f32 %v2971_v30, %v1099_v32 }
 0x2c0   : > { %v1103_v35 = vsub.f32 %v2971_v30, %v2979_v33  ;;  %1216 = vst.msk [vmem:[#allocation4 + $0x18] sm:$0xff] %vm708_vm5, %v2979_v33  ;;  %1115 = vperm.xlu0 %2487, %v2979_v33   ;;  %v960_v30 = vld [vmem:[#allocation5 + $0x8] sm:$0xff] }
 0x2c1   : > { %v1273_v36 = vpop.xlane.xlu0 %1272 }
 0x2c2   : > { %v2989_v37 = vmax.f32 %v2981_v34, %v1273_v36  ;;  %v1106_v14 = vmul.f32 1.442695, %v1103_v35 }
 0x2c4   : > { %v1279_v39 = vsub.f32 %v2981_v34, %v2989_v37  ;;  %1391 = vst.msk [vmem:[#allocation4 + $0x20] sm:$0xff] %vm708_vm5, %v2989_v37  ;;  %1287 = vperm.xlu1 %2488, %v2989_v37   ;;  %v1126_v34 = vld [vmem:[#allocation5 + $0x18] sm:$0xff] }
 0x2c5   : > { %v1276_v40 = vpop.xlane.xlu1 %1275 }
 0x2c6   : > { %v2999_v41 = vmax.f32 %v2991_v38, %v1276_v40 }
 0x2c8   : > { %v1280_v44 = vsub.f32 %v2991_v38, %v2999_v41  ;;  %1392 = vst.msk [vmem:[#allocation4 + $0x28] sm:$0xff] %vm708_vm5, %v2999_v41  ;;  %1292 = vperm.xlu0 %2487, %v2999_v41   ;;  %1155 = vrot.lane.b32.xlu1 %v849_v23, %s2647_s20  ;;  %s3249_s20 = smov 8  }
 0x2c9   : > { %v1449_v45 = vpop.xlane.xlu0 %1448 }
 0x2ca   : > { %v3010_v46 = vmax.f32 %v3001_v42, %v1449_v45 }
 0x2cc   : > { %v1455_v49 = vsub.f32 %v3001_v42, %v3010_v46  ;;  %1567 = vst.msk [vmem:[#allocation4 + $0x30] sm:$0xff] %vm708_vm5, %v3010_v46  ;;  %1463 = vperm.xlu0 %2487, %v3010_v46  }
 0x2cd   : > { %v1452_v50 = vpop.xlane.xlu1 %1451 }
 0x2ce   : > { %v3020_v51 = vmax.f32 %v3012_v47, %v1452_v50 }
 0x2d0   : > { %v1456_v52 = vsub.f32 %v3012_v47, %v3020_v51  ;;  %1568 = vst.msk [vmem:[#allocation4 + $0x38] sm:$0xff] %vm708_vm5, %v3020_v51  ;;  %1331 = vrot.lane.b32.xlu0 %v849_v23, %s3260_s27  ;;  %1468 = vperm.xlu1 %2488, %v3020_v51   ;;  %s2200_s27 = sshll.u32 %s588_s4, 4 }
 0x2d1   : > { %v946_v54 = vpop.permute.xlu0 %945  ;;  %v951_v55 = vpop.permute.xlu1 %950 }
 0x2d2   : > { %v953_v56 = vsub.f32 %v2889_v43, %v946_v54  ;;  %v954_v58 = vsub.f32 %v2893_v48, %v951_v55 }
 0x2d4   : > { %v955_v59 = vmul.f32 1.442695, %v953_v56  ;;  %v957_v60 = vmul.f32 1.442695, %v954_v58  ;;  %1507 = vrot.lane.b32.xlu1 %v849_v23, %s2648_s24  ;;  %s2651_s24 = smov 16  }
 0x2d6   : > { %2507 = vpow2.f32 %v955_v59 }
 0x2d7   : > { %2509 = vpow2.f32 %v957_v60  ;;  %v939_v60 = vmul.f32 1.442695, %v937_v20 }
 0x2e3   : > { %v2508_v62 = vpop.eup %2507 }
 0x2e4   : > { %v2510_v63 = vpop.eup %2509  ;;  %v963_v3 = vsel %vm928_vm4, %v2508_v62, 0.0 }
 0x2e5   : > { %v988_v0 = vpack.c.bf16 %v2510_v63, %v2508_v62  ;;  %v966_v43 = vsel %vm928_vm4, %v2510_v63, 0.0 }
 0x2e7   : > { %2346 = vmatmul.mubr.msk.bf16.vlgmr.msra.gmra.mxu0 %vm928_vm4, %v988_v0  ;;  %v1104_v0 = vmul.f32 1.442695, %v1102_v31 }
 0x2e8   : > { %2357 = vmatprep.mubr.msk.bf16.mxu0 %vm2644_vm0, %v2643_v1 }
 0x2ef   : > { %964 = vadd.xlane.f32.xlu0 %v963_v3 }
 0x2f8   : > { %967 = vadd.xlane.f32.xlu1 %v966_v43 }
 0x337   : > { %v1111_v48 = vpop.permute.xlu1 %1110 }
 0x338   : > { %v1118_v4 = vsub.f32 %v2921_v53, %v1111_v48  ;;  %v959_v48 = vld [vmem:[#allocation5] sm:$0xff] }
 0x33a   : > { %v1120_v5 = vmul.f32 1.442695, %v1118_v4 }
 0x33b   : > { %v1116_v8 = vpop.permute.xlu0 %1115 }
 0x33c   : > { %2511 = vpow2.f32 %v1120_v5  ;;  %v1119_v9 = vsub.f32 %v2925_v57, %v1116_v8 }
 0x33e   : > { %v1122_v10 = vmul.f32 1.442695, %v1119_v9 }
 0x33f   : > { %v1288_v12 = vpop.permute.xlu1 %1287 }
 0x340   : > { %2513 = vpow2.f32 %v1122_v10  ;;  %v1295_v13 = vsub.f32 %v2929_v61, %v1288_v12  ;;  %v1281_v12 = vmul.f32 1.442695, %v1279_v39 }
 0x342   : > { %v1297_v15 = vmul.f32 1.442695, %v1295_v13  ;;  %v1283_v13 = vmul.f32 1.442695, %v1280_v44  ;;  %v1302_v44 = vld [vmem:[#allocation5 + $0x20] sm:$0xff] }
 0x343   : > { %v1293_v16 = vpop.permute.xlu0 %1292  ;;  %v1156_v18 = vpop.permute.xlu1 %1155 }
 0x344   : > { %2515 = vpow2.f32 %v1297_v15  ;;  %v1296_v21 = vsub.f32 %v2933_v2, %v1293_v16  ;;  %2356 = vmatpush3.bf16.msra.mxu0 %v1156_v18  ;;  %v1457_v15 = vmul.f32 1.442695, %v1455_v49  ;;  %v1125_v16 = vld [vmem:[#allocation5 + $0x10] sm:$0xff]  ;;  %v1459_v18 = vmul.f32 1.442695, %v1456_v52 }
 0x345   : > { %2367 = vmatprep.subr.bf16.mxu0 %v2643_v1 }
 0x346   : > { %v1299_v53 = vmul.f32 1.442695, %v1296_v21 }
 0x347   : > { %v1464_v22 = vpop.permute.xlu0 %1463 }
 0x348   : > { %2517 = vpow2.f32 %v1299_v53  ;;  %v1471_v23 = vsub.f32 %v2937_v7, %v1464_v22 }
 0x349   : > { %v2512_v57 = vpop.eup %2511 }
 0x34a   : > { %v1473_v25 = vmul.f32 1.442695, %v1471_v23  ;;  %v1129_v28 = vsel %vm928_vm4, %v2512_v57, 0.0  ;;  %v1303_v23 = vld [vmem:[#allocation5 + $0x28] sm:$0xff] }
 0x34b   : > { %1130 = vadd.xlane.f32.xlu0 %v1129_v28  ;;  %v1469_v61 = vpop.permute.xlu1 %1468  ;;  %v1332_v50 = vpop.permute.xlu0 %1331 }
 0x34c   : > { %2519 = vpow2.f32 %v1473_v25  ;;  %v1472_v32 = vsub.f32 %v2941_v11, %v1469_v61  ;;  %v1478_v25 = vld [vmem:[#allocation5 + $0x30] sm:$0xff] }
 0x34d   : > { %v2514_v36 = vpop.eup %2513 }
 0x34e   : > { %v1475_v40 = vmul.f32 1.442695, %v1472_v32  ;;  %v1132_v2 = vsel %vm928_vm4, %v2514_v36, 0.0  ;;  %v1153_v45 = vpack.c.bf16 %v2514_v36, %v2512_v57 }
 0x34f   : > { %1133 = vadd.xlane.f32.xlu0 %v1132_v2  ;;  %v1508_v58 = vpop.permute.xlu1 %1507 }
 0x350   : > { %2521 = vpow2.f32 %v1475_v40  ;;  %2358 = vmatmul.mubr.msk.bf16.vlgmr.msra.gmra.mxu0 %vm928_vm4, %v1153_v45  ;;  %v1479_v40 = vld [vmem:[#allocation5 + $0x38] sm:$0xff]  ;;  %v974_v45 = vld [vmem:[#allocation6] sm:$0xff] }
 0x351   : > { %v2516_v7 = vpop.eup %2515  ;;  %2368 = vmatpush3.bf16.msra.mxu0 %v1332_v50  ;;  %2369 = vmatprep.mubr.msk.bf16.mxu0 %vm2644_vm0, %v2643_v1  ;;  %2523 = vpow2.f32 %v939_v60 }
 0x352   : > { %v1306_v54 = vsel %vm928_vm4, %v2516_v7, 0.0  ;;  %2379 = vmatprep.subr.bf16.mxu0 %v2643_v1  ;;  %2525 = vpow2.f32 %v1104_v0 }
 0x353   : > { %1307 = vadd.xlane.f32.xlu1 %v1306_v54  ;;  %2527 = vpow2.f32 %v1106_v14 }
 0x354   : > { %2529 = vpow2.f32 %v941_v17 }
 0x355   : > { %v2518_v11 = vpop.eup %2517  ;;  %2531 = vpow2.f32 %v1281_v12 }
 0x356   : > { %v1309_v55 = vsel %vm928_vm4, %v2518_v11, 0.0  ;;  %v1330_v56 = vpack.c.bf16 %v2518_v11, %v2516_v7  ;;  %2533 = vpow2.f32 %v1283_v13 }
 0x357   : > { %1310 = vadd.xlane.f32.xlu0 %v1309_v55  ;;  %2535 = vpow2.f32 %v1457_v15 }
 0x358   : > { %2370 = vmatmul.mubr.msk.bf16.vlgmr.msra.gmra.mxu0 %vm928_vm4, %v1330_v56  ;;  %2537 = vpow2.f32 %v1459_v18 }
 0x359   : > { %v2520_v59 = vpop.eup %2519  ;;  %2380 = vmatpush3.bf16.msra.mxu0 %v1508_v58  ;;  %2381 = vmatprep.mubr.msk.bf16.mxu0 %vm2644_vm0, %v2643_v1  ;;  %v975_v58 = vld [vmem:[#allocation6 + $0x8] sm:$0xff] }
 0x35a   : > { %v1482_v62 = vsel %vm928_vm4, %v2520_v59, 0.0  ;;  %2393 = vmatprep.subr.bf16.mxu0 %v2643_v1 }
 0x35b   : > { %1483 = vadd.xlane.f32.xlu1 %v1482_v62 }
 0x35d   : > { %v2522_v63 = vpop.eup %2521 }
 0x35e   : > { %v1485_v3 = vsel %vm928_vm4, %v2522_v63, 0.0  ;;  %v1506_v43 = vpack.c.bf16 %v2522_v63, %v2520_v59  ;;  %v2524_v20 = vpop.eup %2523 }
 0x35f   : > { %1486 = vadd.xlane.f32.xlu0 %v1485_v3  ;;  %v2526_v27 = vpop.eup %2525  ;;  %v961_v4 = vmul.f32 %v2524_v20, %v959_v48 }
 0x360   : > { %2382 = vmatmul.mubr.msk.bf16.vlgmr.msra.gmra.mxu0 %vm928_vm4, %v1506_v43  ;;  %v2528_v29 = vpop.eup %2527  ;;  %v1127_v21 = vmul.f32 %v2526_v27, %v1125_v16 }
 0x361   : > { %2397 = vmatprep.mubr.msk.bf16.mxu0 %vm2644_vm0, %v2643_v1  ;;  %v2530_v31 = vpop.eup %2529  ;;  %v1128_v38 = vmul.f32 %v2528_v29, %v1126_v34  ;;  %v2497_v34 = vld [vmem:[%s3236_s7] sm:$0xff]  }
 0x362   : > { %v962_v33 = vmul.f32 %v2530_v31, %v960_v30  ;;  %v2532_v39 = vpop.eup %2531 }
 0x363   : > { %v1304_v42 = vmul.f32 %v2532_v39, %v1302_v44  ;;  %v2534_v46 = vpop.eup %2533 }
 0x364   : > { %v1305_v51 = vmul.f32 %v2534_v46, %v1303_v23  ;;  %v2536_v52 = vpop.eup %2535 }
 0x365   : > { %v1480_v61 = vmul.f32 %v2536_v52, %v1478_v25  ;;  %v2538_v32 = vpop.eup %2537 }
 0x366   : > { %v1481_v50 = vmul.f32 %v2538_v32, %v1479_v40 }
 0x36c   : > { %978 = vperm.xlu1 %2488, %v2524_v20  }
 0x370   : > { %1143 = vperm.xlu1 %2488, %v2526_v27  }
 0x374   : > { %1148 = vperm.xlu1 %2488, %v2528_v29  }
 0x375   : > { %983 = vperm.xlu0 %2487, %v2530_v31  }
 0x378   : > { %v965_v5 = vpop.xlane.xlu0 %964 }
 0x379   : > { %v969_v8 = vadd.f32 %v965_v5, %v961_v4 }
 0x37b   : > { %972 = vst.msk [vmem:[#allocation5] sm:$0xff] %vm708_vm5, %v969_v8 }
 0x381   : > { %v968_v19 = vpop.xlane.xlu1 %967 }
 0x382   : > { %v970_v24 = vadd.f32 %v968_v19, %v962_v33  ;;  %v1572_v0 = vld [vmem:[#allocation5] sm:$0xff] }
 0x383   : > { %2539 = vrcp.f32 %v1572_v0 }
 0x384   : > { %973 = vst.msk [vmem:[#allocation5 + $0x8] sm:$0xff] %vm708_vm5, %v970_v24 }
 0x38b   : > { %v1573_v43 = vld [vmem:[#allocation5 + $0x8] sm:$0xff] }
 0x38c   : > { %2541 = vrcp.f32 %v1573_v43 }
 0x390   : > { %v2540_v30 = vpop.eup %2539 }
 0x3a7   : > { %v1026_v26 = vpop.f32.mrf.mxu0 }
 0x3a9   : > { %v2347_v35 = vpop.f32.mrf.mxu0 }
 0x3ab   : > { %v1029_v9 = vpop.f32.mrf.mxu0 }
 0x3ad   : > { %v2348_v10 = vpop.f32.mrf.mxu0 }
 0x3d4   : > { %v1131_v53 = vpop.xlane.xlu0 %1130 }
 0x3d5   : > { %v1135_v37 = vadd.f32 %v1131_v53, %v1127_v21  ;;  %v2496_v53 = vld [vmem:[%s3236_s7 + $0x8] sm:$0xff]  }
 0x3d6   : > { %2386 = vmatpush3.bf16.msra.mxu1 %v2496_v53 }
 0x3d7   : > { %1137 = vst.msk [vmem:[#allocation5 + $0x10] sm:$0xff] %vm708_vm5, %v1135_v37  ;;  %2387 = vmatprep.subr.bf16.mxu1 %v2643_v1 }
 0x3d8   : > { %v1134_v41 = vpop.xlane.xlu0 %1133 }
 0x3d9   : > { %v1136_v22 = vadd.f32 %v1134_v41, %v1128_v38 }
 0x3da   : > { %2388 = vmatpush3.bf16.msra.mxu1 %v2497_v34 }
 0x3db   : > { %1138 = vst.msk [vmem:[#allocation5 + $0x18] sm:$0xff] %vm708_vm5, %v1136_v22  ;;  %2401 = vmatprep.subr.bf16.mxu1 %v2643_v1 }
 0x3dc   : > { %v1308_v49 = vpop.xlane.xlu1 %1307 }
 0x3dd   : > { %v1312_v47 = vadd.f32 %v1308_v49, %v1304_v42 }
 0x3de   : > { %v1601_v17 = vld [vmem:[#allocation5 + $0x10] sm:$0xff] }
 0x3df   : > { %1314 = vst.msk [vmem:[#allocation5 + $0x20] sm:$0xff] %vm708_vm5, %v1312_v47  ;;  %2543 = vrcp.f32 %v1601_v17 }
 0x3e0   : > { %v1311_v57 = vpop.xlane.xlu0 %1310 }
 0x3e1   : > { %v1313_v28 = vadd.f32 %v1311_v57, %v1305_v51 }
 0x3e2   : > { %v1602_v29 = vld [vmem:[#allocation5 + $0x18] sm:$0xff] }
 0x3e3   : > { %1315 = vst.msk [vmem:[#allocation5 + $0x28] sm:$0xff] %vm708_vm5, %v1313_v28  ;;  %2545 = vrcp.f32 %v1602_v29 }
 0x3e4   : > { %v1484_v36 = vpop.xlane.xlu1 %1483 }
 0x3e5   : > { %v1488_v2 = vadd.f32 %v1484_v36, %v1480_v61 }
 0x3e6   : > { %v1630_v4 = vld [vmem:[#allocation5 + $0x20] sm:$0xff] }
 0x3e7   : > { %1490 = vst.msk [vmem:[#allocation5 + $0x30] sm:$0xff] %vm708_vm5, %v1488_v2  ;;  %2547 = vrcp.f32 %v1630_v4 }
 0x3e8   : > { %v1487_v7 = vpop.xlane.xlu0 %1486  ;;  %v979_v54 = vpop.permute.xlu1 %978 }
 0x3e9   : > { %v1489_v11 = vadd.f32 %v1487_v7, %v1481_v50  ;;  %v986_v55 = vmul.f32 %v979_v54, %v974_v45 }
 0x3ea   : > { %v1631_v8 = vld [vmem:[#allocation5 + $0x28] sm:$0xff] }
 0x3eb   : > { %1491 = vst.msk [vmem:[#allocation5 + $0x38] sm:$0xff] %vm708_vm5, %v1489_v11  ;;  %v1033_v56 = vadd.f32 %v1026_v26, %v986_v55  ;;  %2549 = vrcp.f32 %v1631_v8  ;;  %v2542_v26 = vpop.eup %2541 }
 0x3ec   : > { %v2544_v35 = vpop.eup %2543  ;;  %v1144_v37 = vpop.permute.xlu1 %1143 }
 0x3ed   : > { %1035 = vst.msk [vmem:[#allocation6] sm:$0xff] %vm878_vm3, %v1033_v56 }
 0x3ee   : > { %v1659_v19 = vld [vmem:[#allocation5 + $0x30] sm:$0xff] }
 0x3ef   : > { %2551 = vrcp.f32 %v1659_v19 }
 0x3f0   : > { %v984_v59 = vpop.permute.xlu0 %983  ;;  %v2546_v13 = vpop.eup %2545 }
 0x3f1   : > { %v987_v60 = vmul.f32 %v984_v59, %v975_v58  ;;  %v1149_v44 = vpop.permute.xlu1 %1148 }
 0x3f2   : > { %v1660_v10 = vld [vmem:[#allocation5 + $0x38] sm:$0xff] }
 0x3f3   : > { %v1034_v62 = vadd.f32 %v1029_v9, %v987_v60  ;;  %2553 = vrcp.f32 %v1660_v10 }
 0x3f4   : > { %v2548_v15 = vpop.eup %2547  ;;  %v1139_v38 = vld [vmem:[#allocation6] sm:$0xff] }
 0x3f5   : > { %1036 = vst.msk [vmem:[#allocation6 + $0x8] sm:$0xff] %vm878_vm3, %v1034_v62 }
 0x3f8   : > { %v2550_v16 = vpop.eup %2549 }
 0x3fc   : > { %v2552_v18 = vpop.eup %2551  ;;  %v1140_v41 = vld [vmem:[#allocation6 + $0x8] sm:$0xff] }
 0x400   : > { %v2554_v21 = vpop.eup %2553 }
 0x410   : > { %v1195_v63 = vpop.f32.mrf.mxu0 }
 0x411   : > { %1204 = vrot.lane.b32.xlu0 %v1195_v63, %s3249_s20 }
 0x412   : > { %v2359_v3 = vpop.f32.mrf.mxu0 }
 0x414   : > { %v1198_v14 = vpop.f32.mrf.mxu0 }
 0x415   : > { %1206 = vrot.lane.b32.xlu1 %v1198_v14, %s3249_s20  ;;  %1320 = vperm.xlu0 %2487, %v2532_v39   ;;  %v1151_v39 = vmul.f32 %v1144_v37, %v1139_v38 }
 0x416   : > { %v2360_v20 = vpop.f32.mrf.mxu0 }
 0x418   : > { %v1371_v27 = vpop.f32.mrf.mxu0 }
 0x419   : > { %1325 = vperm.xlu1 %2488, %v2534_v46   ;;  %1496 = vperm.xlu0 %2487, %v2536_v52   ;;  %v1152_v46 = vmul.f32 %v1149_v44, %v1140_v41 }
 0x41a   : > { %v2371_v31 = vpop.f32.mrf.mxu0 }
 0x41c   : > { %v1374_v48 = vpop.f32.mrf.mxu0 }
 0x41d   : > { %1501 = vperm.xlu1 %2488, %v2538_v32   ;;  %1380 = vrot.lane.b32.xlu0 %v1371_v27, %s2651_s24 }
 0x41e   : > { %v2372_v5 = vpop.f32.mrf.mxu0 }
 0x420   : > { %v1547_v33 = vpop.f32.mrf.mxu0 }
 0x421   : > { %1382 = vrot.lane.b32.xlu1 %v1374_v48, %s2651_s24  ;;  %1580 = vperm.xlu0 %2487, %v2540_v30   ;;  %s2273_s24 = sshll.u32 %s2633_s21, 8  ;;  %s3183_s21 = scalar_lea.sflag [#allocation8], %s588_s4 }
 0x422   : > { %v2383_v24 = vpop.f32.mrf.mxu0  ;;  %s3177_s26 = scalar_lea.hbm %s3244_s15, %s2273_s24 }
 0x424   : > { %v1550_v9 = vpop.f32.mrf.mxu0 }
 0x425   : > { %1609 = vperm.xlu0 %2487, %v2544_v35   ;;  %1585 = vperm.xlu1 %2488, %v2542_v26  }
 0x426   : > { %v2384_v12 = vpop.f32.mrf.mxu0 }
 0x429   : > { %1556 = vrot.lane.b32.xlu0 %v1547_v33, %s2652_s25  ;;  %1614 = vperm.xlu1 %2488, %v2546_v13  }
 0x42d   : > { %1558 = vrot.lane.b32.xlu1 %v1550_v9, %s2652_s25  ;;  %1638 = vperm.xlu0 %2487, %v2548_v15   ;;  %s590_s25 = scalar_lea.vmem [#allocation7], %s2200_s27  ;;  %s2653_s27 = smov [#allocation7]  }
 0x42e   : > { %s2065_s17 = sshll.u32 %s590_s25, 4  ;;  %s2569_s20 = sshll.u32 %s2653_s27, 4  ;;  %s3180_s17 = int_to_ptr.vmem [resolvable:$true] %s2065_s17  ;;  %s2570_s20 = int_to_ptr.vmem [resolvable:$false] %s2569_s20 }
 0x42f   : > { %s2565_s16 = scalar_lea.vmem %s3180_s17, 256  ;;  %s2571_s24 = scalar_lea.vmem %s2570_s20, 512 }
 0x430   : > { %p2566_p12 = scmp.ne.s32.totalorder %s3180_s17, %s2565_s16  ;;  %p2572_p1 = scmp.lt.s32.totalorder %s3180_s17, %s2570_s20 }
 0x431   : > { %1643 = vperm.xlu1 %2488, %v2550_v16   ;;  %1667 = vperm.xlu0 %2487, %v2552_v18   ;;  %p2573_p2 = scmp.lt.s32.totalorder %s2571_s24, %s2565_s16 }
 0x432   : > { %p2567_p13 = pnand %p2566_p12, %p2775_p4 }
 0x433   : > { %p2574_p3 = por %p2573_p2, %p2572_p1 }
 0x434   : > { %p2568_p0 = pneg %p2567_p13 }
 0x435   : > { %1672 = vperm.xlu1 %2488, %v2554_v21  }
 0x436   : > { %p2575_p5 = pnand %p2574_p3, %p2568_p0 }
 0x483   : > { %v1205_v22 = vpop.permute.xlu0 %1204 }
 0x484   : > { %v1210_v42 = vadd.f32 %v1205_v22, %v1151_v39 }
 0x486   : > { %1213 = vst.msk [vmem:[#allocation6] sm:$0xff] %vm1212_vm6, %v1210_v42 }
 0x487   : > { %v1207_v49 = vpop.permute.xlu1 %1206 }
 0x488   : > { %v1211_v23 = vadd.f32 %v1207_v49, %v1152_v46 }
 0x48a   : > { %1214 = vst.msk [vmem:[#allocation6 + $0x8] sm:$0xff] %vm1212_vm6, %v1211_v23 }
 0x48d   : > { %v1316_v57 = vld [vmem:[#allocation6] sm:$0xff] }
 0x490   : > { %v1321_v47 = vpop.permute.xlu0 %1320 }
 0x491   : > { %v1328_v25 = vmul.f32 %v1321_v47, %v1316_v57  ;;  %v1317_v36 = vld [vmem:[#allocation6 + $0x8] sm:$0xff]  ;;  %v2501_v57 = vld [vmem:[%s3240_s11 + $0x8] sm:$0xff]  }
 0x492   : > { %2394 = vmatpush3.bf16.msra.mxu0 %v2501_v57 }
 0x493   : > { %2395 = vmatprep.subr.bf16.mxu0 %v2643_v1 }
 0x494   : > { %v1497_v51 = vpop.permute.xlu0 %1496  ;;  %v1326_v52 = vpop.permute.xlu1 %1325 }
 0x495   : > { %v1329_v40 = vmul.f32 %v1326_v52, %v1317_v36  ;;  %v2500_v52 = vld [vmem:[%s3239_s10] sm:$0xff]  }
 0x498   : > { %v1381_v28 = vpop.permute.xlu0 %1380  ;;  %v1502_v61 = vpop.permute.xlu1 %1501 }
 0x499   : > { %v1386_v32 = vadd.f32 %v1381_v28, %v1328_v25  ;;  %v2502_v25 = vld [vmem:[%s3240_s11] sm:$0xff]  }
 0x49a   : > { %2396 = vmatpush3.bf16.msra.mxu0 %v2502_v25 }
 0x49b   : > { %1389 = vst.msk [vmem:[#allocation6] sm:$0xff] %vm1388_vm7, %v1386_v32  ;;  %2409 = vmatprep.subr.bf16.mxu0 %v2643_v1 }
 0x49c   : > { %v1581_v2 = vpop.permute.xlu0 %1580  ;;  %v1383_v45 = vpop.permute.xlu1 %1382 }
 0x49d   : > { %v1387_v50 = vadd.f32 %v1383_v45, %v1329_v40 }
 0x49f   : > { %1390 = vst.msk [vmem:[#allocation6 + $0x8] sm:$0xff] %vm1388_vm7, %v1387_v50 }
 0x4a0   : > { %v1610_v7 = vpop.permute.xlu0 %1609  ;;  %v1586_v54 = vpop.permute.xlu1 %1585 }
 0x4a2   : > { %v1492_v11 = vld [vmem:[#allocation6] sm:$0xff] }
 0x4a3   : > { %v1504_v55 = vmul.f32 %v1497_v51, %v1492_v11  ;;  %v2499_v51 = vld [vmem:[%s3239_s10 + $0x8] sm:$0xff]  }
 0x4a4   : > { %v1557_v56 = vpop.permute.xlu0 %1556  ;;  %v1615_v58 = vpop.permute.xlu1 %1614 }
 0x4a5   : > { %v1562_v59 = vadd.f32 %v1557_v56, %v1504_v55  ;;  %v2241_v55 = vld [vmem:[%s3238_s9] ss:$0 sm:$0xff] }
 0x4a6   : > { %v1493_v60 = vld [vmem:[#allocation6 + $0x8] sm:$0xff] }
 0x4a7   : > { %1565 = vst.msk [vmem:[#allocation6] sm:$0xff] %vm1564_vm8, %v1562_v59  ;;  %v1505_v62 = vmul.f32 %v1502_v61, %v1493_v60  ;;  %v2503_v60 = vld [vmem:[%s3241_s12 + $0x18] sm:$0xff]  }
 0x4a8   : > { %v1559_v63 = vpop.permute.xlu1 %1558  ;;  %v1639_v0 = vpop.permute.xlu0 %1638 }
 0x4a9   : > { %v1563_v3 = vadd.f32 %v1559_v63, %v1505_v62 }
 0x4ab   : > { %1566 = vst.msk [vmem:[#allocation6 + $0x8] sm:$0xff] %vm1564_vm8, %v1563_v3 }
 0x4ac   : > { %v1644_v43 = vpop.permute.xlu1 %1643  ;;  %v1668_v29 = vpop.permute.xlu0 %1667 }
 0x4ae   : > { %v1576_v14 = vld [vmem:[#allocation6] sm:$0xff] }
 0x4af   : > { %v1588_v17 = vmul.f32 %v1581_v2, %v1576_v14  ;;  %v1617_v20 = vmul.f32 %v1610_v7, %v1576_v14  ;;  %v1646_v27 = vmul.f32 %v1639_v0, %v1576_v14  ;;  %v1675_v31 = vmul.f32 %v1668_v29, %v1576_v14  ;;  %v2240_v7 = vld [vmem:[%s3237_s8] ss:$0 sm:$0xff] }
 0x4b0   : > { %v1673_v24 = vpop.permute.xlu1 %1672 }
 0x4b1   : > { %v2265_v48 = vpack.c.bf16 %v1588_v17, %v1588_v17  ;;  %v2267_v4 = vpack.c.bf16 %v1617_v20, %v1617_v20  ;;  %v2269_v8 = vpack.c.bf16 %v1646_v27, %v1646_v27  ;;  %v2271_v26 = vpack.c.bf16 %v1675_v31, %v1675_v31  ;;  %v2505_v17 = vld [vmem:[%s3241_s12 + $0x8] sm:$0xff]   ;;  %v2506_v20 = vld [vmem:[%s3241_s12] sm:$0xff]  }
 0x4b2   : > { %v1577_v5 = vld [vmem:[#allocation6 + $0x8] sm:$0xff] }
 0x4b3   : > { %1599 = vst.msk [vmem:[#allocation3] sm:$0xf] %vm1598_vm9, %v2265_v48  ;;  %v1589_v30 = vmul.f32 %v1586_v54, %v1577_v5  ;;  %v1618_v33 = vmul.f32 %v1615_v58, %v1577_v5  ;;  %v1647_v19 = vmul.f32 %v1644_v43, %v1577_v5  ;;  %v1676_v35 = vmul.f32 %v1673_v24, %v1577_v5  ;;  %v2504_v43 = vld [vmem:[%s3241_s12 + $0x10] sm:$0xff]  }
 0x4b4   : > { %1628 = vst.msk [vmem:[#allocation3] sm:$0xf] %vm1627_vm10, %v2267_v4 }
 0x4b5   : > { %1657 = vst.msk [vmem:[#allocation3] sm:$0xf] %vm1656_vm11, %v2269_v8  ;;  %v2266_v9 = vpack.c.bf16 %v1589_v30, %v1589_v30  ;;  %v2268_v10 = vpack.c.bf16 %v1618_v33, %v1618_v33  ;;  %v2270_v12 = vpack.c.bf16 %v1647_v19, %v1647_v19  ;;  %v2272_v13 = vpack.c.bf16 %v1676_v35, %v1676_v35 }
 0x4b6   : > { %1686 = vst.msk [vmem:[#allocation3] sm:$0xf] %vm1685_vm12, %v2271_v26 }
 0x4b7   : > { %1600 = vst.msk [vmem:[#allocation3 + $0x4] sm:$0xf] %vm1598_vm9, %v2266_v9 }
 0x4b8   : > { %1629 = vst.msk [vmem:[#allocation3 + $0x4] sm:$0xf] %vm1627_vm10, %v2268_v10 }
 0x4b9   : > { %1658 = vst.msk [vmem:[#allocation3 + $0x4] sm:$0xf] %vm1656_vm11, %v2270_v12 }
 0x4ba   : > { %1687 = vst.msk [vmem:[#allocation3 + $0x4] sm:$0xf] %vm1685_vm12, %v2272_v13 }
 0x4c1   : > { %v2498_v15 = vld [vmem:[#allocation3] sm:$0xff]  }
 0x4c2   : > { %2390 = vmatmul.mubr.msk.bf16.vlgmr.msra.gmra.mxu1 %vm652_vm1, %v2498_v15 }
 0x4c3   : > { %2405 = vmatprep.mubr.msk.bf16.mxu1 %vm2644_vm0, %v2643_v1  ;;  %2402 = vmatpush3.bf16.msra.mxu1 %v2499_v51 }
 0x4c4   : > { %2403 = vmatprep.subr.bf16.mxu1 %v2643_v1 }
 0x4c7   : > { %2404 = vmatpush3.bf16.msra.mxu1 %v2500_v52 }
 0x4ca   : > { %2406 = vmatmul.mubr.msk.bf16.vlgmr.msra.gmra.mxu1 %vm652_vm1, %v2830_v6 }
 0x582   : > { %v1748_v16 = vpop.f32.mrf.mxu1 }
 0x583   : > { %v1757_v18 = vsel %vm652_vm1, %v1748_v16, 0.0 }
 0x584   : > { %1758 = vadd.xlane.f32.xlu0 %v1757_v18  ;;  %v2391_v21 = vpop.f32.mrf.mxu1 }
 0x586   : > { %v1751_v53 = vpop.f32.mrf.mxu1 }
 0x587   : > { %v1760_v34 = vsel %vm652_vm1, %v1751_v53, 0.0 }
 0x588   : > { %1761 = vadd.xlane.f32.xlu1 %v1760_v34  ;;  %v2392_v37 = vpop.f32.mrf.mxu1 }
 0x58a   : > { %v1914_v63 = vpop.f32.mrf.mxu1 }
 0x58c   : > { %v2407_v0 = vpop.f32.mrf.mxu1 }
 0x58e   : > { %v1917_v3 = vpop.f32.mrf.mxu1 }
 0x590   : > { %v2408_v14 = vpop.f32.mrf.mxu1 }
 0x60d   : > { %v1759_v38 = vpop.xlane.xlu0 %1758 }
 0x60e   : > { %v1764_v39 = vmul.f32 0.03125, %v1759_v38 }
 0x610   : > { %v1766_v41 = vsub.f32 %v1748_v16, %v1764_v39 }
 0x611   : > { %v1762_v44 = vpop.xlane.xlu1 %1761 }
 0x612   : > { %v1765_v22 = vmul.f32 0.03125, %v1762_v44  ;;  %v1768_v42 = vmul.f32 %v1766_v41, %v1766_v41 }
 0x614   : > { %v1767_v46 = vsub.f32 %v1751_v53, %v1765_v22  ;;  %v1770_v49 = vsel %vm652_vm1, %v1768_v42, 0.0 }
 0x615   : > { %1771 = vadd.xlane.f32.xlu0 %v1770_v49  ;;  %v2253_v49 = vld [vmem:[%s3242_s13] ss:$0 sm:$0xff] }
 0x616   : > { %v1769_v23 = vmul.f32 %v1767_v46, %v1767_v46 }
 0x618   : > { %v1773_v47 = vsel %vm652_vm1, %v1769_v23, 0.0 }
 0x619   : > { %1774 = vadd.xlane.f32.xlu0 %v1773_v47  ;;  %v2254_v47 = vld [vmem:[%s3243_s14] ss:$0 sm:$0xff] }
 0x69e   : > { %v1772_v28 = vpop.xlane.xlu0 %1771 }
 0x69f   : > { %v1776_v61 = vmul.f32 0.03125, %v1772_v28 }
 0x6a1   : > { %v1778_v32 = vadd.f32 1e-05, %v1776_v61  ;;  %v2563_v61 = vld [vmem:[%s2818_s29] sm:$0xff] }
 0x6a2   : > { %v1775_v36 = vpop.xlane.xlu0 %1774 }
 0x6a3   : > { %2555 = vrsqrt.f32 %v1778_v32  ;;  %v1777_v40 = vmul.f32 0.03125, %v1775_v36 }
 0x6a5   : > { %v1779_v2 = vadd.f32 1e-05, %v1777_v40  ;;  %v2564_v40 = vld [vmem:[%s2818_s29 + $0x8] sm:$0xff] }
 0x6a7   : > { %2557 = vrsqrt.f32 %v1779_v2 }
 0x6b0   : > { %v2556_v45 = vpop.eup %2555 }
 0x6b1   : > { %v1782_v50 = vmul.f32 %v2556_v45, %v1766_v41 }
 0x6b3   : > { %v1790_v11 = vmul.f32 %v2240_v7, %v1782_v50 }
 0x6b4   : > { %v2558_v6 = vpop.eup %2557 }
 0x6b5   : > { %v1783_v54 = vmul.f32 %v2558_v6, %v1767_v46  ;;  %v1798_v58 = vadd.f32 %v2241_v55, %v1790_v11 }
 0x6b7   : > { %v1791_v56 = vmul.f32 %v2240_v7, %v1783_v54 }
 0x6b9   : > { %v1799_v59 = vadd.f32 %v2241_v55, %v1791_v56 }
 0x6bb   : > { %v1804_v62 = vpack.c.bf16 %v1799_v59, %v1798_v58 }
 0x6bd   : > { %2398 = vmatmul.mubr.msk.bf16.vlgmr.msra.gmra.mxu0 %vm652_vm1, %v1804_v62 }
 0x6be   : > { %2410 = vmatpush3.bf16.msra.mxu0 %v2503_v60  ;;  %2417 = vmatprep.mubr.msk.bf16.mxu0 %vm2644_vm0, %v2643_v1 }
 0x6bf   : > { %2411 = vmatprep.subr.bf16.mxu0 %v2643_v1 }
 0x6c2   : > { %2412 = vmatpush3.bf16.msra.mxu0 %v2504_v43 }
 0x6c3   : > { %2413 = vmatprep.subr.bf16.mxu0 %v2643_v1 }
 0x6c6   : > { %2414 = vmatpush3.bf16.msra.mxu0 %v2505_v17 }
 0x6c7   : > { %2415 = vmatprep.subr.bf16.mxu0 %v2643_v1 }
 0x6ca   : > { %2416 = vmatpush3.bf16.msra.mxu0 %v2506_v20 }
 0x77d   : > { %v1858_v27 = vpop.f32.mrf.mxu0 }
 0x77e   : > { %v1915_v31 = vadd.f32 %v1914_v63, %v1858_v27 }
 0x77f   : > { %v2399_v29 = vpop.f32.mrf.mxu0 }
 0x780   : > { %v1921_v8 = vmax.f32 %v1915_v31, 0.0 }
 0x781   : > { %v1861_v48 = vpop.f32.mrf.mxu0 }
 0x782   : > { %v1918_v4 = vadd.f32 %v1917_v3, %v1861_v48 }
 0x783   : > { %v2400_v5 = vpop.f32.mrf.mxu0 }
 0x784   : > { %v1922_v30 = vmax.f32 %v1918_v4, 0.0 }
 0x786   : > { %v1923_v33 = vpack.c.bf16 %v1922_v30, %v1921_v8 }
 0x788   : > { %2418 = vmatmul.mubr.msk.bf16.vlgmr.msra.gmra.mxu0 %vm1956_vm13, %v1923_v33 }
 0x848   : > { %v1994_v19 = vpop.f32.mrf.mxu0 }
 0x849   : > { %v2003_v24 = vsel %vm652_vm1, %v1994_v19, 0.0 }
 0x84a   : > { %2004 = vadd.xlane.f32.xlu1 %v2003_v24  ;;  %v2419_v1 = vpop.f32.mrf.mxu0 }
 0x84c   : > { %v1997_v26 = vpop.f32.mrf.mxu0 }
 0x84d   : > { %v2006_v35 = vsel %vm652_vm1, %v1997_v26, 0.0 }
 0x84e   : > { %2007 = vadd.xlane.f32.xlu0 %v2006_v35  ;;  %v2420_v9 = vpop.f32.mrf.mxu0 }
 0x8d3   : > { %v2005_v10 = vpop.xlane.xlu1 %2004 }
 0x8d4   : > { %v2009_v12 = vmul.f32 0.03125, %v2005_v10 }
 0x8d6   : > { %v2011_v13 = vsub.f32 %v1994_v19, %v2009_v12 }
 0x8d7   : > { %v2008_v15 = vpop.xlane.xlu0 %2007 }
 0x8d8   : > { %v2010_v16 = vmul.f32 0.03125, %v2008_v15  ;;  %v2013_v18 = vmul.f32 %v2011_v13, %v2011_v13 }
 0x8da   : > { %v2012_v21 = vsub.f32 %v1997_v26, %v2010_v16  ;;  %v2015_v53 = vsel %vm652_vm1, %v2013_v18, 0.0 }
 0x8db   : > { %2016 = vadd.xlane.f32.xlu1 %v2015_v53 }
 0x8dc   : > { %v2014_v34 = vmul.f32 %v2012_v21, %v2012_v21 }
 0x8de   : > { %v2018_v37 = vsel %vm652_vm1, %v2014_v34, 0.0 }
 0x8df   : > { %2019 = vadd.xlane.f32.xlu0 %v2018_v37 }
 0x964   : > { %v2017_v38 = vpop.xlane.xlu1 %2016 }
 0x965   : > { %v2021_v39 = vmul.f32 0.03125, %v2017_v38 }
 0x967   : > { %v2023_v41 = vadd.f32 1e-05, %v2021_v39 }
 0x968   : > { %v2020_v44 = vpop.xlane.xlu0 %2019 }
 0x969   : > { %2559 = vrsqrt.f32 %v2023_v41  ;;  %v2022_v22 = vmul.f32 0.03125, %v2020_v44 }
 0x96b   : > { %v2024_v42 = vadd.f32 1e-05, %v2022_v22 }
 0x96d   : > { %2561 = vrsqrt.f32 %v2024_v42 }
 0x976   : > { %v2560_v46 = vpop.eup %2559 }
 0x977   : > { %v2027_v23 = vmul.f32 %v2560_v46, %v2011_v13 }
 0x979   : > { %v2035_v51 = vmul.f32 %v2253_v49, %v2027_v23 }
 0x97a   : > { %v2562_v52 = vpop.eup %2561 }
 0x97b   : > { %v2028_v57 = vmul.f32 %v2562_v52, %v2012_v21  ;;  %v2043_v25 = vadd.f32 %v2254_v47, %v2035_v51 }
 0x97d   : > { %v2036_v28 = vmul.f32 %v2253_v49, %v2028_v57  ;;  %v2045_v32 = vadd.f32 %v2563_v61, %v2043_v25 }
 0x97f   : > { %v2044_v36 = vadd.f32 %v2254_v47, %v2036_v28  ;;  %2047 = vst.msk [vmem:[%s590_s25] sm:$0xff] %vm652_vm1, %v2045_v32 }
 0x981   : > { %v2046_v2 = vadd.f32 %v2564_v40, %v2044_v36 }
 0x983   : > { %2048 = vst.msk [vmem:[%s590_s25 + $0x8] sm:$0xff] %vm652_vm1, %v2046_v2 }
 0x984   : > { %2578 = shalt.err (!%p2575_p5)
}
 0x985   : > { %s2579_s29 = scalar_lea.hbm %s3177_s26, 256  ;;  %s2583_s22 = scalar_lea.hbm %s3244_s15, 512 }
 0x986   : > { %p2580_p6 = scmp.ne.s32.totalorder %s3177_s26, %s2579_s29  ;;  %p2584_p10 = scmp.lt.s32.totalorder %s3177_s26, %s3244_s15 }
 0x987   : > { %p2585_p11 = scmp.lt.s32.totalorder %s2583_s22, %s2579_s29 }
 0x988   : > { %p2581_p7 = pnand %p2580_p6, %p2775_p4 }
 0x989   : > { %p2586_p12 = por %p2585_p11, %p2584_p10 }
 0x98a   : > { %p2582_p9 = pneg %p2581_p7 }
 0x98c   : > { %p2587_p13 = pnand %p2586_p12, %p2582_p9 }
 0x98e   : > { %2590 = shalt.err (!%p2587_p13)
}
 0x98f   : > { %s2654_s16 = smov 128   ;;  %s3261_s20 = smov 8  }
 0x990   : > { %2421 = dma.vmem_to_hbm [thread:$0]  (%p2775_p4), %s3180_s17, 256, %s3177_s26, %s3183_s21, %s2654_s16, %s2654_s16, %s3261_s20  }
 0x991 PF: > { %p2427_p0 = scmp.ge.s32.totalorder %s2641_s23, 2  ;;  %s2080_s24 = sand.u32 1, %s2621_s18  }
 0x992   : > { %s2081_s0 = scalar_lea.sflag [#allocation8], %s2080_s24 }
 0x993   : > { %p2424_p1 = pnand %p2427_p0, %p2782_p8 }
 0x995   : > { %p2425_p2 = pneg %p2424_p1 }
 0x997   : > { %2616 = dma.done.wait (%p2425_p2), %s2081_s0, 256  }
 0x998   : > { %2618 = vsyncadd (%p2425_p2), %s2081_s0, 4294967040  ;;  %s28_s23 = sadd.s32 1, %s2641_s23   ;;  %s3262_s28 = sld [smem:[#allocation10_spill]] }
 0x999   : > { %p25_p3 = scmp.ge.s32.totalorder %s28_s23, 4   ;;  %s3263_s20 = sld [smem:[#allocation13_spill]] }
 0x99a   : > { %s3264_s21 = sld [smem:[#allocation11_spill]]  ;;  %s3266_s18 = smov %s2625_s19 }
 0x99b   : > { %s3265_s22 = sld [smem:[#allocation12_spill]]  ;;  %27 = sbr.rel (!%p25_p3) target bundleno = 7 (0x7), region = 138 }
 0x99e   : > { %s3267_s19 = smov %s3262_s28 }
 0x9a0   :  { %2086 = vsyncpa [#allocation8], 1 }
 0x9a1   :  { %2088 = vsyncpa [#allocation8 + $0x1], 1 }

// kernel: semantic_transformer_forward.9
= control target key start
LH: loop header
LB: loop body
LE: loop exit
PB: predicated region body
PF: predicated region fallthrough
CT: control target
= control target key end

     0   :  { %s2647_s18 = smov 0   ;;  %s2649_s19 = smov 0   ;;  %s3058_s0 = inlined_call_operand.vmem [shape: f32[2,16,32], index: 0, kind: input, shape index: {}, may-alias: {0,1}]   ;;  %s3059_s1 = inlined_call_operand.vmem [shape: f32[2,16,32], index: 1, kind: input, shape index: {}, may-alias: {0,1}]   ;;  %s3060_s2 = inlined_call_operand.vmem [shape: f32[2,16,1], index: 2, kind: input, shape index: {}]   ;;  %s3061_s3 = inlined_call_operand.vmem [shape: f32[2,1,16], index: 3, kind: input, shape index: {}]   ;;  %s3062_s4 = inlined_call_operand.vmem [shape: bf16[32,32], index: 4, kind: input, shape index: {}]   ;;  %s3063_s5 = inlined_call_operand.vmem [shape: bf16[32,32], index: 5, kind: input, shape index: {}]   ;;  %s3064_s6 = inlined_call_operand.vmem [shape: bf16[32,32], index: 6, kind: input, shape index: {}]   ;;  %s3065_s7 = inlined_call_operand.vmem [shape: bf16[32,32], index: 7, kind: input, shape index: {}]   ;;  %s3066_s8 = inlined_call_operand.vmem [shape: f32[1,32], index: 8, kind: input, shape index: {}]   ;;  %s3067_s9 = inlined_call_operand.vmem [shape: f32[1,32], index: 9, kind: input, shape index: {}]   ;;  %s3068_s10 = inlined_call_operand.vmem [shape: bf16[32,64], index: 10, kind: input, shape index: {}]   ;;  %s3069_s11 = inlined_call_operand.vmem [shape: bf16[32,64], index: 11, kind: input, shape index: {}]   ;;  %s3070_s12 = inlined_call_operand.vmem [shape: bf16[64,32], index: 12, kind: input, shape index: {}]   ;;  %s3071_s13 = inlined_call_operand.vmem [shape: f32[1,32], index: 13, kind: input, shape index: {}]   ;;  %s3072_s14 = inlined_call_operand.vmem [shape: f32[1,32], index: 14, kind: input, shape index: {}]   ;;  %s3073_s15 = inlined_call_operand.vmem [shape: f32[2,16,32], index: 15, kind: output, shape index: {}]  }
   0x1   :  { %s2651_s20 = smov 0  }
   0x2 LB: > { %s44_s21 = sadd.s32 1, %s2551_s19  ;;  %p2201_p0 = scmp.ge.s32.totalorder %s2555_s20, 1  ;;  %s2555_s20 = sphi %s2651_s20, %s25_s20   ;;  %s2551_s19 = sphi %s2649_s19, %s3075_s19   ;;  %s2547_s18 = sphi %s2647_s18, %s3074_s18  }
   0x3   : > { %p46_p1 = scmp.ge.s32.totalorder %s44_s21, 2  ;;  %p512_p2 = scmp.lt.s32.totalorder %s2555_s20, 3 }
   0x5   : > { %s3077_s21 = smov (%p46_p1, %s44_s21), 0  ;;  %p513_p3 = pnand %p2201_p0, %p512_p2 }
   0x6   : > { %p593_p4 = scmp.lt.s32.totalorder (!%p513_p3), %s2547_s18, 1  ;;  %s2560_s27 = smov (!%p513_p3), 112  }
   0x7   : > { %516 = sbr.rel (%p513_p3) target bundleno = 2423 (0x977), region = 80  ;;  %s2561_s28 = smov (!%p513_p3), 120  }
   0x8   : > { %s2562_s22 = smov (!%p513_p3), 104  }
   0xc   : > { %v2457_v0 = vld [vmem:[%s3062_s4 + $0x8] sm:$0xff]   ;;  %v2557_v1 = vmov 0.0   ;;  %v2458_v2 = vld [vmem:[%s3062_s4] sm:$0xff]   ;;  %vm2558_vm0 = vmmov 0   ;;  %vm662_vm1 = vcmask 261120   ;;  %s3079_s18 = smov (!%p593_p4, %s2547_s18), 1 }
   0xd   : > { %2313 = vmatprep.subr.bf16.mxu1 %v2557_v1  ;;  %2329 = vmatprep.subr.bf16.mxu0 %v2557_v1  ;;  %735 = vst.msk [vmem:[#allocation6] sm:$0xff] %vm662_vm1, %v2557_v1  ;;  %736 = vst.msk [vmem:[#allocation6 + $0x8] sm:$0xff] %vm662_vm1, %v2557_v1  ;;  %s2685_s26 = sshll.u32 %s3079_s18, 4  ;;  %v2459_v3 = vld [vmem:[%s3063_s5 + $0x8] sm:$0xff]   ;;  %v2460_v7 = vld [vmem:[%s3063_s5] sm:$0xff]   ;;  %v2559_v11 = vmov 0  }
   0xe   : > { %2314 = vmatpush3.bf16.msra.mxu1 %v2457_v0  ;;  %2317 = vmatprep.mubr.msk.bf16.mxu1 %vm2558_vm0, %v2557_v1  ;;  %s2694_s16 = scalar_lea.vmem %s3058_s0, %s2685_s26  ;;  %s610_s23 = scalar_lea.vmem %s3059_s1, %s2685_s26  ;;  %vm715_vm2 = vcmask 257024   ;;  %vm888_vm3 = vcmask 64512   ;;  %v2462_v27 = vld [vmem:[%s3064_s6 + $0x8] sm:$0xff]   ;;  %v2463_v28 = vld [vmem:[%s3064_s6] sm:$0xff]   ;;  %vm938_vm4 = vcmask 130048   ;;  %vm718_vm5 = vcmask 7168  }
   0xf   : > { %2315 = vmatprep.subr.bf16.mxu1 %v2557_v1  ;;  %2333 = vmatprep.mubr.msk.bf16.mxu0 %vm2558_vm0, %v2557_v1  ;;  %v639_v4 = vld [vmem:[%s2694_s16] sm:$0xff]  ;;  %v640_v5 = vld [vmem:[%s2694_s16 + $0x8] sm:$0xff]  ;;  %s620_s17 = scalar_lea.vmem %s3060_s2, %s2685_s26  ;;  %v2563_v50 = vmov -1e+30   ;;  %727 = vst.msk [vmem:[#allocation5] sm:$0xff] %vm718_vm5, %v2557_v1  ;;  %728 = vst.msk [vmem:[#allocation5 + $0x8] sm:$0xff] %vm718_vm5, %v2557_v1 }
  0x10   : > { %v2703_v6 = vpack.c.bf16 %v640_v5, %v639_v4  ;;  %v737_v8 = vld [vmem:[%s610_s23] sm:$0xff]  ;;  %v738_v9 = vld [vmem:[%s610_s23 + $0x8] sm:$0xff]  ;;  %2455 = vset.pattern.permute.xlu0 %v2559_v11  ;;  %2456 = vset.pattern.permute.xlu1 %v2559_v11  ;;  %s627_s23 = scalar_lea.vmem %s3061_s3, %s3079_s18  ;;  %719 = vst.msk [vmem:[#allocation4] sm:$0xff] %vm718_vm5, %v2563_v50  ;;  %720 = vst.msk [vmem:[#allocation4 + $0x8] sm:$0xff] %vm718_vm5, %v2563_v50  ;;  %s2564_s18 = smov 8   ;;  %vm1222_vm6 = vcmask 130112  }
  0x11   : > { %v739_v10 = vpack.c.bf16 %v738_v9, %v737_v8  ;;  %v860_v25 = vld [vmem:[%s620_s17] sm:$0xff]  ;;  %v861_v26 = vld [vmem:[%s620_s17 + $0x8] sm:$0xff]  ;;  %2330 = vmatpush3.bf16.msra.mxu0 %v2462_v27  ;;  %721 = vst.msk [vmem:[#allocation4 + $0x10] sm:$0xff] %vm718_vm5, %v2563_v50  ;;  %722 = vst.msk [vmem:[#allocation4 + $0x18] sm:$0xff] %vm718_vm5, %v2563_v50  ;;  %vm1398_vm7 = vcmask 195712   ;;  %vm1574_vm8 = vcmask 261312  }
  0x12   : > { %2316 = vmatpush3.bf16.msra.mxu1 %v2458_v2  ;;  %2331 = vmatprep.subr.bf16.mxu0 %v2557_v1  ;;  %v2221_v38 = vld [vmem:[%s627_s23] ss:$0 sm:$0xff]  ;;  %723 = vst.msk [vmem:[#allocation4 + $0x20] sm:$0xff] %vm718_vm5, %v2563_v50  ;;  %724 = vst.msk [vmem:[#allocation4 + $0x28] sm:$0xff] %vm718_vm5, %v2563_v50  ;;  %vm1608_vm9 = vcmask 60416   ;;  %vm1637_vm10 = vcmask 126016  }
  0x13   : > { %2321 = vmatprep.subr.bf16.mxu1 %v2557_v1  ;;  %725 = vst.msk [vmem:[#allocation4 + $0x30] sm:$0xff] %vm718_vm5, %v2563_v50  ;;  %726 = vst.msk [vmem:[#allocation4 + $0x38] sm:$0xff] %vm718_vm5, %v2563_v50  ;;  %vm1666_vm11 = vcmask 191616   ;;  %vm1695_vm12 = vcmask 257216   ;;  %vm1966_vm13 = vcmask 523264  }
  0x14   : > { %729 = vst.msk [vmem:[#allocation5 + $0x10] sm:$0xff] %vm718_vm5, %v2557_v1  ;;  %730 = vst.msk [vmem:[#allocation5 + $0x18] sm:$0xff] %vm718_vm5, %v2557_v1 }
  0x15   : > { %2318 = vmatmul.mubr.msk.bf16.vlgmr.msra.gmra.mxu1 %vm662_vm1, %v2703_v6  ;;  %2332 = vmatpush3.bf16.msra.mxu0 %v2463_v28  ;;  %731 = vst.msk [vmem:[#allocation5 + $0x20] sm:$0xff] %vm718_vm5, %v2557_v1  ;;  %732 = vst.msk [vmem:[#allocation5 + $0x28] sm:$0xff] %vm718_vm5, %v2557_v1 }
  0x16   : > { %2322 = vmatpush3.bf16.msra.mxu1 %v2459_v3  ;;  %2325 = vmatprep.mubr.msk.bf16.mxu1 %vm2558_vm0, %v2557_v1  ;;  %733 = vst.msk [vmem:[#allocation5 + $0x30] sm:$0xff] %vm718_vm5, %v2557_v1  ;;  %734 = vst.msk [vmem:[#allocation5 + $0x38] sm:$0xff] %vm718_vm5, %v2557_v1 }
  0x17   : > { %2323 = vmatprep.subr.bf16.mxu1 %v2557_v1  ;;  %2343 = vmatprep.subr.bf16.mxu0 %v2557_v1 }
  0x18   : > { %2334 = vmatmul.mubr.msk.bf16.vlgmr.msra.gmra.mxu0 %vm662_vm1, %v739_v10  ;;  %v2839_v27 = vld [vmem:[#allocation4 + $0x10] sm:$0xff] }
  0x19   : > { %2345 = vmatprep.mubr.msk.bf16.mxu0 %vm2558_vm0, %v2557_v1 }
  0x1a   : > { %2324 = vmatpush3.bf16.msra.mxu1 %v2460_v7 }
  0x1b   : > { %2337 = vmatprep.subr.bf16.mxu1 %v2557_v1 }
  0x1d   : > { %2326 = vmatmul.mubr.msk.bf16.vlgmr.msra.gmra.mxu1 %vm662_vm1, %v739_v10 }
  0x1e   : > { %2339 = vmatprep.mubr.msk.bf16.mxu1 %vm2558_vm0, %v2557_v1 }
  0xd5   : > { %v700_v12 = vpop.f32.mrf.mxu1 }
  0xd6   : > { %v2264_v13 = vpack.c.bf16 %v700_v12, %v700_v12 }
  0xd7   : > { %v2319_v14 = vpop.f32.mrf.mxu1 }
  0xd8   : > { %716 = vst.msk [vmem:[#allocation2] sm:$0xf] %vm715_vm2, %v2264_v13  ;;  %v2818_v14 = vld [vmem:[#allocation4] sm:$0xff] }
  0xd9   : > { %v703_v15 = vpop.f32.mrf.mxu1 }
  0xda   : > { %v2265_v16 = vpack.c.bf16 %v703_v15, %v703_v15  ;;  %v852_v15 = vpop.f32.mrf.mxu0 }
  0xdb   : > { %v2320_v17 = vpop.f32.mrf.mxu1 }
  0xdc   : > { %717 = vst.msk [vmem:[#allocation2 + $0x4] sm:$0xf] %vm715_vm2, %v2265_v16 }
  0xdd   : > { %v794_v18 = vpop.f32.mrf.mxu1 }
  0xdf   : > { %v2327_v19 = vpop.f32.mrf.mxu1 }
  0xe0   : > { %v2823_v19 = vld [vmem:[#allocation4 + $0x8] sm:$0xff] }
  0xe1   : > { %v797_v20 = vpop.f32.mrf.mxu1 }
  0xe2   : > { %v801_v21 = vpack.c.bf16 %v797_v20, %v794_v18  ;;  %v2335_v18 = vpop.f32.mrf.mxu0 }
  0xe3   : > { %v2328_v22 = vpop.f32.mrf.mxu1  ;;  %v2461_v24 = vld [vmem:[#allocation2] sm:$0xff]  }
  0xe4   : > { %1229 = vrot.lane.b32.xlu1 %v801_v21, %s2560_s27  ;;  %1052 = vrot.lane.b32.xlu0 %v801_v21, %s2561_s28  ;;  %v893_v23 = vsel %vm888_vm3, %v801_v21, 0 }
  0xe5   : > { %2338 = vmatpush3.bf16.xpose.msra.mxu1 %v893_v23 }
  0xe6   : > { %2349 = vmatprep.subr.bf16.mxu1 %v2557_v1 }
  0xe8   : > { %1227 = vrot.lane.b32.xlu1 %v2461_v24, %s2560_s27  ;;  %1049 = vrot.lane.b32.xlu0 %v2461_v24, %s2561_s28 }
  0xec   : > { %1403 = vrot.lane.b32.xlu1 %v2461_v24, %s2562_s22  ;;  %1405 = vrot.lane.b32.xlu0 %v801_v21, %s2562_s22  ;;  %v855_v21 = vpop.f32.mrf.mxu0 }
  0xed   : > { %2340 = vmatmul.mubr.msk.bf16.vlgmr.msra.gmra.mxu1 %vm888_vm3, %v2461_v24  ;;  %v859_v23 = vpack.c.bf16 %v855_v21, %v852_v15 }
  0xee   : > { %2351 = vmatprep.mubr.msk.bf16.mxu1 %vm2558_vm0, %v2557_v1 }
  0xef   : > { %2344 = vmatpush3.bf16.msra.mxu0 %v859_v23 }
  0xf0   : > { %865 = vperm.xlu0 %2455, %v860_v25   ;;  %870 = vperm.xlu1 %2456, %v861_v26   ;;  %v2336_v25 = vpop.f32.mrf.mxu0 }
  0xf1   : > { %2355 = vmatprep.subr.bf16.mxu0 %v2557_v1 }
 0x156   : > { %v1053_v29 = vpop.permute.xlu0 %1052  ;;  %v1230_v31 = vpop.permute.xlu1 %1229 }
 0x157   : > { %v1058_v30 = vsel %vm888_vm3, %v1053_v29, 0  ;;  %v1235_v33 = vsel %vm888_vm3, %v1230_v31, 0 }
 0x158   : > { %2350 = vmatpush3.bf16.xpose.msra.mxu1 %v1058_v30  ;;  %v2844_v30 = vld [vmem:[#allocation4 + $0x18] sm:$0xff] }
 0x159   : > { %2361 = vmatprep.subr.bf16.mxu1 %v2557_v1 }
 0x15a   : > { %v1050_v32 = vpop.permute.xlu0 %1049  ;;  %v1228_v35 = vpop.permute.xlu1 %1227 }
 0x15e   : > { %v1406_v34 = vpop.permute.xlu0 %1405  ;;  %v1404_v37 = vpop.permute.xlu1 %1403 }
 0x15f   : > { %2352 = vmatmul.mubr.msk.bf16.vlgmr.msra.gmra.mxu1 %vm888_vm3, %v1050_v32  ;;  %v1411_v36 = vsel %vm888_vm3, %v1406_v34, 0  ;;  %v2854_v34 = vld [vmem:[#allocation4 + $0x20] sm:$0xff] }
 0x160   : > { %2362 = vmatpush3.bf16.xpose.msra.mxu1 %v1235_v33  ;;  %2363 = vmatprep.mubr.msk.bf16.mxu1 %vm2558_vm0, %v2557_v1 }
 0x161   : > { %2373 = vmatprep.subr.bf16.mxu1 %v2557_v1 }
 0x167   : > { %2364 = vmatmul.mubr.msk.bf16.vlgmr.msra.gmra.mxu1 %vm888_vm3, %v1228_v35 }
 0x168   : > { %2374 = vmatpush3.bf16.xpose.msra.mxu1 %v1411_v36  ;;  %2375 = vmatprep.mubr.msk.bf16.mxu1 %vm2558_vm0, %v2557_v1 }
 0x169   : > { %2385 = vmatprep.subr.bf16.mxu1 %v2557_v1 }
 0x16b   : > { %v866_v39 = vpop.permute.xlu0 %865  ;;  %v871_v41 = vpop.permute.xlu1 %870 }
 0x16c   : > { %v879_v40 = vmul.f32 %v2221_v38, %v866_v39  ;;  %v880_v44 = vmul.f32 %v2221_v38, %v871_v41  ;;  %v2864_v38 = vld [vmem:[#allocation4 + $0x28] sm:$0xff] }
 0x16f   : > { %2376 = vmatmul.mubr.msk.bf16.vlgmr.msra.gmra.mxu1 %vm888_vm3, %v1404_v37 }
 0x170   : > { %2389 = vmatprep.mubr.msk.bf16.mxu1 %vm2558_vm0, %v2557_v1 }
 0x1ad   : > { %v929_v42 = vpop.f32.mrf.mxu1 }
 0x1ae   : > { %v2762_v43 = vadd.f32 %v929_v42, %v879_v40  ;;  %v2874_v42 = vld [vmem:[#allocation4 + $0x30] sm:$0xff] }
 0x1af   : > { %v2341_v45 = vpop.f32.mrf.mxu1 }
 0x1b0   : > { %v939_v46 = vsel %vm938_vm4, %v2762_v43, -inf }
 0x1b1   : > { %940 = vmax.xlane.f32.xlu1 %v939_v46  ;;  %v932_v47 = vpop.f32.mrf.mxu1 }
 0x1b2   : > { %v2766_v48 = vadd.f32 %v932_v47, %v880_v44  ;;  %v2885_v47 = vld [vmem:[#allocation4 + $0x38] sm:$0xff] }
 0x1b3   : > { %v2342_v49 = vpop.f32.mrf.mxu1 }
 0x1b4   : > { %v942_v51 = vsel %vm938_vm4, %v2766_v48, -inf }
 0x1b5   : > { %943 = vmax.xlane.f32.xlu0 %v942_v51 }
 0x21f   : > { %v1094_v52 = vpop.f32.mrf.mxu1 }
 0x220   : > { %v2794_v53 = vadd.f32 %v1094_v52, %v879_v40 }
 0x221   : > { %v2353_v54 = vpop.f32.mrf.mxu1 }
 0x222   : > { %v1104_v55 = vsel %vm938_vm4, %v2794_v53, -inf }
 0x223   : > { %1105 = vmax.xlane.f32.xlu0 %v1104_v55  ;;  %v1097_v56 = vpop.f32.mrf.mxu1 }
 0x224   : > { %v2798_v57 = vadd.f32 %v1097_v56, %v880_v44 }
 0x225   : > { %v2354_v58 = vpop.f32.mrf.mxu1 }
 0x226   : > { %v1107_v59 = vsel %vm938_vm4, %v2798_v57, -inf }
 0x227   : > { %1108 = vmax.xlane.f32.xlu1 %v1107_v59  ;;  %v1271_v60 = vpop.f32.mrf.mxu1 }
 0x228   : > { %v2802_v61 = vadd.f32 %v1271_v60, %v879_v40 }
 0x229   : > { %v2365_v62 = vpop.f32.mrf.mxu1 }
 0x22a   : > { %v1281_v63 = vsel %vm938_vm4, %v2802_v61, -inf }
 0x22b   : > { %1282 = vmax.xlane.f32.xlu0 %v1281_v63  ;;  %v1274_v0 = vpop.f32.mrf.mxu1 }
 0x22c   : > { %v2806_v2 = vadd.f32 %v1274_v0, %v880_v44 }
 0x22d   : > { %v2366_v3 = vpop.f32.mrf.mxu1 }
 0x22e   : > { %v1284_v4 = vsel %vm938_vm4, %v2806_v2, -inf }
 0x22f   : > { %1285 = vmax.xlane.f32.xlu1 %v1284_v4  ;;  %v1447_v5 = vpop.f32.mrf.mxu1 }
 0x230   : > { %v2810_v7 = vadd.f32 %v1447_v5, %v879_v40 }
 0x231   : > { %v2377_v8 = vpop.f32.mrf.mxu1 }
 0x232   : > { %v1457_v9 = vsel %vm938_vm4, %v2810_v7, -inf }
 0x233   : > { %1458 = vmax.xlane.f32.xlu0 %v1457_v9  ;;  %v1450_v10 = vpop.f32.mrf.mxu1 }
 0x234   : > { %v2814_v11 = vadd.f32 %v1450_v10, %v880_v44 }
 0x235   : > { %v2378_v12 = vpop.f32.mrf.mxu1 }
 0x236   : > { %v1460_v13 = vsel %vm938_vm4, %v2814_v11, -inf }
 0x237   : > { %1461 = vmax.xlane.f32.xlu1 %v1460_v13 }
 0x23a   : > { %v941_v16 = vpop.xlane.xlu1 %940 }
 0x23b   : > { %v2821_v17 = vmax.f32 %v2818_v14, %v941_v16 }
 0x23d   : > { %v947_v20 = vsub.f32 %v2818_v14, %v2821_v17  ;;  %1047 = vst.msk [vmem:[#allocation4] sm:$0xff] %vm718_vm5, %v2821_v17 }
 0x23e   : > { %v944_v22 = vpop.xlane.xlu0 %943 }
 0x23f   : > { %v2830_v24 = vmax.f32 %v2823_v19, %v944_v22 }
 0x241   : > { %v948_v26 = vsub.f32 %v2823_v19, %v2830_v24  ;;  %1048 = vst.msk [vmem:[#allocation4 + $0x8] sm:$0xff] %vm718_vm5, %v2830_v24 }
 0x248   : > { %960 = vperm.xlu1 %2456, %v2830_v24  }
 0x249   : > { %955 = vperm.xlu0 %2455, %v2821_v17   ;;  %v951_v17 = vmul.f32 1.442695, %v948_v26 }
 0x2ac   : > { %v1106_v28 = vpop.xlane.xlu0 %1105 }
 0x2ad   : > { %v2842_v29 = vmax.f32 %v2839_v27, %v1106_v28 }
 0x2af   : > { %v1112_v31 = vsub.f32 %v2839_v27, %v2842_v29  ;;  %1225 = vst.msk [vmem:[#allocation4 + $0x10] sm:$0xff] %vm718_vm5, %v2842_v29  ;;  %1120 = vperm.xlu1 %2456, %v2842_v29  }
 0x2b0   : > { %v1109_v32 = vpop.xlane.xlu1 %1108 }
 0x2b1   : > { %v2852_v33 = vmax.f32 %v2844_v30, %v1109_v32 }
 0x2b3   : > { %v1113_v35 = vsub.f32 %v2844_v30, %v2852_v33  ;;  %1226 = vst.msk [vmem:[#allocation4 + $0x18] sm:$0xff] %vm718_vm5, %v2852_v33  ;;  %1125 = vperm.xlu0 %2455, %v2852_v33   ;;  %v970_v30 = vld [vmem:[#allocation5 + $0x8] sm:$0xff] }
 0x2b4   : > { %v1283_v36 = vpop.xlane.xlu0 %1282 }
 0x2b5   : > { %v2862_v37 = vmax.f32 %v2854_v34, %v1283_v36  ;;  %v1116_v14 = vmul.f32 1.442695, %v1113_v35 }
 0x2b7   : > { %v1289_v39 = vsub.f32 %v2854_v34, %v2862_v37  ;;  %1401 = vst.msk [vmem:[#allocation4 + $0x20] sm:$0xff] %vm718_vm5, %v2862_v37  ;;  %1297 = vperm.xlu1 %2456, %v2862_v37   ;;  %v1136_v34 = vld [vmem:[#allocation5 + $0x18] sm:$0xff] }
 0x2b8   : > { %v1286_v40 = vpop.xlane.xlu1 %1285 }
 0x2b9   : > { %v2872_v41 = vmax.f32 %v2864_v38, %v1286_v40 }
 0x2bb   : > { %v1290_v44 = vsub.f32 %v2864_v38, %v2872_v41  ;;  %1402 = vst.msk [vmem:[#allocation4 + $0x28] sm:$0xff] %vm718_vm5, %v2872_v41  ;;  %1302 = vperm.xlu0 %2455, %v2872_v41   ;;  %1165 = vrot.lane.b32.xlu1 %v859_v23, %s2561_s28  ;;  %s2566_s28 = smov 24  }
 0x2bc   : > { %v1459_v45 = vpop.xlane.xlu0 %1458 }
 0x2bd   : > { %v2883_v46 = vmax.f32 %v2874_v42, %v1459_v45 }
 0x2bf   : > { %v1465_v49 = vsub.f32 %v2874_v42, %v2883_v46  ;;  %1577 = vst.msk [vmem:[#allocation4 + $0x30] sm:$0xff] %vm718_vm5, %v2883_v46  ;;  %1473 = vperm.xlu0 %2455, %v2883_v46  }
 0x2c0   : > { %v1462_v50 = vpop.xlane.xlu1 %1461 }
 0x2c1   : > { %v2893_v51 = vmax.f32 %v2885_v47, %v1462_v50 }
 0x2c3   : > { %v1466_v52 = vsub.f32 %v2885_v47, %v2893_v51  ;;  %1578 = vst.msk [vmem:[#allocation4 + $0x38] sm:$0xff] %vm718_vm5, %v2893_v51  ;;  %1341 = vrot.lane.b32.xlu0 %v859_v23, %s2560_s27  ;;  %1478 = vperm.xlu1 %2456, %v2893_v51   ;;  %s2565_s27 = smov 16  }
 0x2c4   : > { %v956_v54 = vpop.permute.xlu0 %955  ;;  %v961_v55 = vpop.permute.xlu1 %960 }
 0x2c5   : > { %v963_v56 = vsub.f32 %v2762_v43, %v956_v54  ;;  %v964_v58 = vsub.f32 %v2766_v48, %v961_v55 }
 0x2c7   : > { %v965_v59 = vmul.f32 1.442695, %v963_v56  ;;  %v967_v60 = vmul.f32 1.442695, %v964_v58  ;;  %1517 = vrot.lane.b32.xlu1 %v859_v23, %s2562_s22  ;;  %s636_s22 = scalar_lea.vmem %s3073_s15, %s2685_s26 }
 0x2c9   : > { %2475 = vpow2.f32 %v965_v59 }
 0x2ca   : > { %2477 = vpow2.f32 %v967_v60  ;;  %v949_v60 = vmul.f32 1.442695, %v947_v20 }
 0x2d6   : > { %v2476_v62 = vpop.eup %2475 }
 0x2d7   : > { %v2478_v63 = vpop.eup %2477  ;;  %v973_v3 = vsel %vm938_vm4, %v2476_v62, 0.0 }
 0x2d8   : > { %v998_v0 = vpack.c.bf16 %v2478_v63, %v2476_v62  ;;  %v976_v43 = vsel %vm938_vm4, %v2478_v63, 0.0 }
 0x2da   : > { %2346 = vmatmul.mubr.msk.bf16.vlgmr.msra.gmra.mxu0 %vm938_vm4, %v998_v0  ;;  %v1114_v0 = vmul.f32 1.442695, %v1112_v31 }
 0x2db   : > { %2357 = vmatprep.mubr.msk.bf16.mxu0 %vm2558_vm0, %v2557_v1 }
 0x2e2   : > { %974 = vadd.xlane.f32.xlu0 %v973_v3 }
 0x2eb   : > { %977 = vadd.xlane.f32.xlu1 %v976_v43 }
 0x32a   : > { %v1121_v48 = vpop.permute.xlu1 %1120 }
 0x32b   : > { %v1128_v4 = vsub.f32 %v2794_v53, %v1121_v48  ;;  %v969_v48 = vld [vmem:[#allocation5] sm:$0xff] }
 0x32d   : > { %v1130_v5 = vmul.f32 1.442695, %v1128_v4 }
 0x32e   : > { %v1126_v8 = vpop.permute.xlu0 %1125 }
 0x32f   : > { %2479 = vpow2.f32 %v1130_v5  ;;  %v1129_v9 = vsub.f32 %v2798_v57, %v1126_v8 }
 0x331   : > { %v1132_v10 = vmul.f32 1.442695, %v1129_v9 }
 0x332   : > { %v1298_v12 = vpop.permute.xlu1 %1297 }
 0x333   : > { %2481 = vpow2.f32 %v1132_v10  ;;  %v1305_v13 = vsub.f32 %v2802_v61, %v1298_v12  ;;  %v1291_v12 = vmul.f32 1.442695, %v1289_v39 }
 0x335   : > { %v1307_v15 = vmul.f32 1.442695, %v1305_v13  ;;  %v1293_v13 = vmul.f32 1.442695, %v1290_v44  ;;  %v1312_v44 = vld [vmem:[#allocation5 + $0x20] sm:$0xff] }
 0x336   : > { %v1303_v16 = vpop.permute.xlu0 %1302  ;;  %v1166_v18 = vpop.permute.xlu1 %1165 }
 0x337   : > { %2483 = vpow2.f32 %v1307_v15  ;;  %v1306_v21 = vsub.f32 %v2806_v2, %v1303_v16  ;;  %2356 = vmatpush3.bf16.msra.mxu0 %v1166_v18  ;;  %v1467_v15 = vmul.f32 1.442695, %v1465_v49  ;;  %v1135_v16 = vld [vmem:[#allocation5 + $0x10] sm:$0xff]  ;;  %v1469_v18 = vmul.f32 1.442695, %v1466_v52 }
 0x338   : > { %2367 = vmatprep.subr.bf16.mxu0 %v2557_v1 }
 0x339   : > { %v1309_v53 = vmul.f32 1.442695, %v1306_v21 }
 0x33a   : > { %v1474_v22 = vpop.permute.xlu0 %1473 }
 0x33b   : > { %2485 = vpow2.f32 %v1309_v53  ;;  %v1481_v23 = vsub.f32 %v2810_v7, %v1474_v22 }
 0x33c   : > { %v2480_v57 = vpop.eup %2479 }
 0x33d   : > { %v1483_v25 = vmul.f32 1.442695, %v1481_v23  ;;  %v1139_v28 = vsel %vm938_vm4, %v2480_v57, 0.0  ;;  %v1313_v23 = vld [vmem:[#allocation5 + $0x28] sm:$0xff] }
 0x33e   : > { %1140 = vadd.xlane.f32.xlu0 %v1139_v28  ;;  %v1479_v61 = vpop.permute.xlu1 %1478  ;;  %v1342_v50 = vpop.permute.xlu0 %1341 }
 0x33f   : > { %2487 = vpow2.f32 %v1483_v25  ;;  %v1482_v32 = vsub.f32 %v2814_v11, %v1479_v61  ;;  %v1488_v25 = vld [vmem:[#allocation5 + $0x30] sm:$0xff] }
 0x340   : > { %v2482_v36 = vpop.eup %2481 }
 0x341   : > { %v1485_v40 = vmul.f32 1.442695, %v1482_v32  ;;  %v1142_v2 = vsel %vm938_vm4, %v2482_v36, 0.0  ;;  %v1163_v45 = vpack.c.bf16 %v2482_v36, %v2480_v57 }
 0x342   : > { %1143 = vadd.xlane.f32.xlu0 %v1142_v2  ;;  %v1518_v58 = vpop.permute.xlu1 %1517 }
 0x343   : > { %2489 = vpow2.f32 %v1485_v40  ;;  %2358 = vmatmul.mubr.msk.bf16.vlgmr.msra.gmra.mxu0 %vm938_vm4, %v1163_v45  ;;  %v1489_v40 = vld [vmem:[#allocation5 + $0x38] sm:$0xff]  ;;  %v984_v45 = vld [vmem:[#allocation6] sm:$0xff] }
 0x344   : > { %v2484_v7 = vpop.eup %2483  ;;  %2368 = vmatpush3.bf16.msra.mxu0 %v1342_v50  ;;  %2369 = vmatprep.mubr.msk.bf16.mxu0 %vm2558_vm0, %v2557_v1  ;;  %2491 = vpow2.f32 %v949_v60 }
 0x345   : > { %v1316_v54 = vsel %vm938_vm4, %v2484_v7, 0.0  ;;  %2379 = vmatprep.subr.bf16.mxu0 %v2557_v1  ;;  %2493 = vpow2.f32 %v1114_v0 }
 0x346   : > { %1317 = vadd.xlane.f32.xlu1 %v1316_v54  ;;  %2495 = vpow2.f32 %v1116_v14 }
 0x347   : > { %2497 = vpow2.f32 %v951_v17 }
 0x348   : > { %v2486_v11 = vpop.eup %2485  ;;  %2499 = vpow2.f32 %v1291_v12 }
 0x349   : > { %v1319_v55 = vsel %vm938_vm4, %v2486_v11, 0.0  ;;  %v1340_v56 = vpack.c.bf16 %v2486_v11, %v2484_v7  ;;  %2501 = vpow2.f32 %v1293_v13 }
 0x34a   : > { %1320 = vadd.xlane.f32.xlu0 %v1319_v55  ;;  %2503 = vpow2.f32 %v1467_v15 }
 0x34b   : > { %2370 = vmatmul.mubr.msk.bf16.vlgmr.msra.gmra.mxu0 %vm938_vm4, %v1340_v56  ;;  %2505 = vpow2.f32 %v1469_v18 }
 0x34c   : > { %v2488_v59 = vpop.eup %2487  ;;  %2380 = vmatpush3.bf16.msra.mxu0 %v1518_v58  ;;  %2381 = vmatprep.mubr.msk.bf16.mxu0 %vm2558_vm0, %v2557_v1  ;;  %v985_v58 = vld [vmem:[#allocation6 + $0x8] sm:$0xff] }
 0x34d   : > { %v1492_v62 = vsel %vm938_vm4, %v2488_v59, 0.0  ;;  %2393 = vmatprep.subr.bf16.mxu0 %v2557_v1 }
 0x34e   : > { %1493 = vadd.xlane.f32.xlu1 %v1492_v62 }
 0x350   : > { %v2490_v63 = vpop.eup %2489 }
 0x351   : > { %v1495_v3 = vsel %vm938_vm4, %v2490_v63, 0.0  ;;  %v1516_v43 = vpack.c.bf16 %v2490_v63, %v2488_v59  ;;  %v2492_v20 = vpop.eup %2491 }
 0x352   : > { %1496 = vadd.xlane.f32.xlu0 %v1495_v3  ;;  %v2494_v27 = vpop.eup %2493  ;;  %v971_v4 = vmul.f32 %v2492_v20, %v969_v48 }
 0x353   : > { %2382 = vmatmul.mubr.msk.bf16.vlgmr.msra.gmra.mxu0 %vm938_vm4, %v1516_v43  ;;  %v2496_v29 = vpop.eup %2495  ;;  %v1137_v21 = vmul.f32 %v2494_v27, %v1135_v16 }
 0x354   : > { %2397 = vmatprep.mubr.msk.bf16.mxu0 %vm2558_vm0, %v2557_v1  ;;  %v2498_v31 = vpop.eup %2497  ;;  %v1138_v38 = vmul.f32 %v2496_v29, %v1136_v34  ;;  %v2465_v34 = vld [vmem:[%s3065_s7] sm:$0xff]  }
 0x355   : > { %v972_v33 = vmul.f32 %v2498_v31, %v970_v30  ;;  %v2500_v39 = vpop.eup %2499 }
 0x356   : > { %v1314_v42 = vmul.f32 %v2500_v39, %v1312_v44  ;;  %v2502_v46 = vpop.eup %2501 }
 0x357   : > { %v1315_v51 = vmul.f32 %v2502_v46, %v1313_v23  ;;  %v2504_v52 = vpop.eup %2503 }
 0x358   : > { %v1490_v61 = vmul.f32 %v2504_v52, %v1488_v25  ;;  %v2506_v32 = vpop.eup %2505 }
 0x359   : > { %v1491_v50 = vmul.f32 %v2506_v32, %v1489_v40 }
 0x35f   : > { %988 = vperm.xlu1 %2456, %v2492_v20  }
 0x363   : > { %1153 = vperm.xlu1 %2456, %v2494_v27  }
 0x367   : > { %1158 = vperm.xlu1 %2456, %v2496_v29  }
 0x368   : > { %993 = vperm.xlu0 %2455, %v2498_v31  }
 0x36b   : > { %v975_v5 = vpop.xlane.xlu0 %974 }
 0x36c   : > { %v979_v8 = vadd.f32 %v975_v5, %v971_v4 }
 0x36e   : > { %982 = vst.msk [vmem:[#allocation5] sm:$0xff] %vm718_vm5, %v979_v8 }
 0x374   : > { %v978_v19 = vpop.xlane.xlu1 %977 }
 0x375   : > { %v980_v24 = vadd.f32 %v978_v19, %v972_v33  ;;  %v1582_v0 = vld [vmem:[#allocation5] sm:$0xff] }
 0x376   : > { %2507 = vrcp.f32 %v1582_v0 }
 0x377   : > { %983 = vst.msk [vmem:[#allocation5 + $0x8] sm:$0xff] %vm718_vm5, %v980_v24 }
 0x37e   : > { %v1583_v43 = vld [vmem:[#allocation5 + $0x8] sm:$0xff] }
 0x37f   : > { %2509 = vrcp.f32 %v1583_v43 }
 0x383   : > { %v2508_v30 = vpop.eup %2507 }
 0x39a   : > { %v1036_v26 = vpop.f32.mrf.mxu0 }
 0x39c   : > { %v2347_v35 = vpop.f32.mrf.mxu0 }
 0x39e   : > { %v1039_v9 = vpop.f32.mrf.mxu0 }
 0x3a0   : > { %v2348_v10 = vpop.f32.mrf.mxu0 }
 0x3c7   : > { %v1141_v53 = vpop.xlane.xlu0 %1140 }
 0x3c8   : > { %v1145_v37 = vadd.f32 %v1141_v53, %v1137_v21  ;;  %v2464_v53 = vld [vmem:[%s3065_s7 + $0x8] sm:$0xff]  }
 0x3c9   : > { %2386 = vmatpush3.bf16.msra.mxu1 %v2464_v53 }
 0x3ca   : > { %1147 = vst.msk [vmem:[#allocation5 + $0x10] sm:$0xff] %vm718_vm5, %v1145_v37  ;;  %2387 = vmatprep.subr.bf16.mxu1 %v2557_v1 }
 0x3cb   : > { %v1144_v41 = vpop.xlane.xlu0 %1143 }
 0x3cc   : > { %v1146_v22 = vadd.f32 %v1144_v41, %v1138_v38 }
 0x3cd   : > { %2388 = vmatpush3.bf16.msra.mxu1 %v2465_v34 }
 0x3ce   : > { %1148 = vst.msk [vmem:[#allocation5 + $0x18] sm:$0xff] %vm718_vm5, %v1146_v22  ;;  %2401 = vmatprep.subr.bf16.mxu1 %v2557_v1 }
 0x3cf   : > { %v1318_v49 = vpop.xlane.xlu1 %1317 }
 0x3d0   : > { %v1322_v47 = vadd.f32 %v1318_v49, %v1314_v42 }
 0x3d1   : > { %v1611_v17 = vld [vmem:[#allocation5 + $0x10] sm:$0xff] }
 0x3d2   : > { %1324 = vst.msk [vmem:[#allocation5 + $0x20] sm:$0xff] %vm718_vm5, %v1322_v47  ;;  %2511 = vrcp.f32 %v1611_v17 }
 0x3d3   : > { %v1321_v57 = vpop.xlane.xlu0 %1320 }
 0x3d4   : > { %v1323_v28 = vadd.f32 %v1321_v57, %v1315_v51 }
 0x3d5   : > { %v1612_v29 = vld [vmem:[#allocation5 + $0x18] sm:$0xff] }
 0x3d6   : > { %1325 = vst.msk [vmem:[#allocation5 + $0x28] sm:$0xff] %vm718_vm5, %v1323_v28  ;;  %2513 = vrcp.f32 %v1612_v29 }
 0x3d7   : > { %v1494_v36 = vpop.xlane.xlu1 %1493 }
 0x3d8   : > { %v1498_v2 = vadd.f32 %v1494_v36, %v1490_v61 }
 0x3d9   : > { %v1640_v4 = vld [vmem:[#allocation5 + $0x20] sm:$0xff] }
 0x3da   : > { %1500 = vst.msk [vmem:[#allocation5 + $0x30] sm:$0xff] %vm718_vm5, %v1498_v2  ;;  %2515 = vrcp.f32 %v1640_v4 }
 0x3db   : > { %v1497_v7 = vpop.xlane.xlu0 %1496  ;;  %v989_v54 = vpop.permute.xlu1 %988 }
 0x3dc   : > { %v1499_v11 = vadd.f32 %v1497_v7, %v1491_v50  ;;  %v996_v55 = vmul.f32 %v989_v54, %v984_v45 }
 0x3dd   : > { %v1641_v8 = vld [vmem:[#allocation5 + $0x28] sm:$0xff] }
 0x3de   : > { %1501 = vst.msk [vmem:[#allocation5 + $0x38] sm:$0xff] %vm718_vm5, %v1499_v11  ;;  %v1043_v56 = vadd.f32 %v1036_v26, %v996_v55  ;;  %2517 = vrcp.f32 %v1641_v8  ;;  %v2510_v26 = vpop.eup %2509 }
 0x3df   : > { %v2512_v35 = vpop.eup %2511  ;;  %v1154_v37 = vpop.permute.xlu1 %1153 }
 0x3e0   : > { %1045 = vst.msk [vmem:[#allocation6] sm:$0xff] %vm888_vm3, %v1043_v56 }
 0x3e1   : > { %v1669_v19 = vld [vmem:[#allocation5 + $0x30] sm:$0xff] }
 0x3e2   : > { %2519 = vrcp.f32 %v1669_v19 }
 0x3e3   : > { %v994_v59 = vpop.permute.xlu0 %993  ;;  %v2514_v13 = vpop.eup %2513 }
 0x3e4   : > { %v997_v60 = vmul.f32 %v994_v59, %v985_v58  ;;  %v1159_v44 = vpop.permute.xlu1 %1158 }
 0x3e5   : > { %v1670_v10 = vld [vmem:[#allocation5 + $0x38] sm:$0xff] }
 0x3e6   : > { %v1044_v62 = vadd.f32 %v1039_v9, %v997_v60  ;;  %2521 = vrcp.f32 %v1670_v10 }
 0x3e7   : > { %v2516_v15 = vpop.eup %2515  ;;  %v1149_v38 = vld [vmem:[#allocation6] sm:$0xff] }
 0x3e8   : > { %1046 = vst.msk [vmem:[#allocation6 + $0x8] sm:$0xff] %vm888_vm3, %v1044_v62 }
 0x3eb   : > { %v2518_v16 = vpop.eup %2517 }
 0x3ef   : > { %v2520_v18 = vpop.eup %2519  ;;  %v1150_v41 = vld [vmem:[#allocation6 + $0x8] sm:$0xff] }
 0x3f3   : > { %v2522_v21 = vpop.eup %2521 }
 0x403   : > { %v1205_v63 = vpop.f32.mrf.mxu0 }
 0x404   : > { %1214 = vrot.lane.b32.xlu0 %v1205_v63, %s2564_s18 }
 0x405   : > { %v2359_v3 = vpop.f32.mrf.mxu0 }
 0x407   : > { %v1208_v14 = vpop.f32.mrf.mxu0 }
 0x408   : > { %1216 = vrot.lane.b32.xlu1 %v1208_v14, %s2564_s18  ;;  %1330 = vperm.xlu0 %2455, %v2500_v39   ;;  %v1161_v39 = vmul.f32 %v1154_v37, %v1149_v38 }
 0x409   : > { %v2360_v20 = vpop.f32.mrf.mxu0 }
 0x40b   : > { %v1381_v27 = vpop.f32.mrf.mxu0 }
 0x40c   : > { %1335 = vperm.xlu1 %2456, %v2502_v46   ;;  %1506 = vperm.xlu0 %2455, %v2504_v52   ;;  %v1162_v46 = vmul.f32 %v1159_v44, %v1150_v41 }
 0x40d   : > { %v2371_v31 = vpop.f32.mrf.mxu0 }
 0x40f   : > { %v1384_v48 = vpop.f32.mrf.mxu0 }
 0x410   : > { %1511 = vperm.xlu1 %2456, %v2506_v32   ;;  %1390 = vrot.lane.b32.xlu0 %v1381_v27, %s2565_s27 }
 0x411   : > { %v2372_v5 = vpop.f32.mrf.mxu0 }
 0x413   : > { %v1557_v33 = vpop.f32.mrf.mxu0 }
 0x414   : > { %1392 = vrot.lane.b32.xlu1 %v1384_v48, %s2565_s27  ;;  %1590 = vperm.xlu0 %2455, %v2508_v30  }
 0x415   : > { %v2383_v24 = vpop.f32.mrf.mxu0 }
 0x417   : > { %v1560_v9 = vpop.f32.mrf.mxu0 }
 0x418   : > { %1619 = vperm.xlu0 %2455, %v2512_v35   ;;  %1595 = vperm.xlu1 %2456, %v2510_v26  }
 0x419   : > { %v2384_v12 = vpop.f32.mrf.mxu0 }
 0x41c   : > { %1566 = vrot.lane.b32.xlu0 %v1557_v33, %s2566_s28  ;;  %1624 = vperm.xlu1 %2456, %v2514_v13  }
 0x420   : > { %1568 = vrot.lane.b32.xlu1 %v1560_v9, %s2566_s28  ;;  %1648 = vperm.xlu0 %2455, %v2516_v15  }
 0x424   : > { %1653 = vperm.xlu1 %2456, %v2518_v16   ;;  %1677 = vperm.xlu0 %2455, %v2520_v18  }
 0x428   : > { %1682 = vperm.xlu1 %2456, %v2522_v21  }
 0x476   : > { %v1215_v22 = vpop.permute.xlu0 %1214 }
 0x477   : > { %v1220_v42 = vadd.f32 %v1215_v22, %v1161_v39 }
 0x479   : > { %1223 = vst.msk [vmem:[#allocation6] sm:$0xff] %vm1222_vm6, %v1220_v42 }
 0x47a   : > { %v1217_v49 = vpop.permute.xlu1 %1216 }
 0x47b   : > { %v1221_v23 = vadd.f32 %v1217_v49, %v1162_v46 }
 0x47d   : > { %1224 = vst.msk [vmem:[#allocation6 + $0x8] sm:$0xff] %vm1222_vm6, %v1221_v23 }
 0x480   : > { %v1326_v57 = vld [vmem:[#allocation6] sm:$0xff] }
 0x483   : > { %v1331_v47 = vpop.permute.xlu0 %1330 }
 0x484   : > { %v1338_v25 = vmul.f32 %v1331_v47, %v1326_v57  ;;  %v1327_v36 = vld [vmem:[#allocation6 + $0x8] sm:$0xff]  ;;  %v2469_v57 = vld [vmem:[%s3069_s11 + $0x8] sm:$0xff]  }
 0x485   : > { %2394 = vmatpush3.bf16.msra.mxu0 %v2469_v57 }
 0x486   : > { %2395 = vmatprep.subr.bf16.mxu0 %v2557_v1 }
 0x487   : > { %v1507_v51 = vpop.permute.xlu0 %1506  ;;  %v1336_v52 = vpop.permute.xlu1 %1335 }
 0x488   : > { %v1339_v40 = vmul.f32 %v1336_v52, %v1327_v36  ;;  %v2468_v52 = vld [vmem:[%s3068_s10] sm:$0xff]  }
 0x48b   : > { %v1391_v28 = vpop.permute.xlu0 %1390  ;;  %v1512_v61 = vpop.permute.xlu1 %1511 }
 0x48c   : > { %v1396_v32 = vadd.f32 %v1391_v28, %v1338_v25  ;;  %v2470_v25 = vld [vmem:[%s3069_s11] sm:$0xff]  }
 0x48d   : > { %2396 = vmatpush3.bf16.msra.mxu0 %v2470_v25 }
 0x48e   : > { %1399 = vst.msk [vmem:[#allocation6] sm:$0xff] %vm1398_vm7, %v1396_v32  ;;  %2409 = vmatprep.subr.bf16.mxu0 %v2557_v1 }
 0x48f   : > { %v1591_v2 = vpop.permute.xlu0 %1590  ;;  %v1393_v45 = vpop.permute.xlu1 %1392 }
 0x490   : > { %v1397_v50 = vadd.f32 %v1393_v45, %v1339_v40 }
 0x492   : > { %1400 = vst.msk [vmem:[#allocation6 + $0x8] sm:$0xff] %vm1398_vm7, %v1397_v50 }
 0x493   : > { %v1620_v7 = vpop.permute.xlu0 %1619  ;;  %v1596_v54 = vpop.permute.xlu1 %1595 }
 0x495   : > { %v1502_v11 = vld [vmem:[#allocation6] sm:$0xff] }
 0x496   : > { %v1514_v55 = vmul.f32 %v1507_v51, %v1502_v11  ;;  %v2467_v51 = vld [vmem:[%s3068_s10 + $0x8] sm:$0xff]  }
 0x497   : > { %v1567_v56 = vpop.permute.xlu0 %1566  ;;  %v1625_v58 = vpop.permute.xlu1 %1624 }
 0x498   : > { %v1572_v59 = vadd.f32 %v1567_v56, %v1514_v55  ;;  %v2244_v55 = vld [vmem:[%s3067_s9] ss:$0 sm:$0xff] }
 0x499   : > { %v1503_v60 = vld [vmem:[#allocation6 + $0x8] sm:$0xff] }
 0x49a   : > { %1575 = vst.msk [vmem:[#allocation6] sm:$0xff] %vm1574_vm8, %v1572_v59  ;;  %v1515_v62 = vmul.f32 %v1512_v61, %v1503_v60  ;;  %v2471_v60 = vld [vmem:[%s3070_s12 + $0x18] sm:$0xff]  }
 0x49b   : > { %v1569_v63 = vpop.permute.xlu1 %1568  ;;  %v1649_v0 = vpop.permute.xlu0 %1648 }
 0x49c   : > { %v1573_v3 = vadd.f32 %v1569_v63, %v1515_v62 }
 0x49e   : > { %1576 = vst.msk [vmem:[#allocation6 + $0x8] sm:$0xff] %vm1574_vm8, %v1573_v3 }
 0x49f   : > { %v1654_v43 = vpop.permute.xlu1 %1653  ;;  %v1678_v29 = vpop.permute.xlu0 %1677 }
 0x4a1   : > { %v1586_v14 = vld [vmem:[#allocation6] sm:$0xff] }
 0x4a2   : > { %v1598_v17 = vmul.f32 %v1591_v2, %v1586_v14  ;;  %v1627_v20 = vmul.f32 %v1620_v7, %v1586_v14  ;;  %v1656_v27 = vmul.f32 %v1649_v0, %v1586_v14  ;;  %v1685_v31 = vmul.f32 %v1678_v29, %v1586_v14  ;;  %v2243_v7 = vld [vmem:[%s3066_s8] ss:$0 sm:$0xff] }
 0x4a3   : > { %v1683_v24 = vpop.permute.xlu1 %1682 }
 0x4a4   : > { %v2266_v48 = vpack.c.bf16 %v1598_v17, %v1598_v17  ;;  %v2268_v4 = vpack.c.bf16 %v1627_v20, %v1627_v20  ;;  %v2270_v8 = vpack.c.bf16 %v1656_v27, %v1656_v27  ;;  %v2272_v26 = vpack.c.bf16 %v1685_v31, %v1685_v31  ;;  %v2473_v17 = vld [vmem:[%s3070_s12 + $0x8] sm:$0xff]   ;;  %v2474_v20 = vld [vmem:[%s3070_s12] sm:$0xff]  }
 0x4a5   : > { %v1587_v5 = vld [vmem:[#allocation6 + $0x8] sm:$0xff] }
 0x4a6   : > { %1609 = vst.msk [vmem:[#allocation3] sm:$0xf] %vm1608_vm9, %v2266_v48  ;;  %v1599_v30 = vmul.f32 %v1596_v54, %v1587_v5  ;;  %v1628_v33 = vmul.f32 %v1625_v58, %v1587_v5  ;;  %v1657_v19 = vmul.f32 %v1654_v43, %v1587_v5  ;;  %v1686_v35 = vmul.f32 %v1683_v24, %v1587_v5  ;;  %v2472_v43 = vld [vmem:[%s3070_s12 + $0x10] sm:$0xff]  }
 0x4a7   : > { %1638 = vst.msk [vmem:[#allocation3] sm:$0xf] %vm1637_vm10, %v2268_v4 }
 0x4a8   : > { %1667 = vst.msk [vmem:[#allocation3] sm:$0xf] %vm1666_vm11, %v2270_v8  ;;  %v2267_v9 = vpack.c.bf16 %v1599_v30, %v1599_v30  ;;  %v2269_v10 = vpack.c.bf16 %v1628_v33, %v1628_v33  ;;  %v2271_v12 = vpack.c.bf16 %v1657_v19, %v1657_v19  ;;  %v2273_v13 = vpack.c.bf16 %v1686_v35, %v1686_v35 }
 0x4a9   : > { %1696 = vst.msk [vmem:[#allocation3] sm:$0xf] %vm1695_vm12, %v2272_v26 }
 0x4aa   : > { %1610 = vst.msk [vmem:[#allocation3 + $0x4] sm:$0xf] %vm1608_vm9, %v2267_v9 }
 0x4ab   : > { %1639 = vst.msk [vmem:[#allocation3 + $0x4] sm:$0xf] %vm1637_vm10, %v2269_v10 }
 0x4ac   : > { %1668 = vst.msk [vmem:[#allocation3 + $0x4] sm:$0xf] %vm1666_vm11, %v2271_v12 }
 0x4ad   : > { %1697 = vst.msk [vmem:[#allocation3 + $0x4] sm:$0xf] %vm1695_vm12, %v2273_v13 }
 0x4b4   : > { %v2466_v15 = vld [vmem:[#allocation3] sm:$0xff]  }
 0x4b5   : > { %2390 = vmatmul.mubr.msk.bf16.vlgmr.msra.gmra.mxu1 %vm662_vm1, %v2466_v15 }
 0x4b6   : > { %2405 = vmatprep.mubr.msk.bf16.mxu1 %vm2558_vm0, %v2557_v1  ;;  %2402 = vmatpush3.bf16.msra.mxu1 %v2467_v51 }
 0x4b7   : > { %2403 = vmatprep.subr.bf16.mxu1 %v2557_v1 }
 0x4ba   : > { %2404 = vmatpush3.bf16.msra.mxu1 %v2468_v52 }
 0x4bd   : > { %2406 = vmatmul.mubr.msk.bf16.vlgmr.msra.gmra.mxu1 %vm662_vm1, %v2703_v6 }
 0x575   : > { %v1758_v16 = vpop.f32.mrf.mxu1 }
 0x576   : > { %v1767_v18 = vsel %vm662_vm1, %v1758_v16, 0.0 }
 0x577   : > { %1768 = vadd.xlane.f32.xlu0 %v1767_v18  ;;  %v2391_v21 = vpop.f32.mrf.mxu1 }
 0x579   : > { %v1761_v53 = vpop.f32.mrf.mxu1 }
 0x57a   : > { %v1770_v34 = vsel %vm662_vm1, %v1761_v53, 0.0 }
 0x57b   : > { %1771 = vadd.xlane.f32.xlu1 %v1770_v34  ;;  %v2392_v37 = vpop.f32.mrf.mxu1 }
 0x57d   : > { %v1924_v63 = vpop.f32.mrf.mxu1 }
 0x57f   : > { %v2407_v0 = vpop.f32.mrf.mxu1 }
 0x581   : > { %v1927_v3 = vpop.f32.mrf.mxu1 }
 0x583   : > { %v2408_v14 = vpop.f32.mrf.mxu1 }
 0x600   : > { %v1769_v38 = vpop.xlane.xlu0 %1768 }
 0x601   : > { %v1774_v39 = vmul.f32 0.03125, %v1769_v38 }
 0x603   : > { %v1776_v41 = vsub.f32 %v1758_v16, %v1774_v39 }
 0x604   : > { %v1772_v44 = vpop.xlane.xlu1 %1771 }
 0x605   : > { %v1775_v22 = vmul.f32 0.03125, %v1772_v44  ;;  %v1778_v42 = vmul.f32 %v1776_v41, %v1776_v41 }
 0x607   : > { %v1777_v46 = vsub.f32 %v1761_v53, %v1775_v22  ;;  %v1780_v49 = vsel %vm662_vm1, %v1778_v42, 0.0 }
 0x608   : > { %1781 = vadd.xlane.f32.xlu0 %v1780_v49  ;;  %v2256_v49 = vld [vmem:[%s3071_s13] ss:$0 sm:$0xff] }
 0x609   : > { %v1779_v23 = vmul.f32 %v1777_v46, %v1777_v46 }
 0x60b   : > { %v1783_v47 = vsel %vm662_vm1, %v1779_v23, 0.0 }
 0x60c   : > { %1784 = vadd.xlane.f32.xlu0 %v1783_v47  ;;  %v2257_v47 = vld [vmem:[%s3072_s14] ss:$0 sm:$0xff] }
 0x691   : > { %v1782_v28 = vpop.xlane.xlu0 %1781 }
 0x692   : > { %v1786_v61 = vmul.f32 0.03125, %v1782_v28  ;;  %v2531_v28 = vld [vmem:[%s2694_s16] sm:$0xff] }
 0x694   : > { %v1788_v32 = vadd.f32 1e-05, %v1786_v61 }
 0x695   : > { %v1785_v36 = vpop.xlane.xlu0 %1784 }
 0x696   : > { %2523 = vrsqrt.f32 %v1788_v32  ;;  %v1787_v40 = vmul.f32 0.03125, %v1785_v36 }
 0x698   : > { %v1789_v2 = vadd.f32 1e-05, %v1787_v40  ;;  %v2532_v40 = vld [vmem:[%s2694_s16 + $0x8] sm:$0xff] }
 0x69a   : > { %2525 = vrsqrt.f32 %v1789_v2 }
 0x6a3   : > { %v2524_v45 = vpop.eup %2523 }
 0x6a4   : > { %v1792_v50 = vmul.f32 %v2524_v45, %v1776_v41 }
 0x6a6   : > { %v1800_v11 = vmul.f32 %v2243_v7, %v1792_v50 }
 0x6a7   : > { %v2526_v6 = vpop.eup %2525 }
 0x6a8   : > { %v1793_v54 = vmul.f32 %v2526_v6, %v1777_v46  ;;  %v1808_v58 = vadd.f32 %v2244_v55, %v1800_v11 }
 0x6aa   : > { %v1801_v56 = vmul.f32 %v2243_v7, %v1793_v54 }
 0x6ac   : > { %v1809_v59 = vadd.f32 %v2244_v55, %v1801_v56 }
 0x6ae   : > { %v1814_v62 = vpack.c.bf16 %v1809_v59, %v1808_v58 }
 0x6b0   : > { %2398 = vmatmul.mubr.msk.bf16.vlgmr.msra.gmra.mxu0 %vm662_vm1, %v1814_v62 }
 0x6b1   : > { %2410 = vmatpush3.bf16.msra.mxu0 %v2471_v60  ;;  %2417 = vmatprep.mubr.msk.bf16.mxu0 %vm2558_vm0, %v2557_v1 }
 0x6b2   : > { %2411 = vmatprep.subr.bf16.mxu0 %v2557_v1 }
 0x6b5   : > { %2412 = vmatpush3.bf16.msra.mxu0 %v2472_v43 }
 0x6b6   : > { %2413 = vmatprep.subr.bf16.mxu0 %v2557_v1 }
 0x6b9   : > { %2414 = vmatpush3.bf16.msra.mxu0 %v2473_v17 }
 0x6ba   : > { %2415 = vmatprep.subr.bf16.mxu0 %v2557_v1 }
 0x6bd   : > { %2416 = vmatpush3.bf16.msra.mxu0 %v2474_v20 }
 0x770   : > { %v1868_v27 = vpop.f32.mrf.mxu0 }
 0x771   : > { %v1925_v31 = vadd.f32 %v1924_v63, %v1868_v27 }
 0x772   : > { %v2399_v29 = vpop.f32.mrf.mxu0 }
 0x773   : > { %v1931_v8 = vmax.f32 %v1925_v31, 0.0 }
 0x774   : > { %v1871_v48 = vpop.f32.mrf.mxu0 }
 0x775   : > { %v1928_v4 = vadd.f32 %v1927_v3, %v1871_v48 }
 0x776   : > { %v2400_v5 = vpop.f32.mrf.mxu0 }
 0x777   : > { %v1932_v30 = vmax.f32 %v1928_v4, 0.0 }
 0x779   : > { %v1933_v33 = vpack.c.bf16 %v1932_v30, %v1931_v8 }
 0x77b   : > { %2418 = vmatmul.mubr.msk.bf16.vlgmr.msra.gmra.mxu0 %vm1966_vm13, %v1933_v33 }
 0x83b   : > { %v2004_v19 = vpop.f32.mrf.mxu0 }
 0x83c   : > { %v2013_v24 = vsel %vm662_vm1, %v2004_v19, 0.0 }
 0x83d   : > { %2014 = vadd.xlane.f32.xlu1 %v2013_v24  ;;  %v2419_v1 = vpop.f32.mrf.mxu0 }
 0x83f   : > { %v2007_v26 = vpop.f32.mrf.mxu0 }
 0x840   : > { %v2016_v35 = vsel %vm662_vm1, %v2007_v26, 0.0 }
 0x841   : > { %2017 = vadd.xlane.f32.xlu0 %v2016_v35  ;;  %v2420_v9 = vpop.f32.mrf.mxu0 }
 0x8c6   : > { %v2015_v10 = vpop.xlane.xlu1 %2014 }
 0x8c7   : > { %v2019_v12 = vmul.f32 0.03125, %v2015_v10 }
 0x8c9   : > { %v2021_v13 = vsub.f32 %v2004_v19, %v2019_v12 }
 0x8ca   : > { %v2018_v15 = vpop.xlane.xlu0 %2017 }
 0x8cb   : > { %v2020_v16 = vmul.f32 0.03125, %v2018_v15  ;;  %v2023_v18 = vmul.f32 %v2021_v13, %v2021_v13 }
 0x8cd   : > { %v2022_v21 = vsub.f32 %v2007_v26, %v2020_v16  ;;  %v2025_v53 = vsel %vm662_vm1, %v2023_v18, 0.0 }
 0x8ce   : > { %2026 = vadd.xlane.f32.xlu1 %v2025_v53 }
 0x8cf   : > { %v2024_v34 = vmul.f32 %v2022_v21, %v2022_v21 }
 0x8d1   : > { %v2028_v37 = vsel %vm662_vm1, %v2024_v34, 0.0 }
 0x8d2   : > { %2029 = vadd.xlane.f32.xlu0 %v2028_v37 }
 0x957   : > { %v2027_v38 = vpop.xlane.xlu1 %2026 }
 0x958   : > { %v2031_v39 = vmul.f32 0.03125, %v2027_v38 }
 0x95a   : > { %v2033_v41 = vadd.f32 1e-05, %v2031_v39 }
 0x95b   : > { %v2030_v44 = vpop.xlane.xlu0 %2029 }
 0x95c   : > { %2527 = vrsqrt.f32 %v2033_v41  ;;  %v2032_v22 = vmul.f32 0.03125, %v2030_v44 }
 0x95e   : > { %v2034_v42 = vadd.f32 1e-05, %v2032_v22 }
 0x960   : > { %2529 = vrsqrt.f32 %v2034_v42 }
 0x969   : > { %v2528_v46 = vpop.eup %2527 }
 0x96a   : > { %v2037_v23 = vmul.f32 %v2528_v46, %v2021_v13 }
 0x96c   : > { %v2045_v51 = vmul.f32 %v2256_v49, %v2037_v23 }
 0x96d   : > { %v2530_v52 = vpop.eup %2529 }
 0x96e   : > { %v2053_v57 = vadd.f32 %v2257_v47, %v2045_v51  ;;  %v2038_v25 = vmul.f32 %v2530_v52, %v2022_v21 }
 0x970   : > { %v2055_v61 = vadd.f32 %v2531_v28, %v2053_v57  ;;  %v2046_v32 = vmul.f32 %v2256_v49, %v2038_v25 }
 0x972   : > { %2057 = vst.msk [vmem:[%s636_s22] sm:$0xff] %vm662_vm1, %v2055_v61  ;;  %v2054_v36 = vadd.f32 %v2257_v47, %v2046_v32 }
 0x974   : > { %v2056_v2 = vadd.f32 %v2532_v40, %v2054_v36 }
 0x976   : > { %2058 = vst.msk [vmem:[%s636_s22 + $0x8] sm:$0xff] %vm662_vm1, %v2056_v2 }
 0x977 PF: > { %s25_s20 = sadd.s32 1, %s2555_s20   ;;  %s3074_s18 = smov %s2551_s19 }
 0x978   : > { %p22_p5 = scmp.ge.s32.totalorder %s25_s20, 4   ;;  %s3075_s19 = smov %s3077_s21 }
 0x97a   :  { %24 = sbr.rel (!%p22_p5) target bundleno = 2 (0x2), region = 133 }

</bundles_post_ra>
